<compile_context>
chip_gen: v5e
topology: v5e:2x2
jax: 0.10.0
libtpu: 0.0.40
codegen_flags: <defaults>
</compile_context>

<pallas_src>
import functools
import math

import jax
import jax.numpy as jnp
from jax.experimental import pallas as pl
from jax.experimental.pallas import tpu as pltpu

LANE = 128  # TPU lane width; classifier output padded to this for dense stores


# ----------------------------------------------------------------------------
# Fused kernel: PE add + num_layers encoder layers + mean-pool + classifier.
#
# consts_ref layout (f32, padded to width W = max(3D, F, D, Cp)):
#   rows 8l .. 8l+7  : [bqkv(3D), bo(D), b1(F), b2(D), g1(D), be1(D), g2(D), be2(D)]
#   rows 8L .. 8L+S-1: positional encoding rows (D wide)
#   row  8L+S        : classifier bias (Cp wide)
# ----------------------------------------------------------------------------
def vit_fused_kernel(x_ref, wqkv_ref, wo_ref, w1_ref, w2_ref, wh_ref, consts_ref,
                     o_ref, *, nhead, num_layers):
    B, S, D = x_ref.shape
    F = w1_ref.shape[-1]
    Cp = wh_ref.shape[-1]
    H = nhead
    hd = D // H
    BS = B * S
    L = num_layers
    scale = 1.0 / math.sqrt(hd)

    pe_row = 8 * L
    bh_row = pe_row + S

    # Positional-encoding add fused into the kernel (cheap VPU filler).
    pe = consts_ref[pe_row:pe_row + S, :D]                             # (S, D) f32
    x = x_ref[...].astype(jnp.float32) + pe[None, :, :]                # (B, S, D)
    xb = x.reshape(BS, D)                                              # (B*S, D)

    for l in range(L):                               # static unrolled layer loop
        r = 8 * l
        bqkv = consts_ref[r + 0:r + 1, :3 * D]       # (1, 3D)
        bo   = consts_ref[r + 1:r + 2, :D]
        b1   = consts_ref[r + 2:r + 3, :F]
        b2   = consts_ref[r + 3:r + 4, :D]
        g1   = consts_ref[r + 4:r + 5, :D]
        be1  = consts_ref[r + 5:r + 6, :D]
        g2   = consts_ref[r + 6:r + 7, :D]
        be2  = consts_ref[r + 7:r + 8, :D]

        x_bf = xb.astype(jnp.bfloat16)

        # --- fused QKV projection: ONE MXU push + ONE bias add --------------
        qkv = jnp.dot(x_bf, wqkv_ref[l],
                      preferred_element_type=jnp.float32) + bqkv       # (BS, 3D)
        qkv3 = qkv.reshape(B, S, 3 * D)                                # (B, S, 3D)

        # Head split via static lane slices of the fused result, regrouped
        # into a head-batched (H*B, S, hd) layout (leading-axis concat only).
        q = jnp.concatenate(
            [qkv3[:, :, 0 * D + h * hd:0 * D + (h + 1) * hd] for h in range(H)],
            axis=0) * scale
        k = jnp.concatenate(
            [qkv3[:, :, 1 * D + h * hd:1 * D + (h + 1) * hd] for h in range(H)],
            axis=0)
        v = jnp.concatenate(
            [qkv3[:, :, 2 * D + h * hd:2 * D + (h + 1) * hd] for h in range(H)],
            axis=0)
        q = q.astype(jnp.bfloat16)
        k = k.astype(jnp.bfloat16)
        v = v.astype(jnp.bfloat16)

        # Head-batched scores + softmax (f32) + PV: single dot_general each.
        s = jnp.einsum('bqd,bkd->bqk', q, k,
                       preferred_element_type=jnp.float32)             # (H*B, S, S)
        s = s - jnp.max(s, axis=-1, keepdims=True)
        p = jnp.exp(s)
        p = p * pl.reciprocal(jnp.sum(p, axis=-1, keepdims=True), approx=True)
        ctx = jnp.einsum('bqk,bkd->bqd', p.astype(jnp.bfloat16), v,
                         preferred_element_type=jnp.float32)           # (H*B, S, hd)

        # --- fused output projection: heads back along lanes, ONE K=D dot ---
        ctx_c = jnp.concatenate([ctx[h * B:(h + 1) * B] for h in range(H)],
                                axis=-1)                               # (B, S, D)
        attn = jnp.dot(ctx_c.reshape(BS, D).astype(jnp.bfloat16), wo_ref[l],
                       preferred_element_type=jnp.float32) + bo        # (BS, D)

        # --- residual + LayerNorm 1 (f32) ------------------------------------
        y = xb + attn
        mu = jnp.mean(y, axis=-1, keepdims=True)
        var = jnp.mean((y - mu) ** 2, axis=-1, keepdims=True)
        y = (y - mu) * jax.lax.rsqrt(var + 1e-5) * g1 + be1

        # --- feed-forward (bf16 matmuls, f32 accumulate) ----------------------
        h1 = jnp.dot(y.astype(jnp.bfloat16), w1_ref[l],
                     preferred_element_type=jnp.float32) + b1
        h1 = jnp.maximum(h1, 0.0)
        h2 = jnp.dot(h1.astype(jnp.bfloat16), w2_ref[l],
                     preferred_element_type=jnp.float32) + b2

        # --- residual + LayerNorm 2 (f32) ------------------------------------
        z = y + h2
        mu2 = jnp.mean(z, axis=-1, keepdims=True)
        var2 = jnp.mean((z - mu2) ** 2, axis=-1, keepdims=True)
        xb = (z - mu2) * jax.lax.rsqrt(var2 + 1e-5) * g2 + be2

    # --- mean-pool over sequence + classifier head (lane-dense output) --------
    pooled = jnp.mean(xb.reshape(B, S, D), axis=1)                     # (B, D)
    logits = jnp.dot(pooled.astype(jnp.bfloat16), wh_ref[...],
                     preferred_element_type=jnp.float32) \
             + consts_ref[bh_row:bh_row + 1, :Cp]
    o_ref[...] = logits.astype(o_ref.dtype)                            # (B, 128-pad)


# ----------------------------------------------------------------------------
# Parameter construction (PyTorch-like shapes) and kernel-layout packing.
# Weights are stored (in, out) so kernels do `x @ W` (== PyTorch x @ W^T).
# ----------------------------------------------------------------------------
def init_params(key, d_model, nhead, num_layers, dim_feedforward, num_classes):
    layers = []
    for _ in range(num_layers):
        key, *ks = jax.random.split(key, 13)
        k = iter(ks)
        layers.append(dict(
            wqkv=jax.random.normal(next(k), (d_model, 3 * d_model), jnp.float32) * 0.02,
            bqkv=jax.random.normal(next(k), (1, 3 * d_model), jnp.float32) * 0.01,
            wo=jax.random.normal(next(k), (d_model, d_model), jnp.float32) * 0.02,
            bo=jax.random.normal(next(k), (1, d_model), jnp.float32) * 0.01,
            g1=1.0 + jax.random.normal(next(k), (1, d_model), jnp.float32) * 0.01,
            be1=jax.random.normal(next(k), (1, d_model), jnp.float32) * 0.01,
            w1=jax.random.normal(next(k), (d_model, dim_feedforward), jnp.float32) * 0.02,
            b1=jax.random.normal(next(k), (1, dim_feedforward), jnp.float32) * 0.01,
            w2=jax.random.normal(next(k), (dim_feedforward, d_model), jnp.float32) * 0.02,
            b2=jax.random.normal(next(k), (1, d_model), jnp.float32) * 0.01,
            g2=1.0 + jax.random.normal(next(k), (1, d_model), jnp.float32) * 0.01,
            be2=jax.random.normal(next(k), (1, d_model), jnp.float32) * 0.01,
        ))
    key, kh, kb = jax.random.split(key, 3)
    head = dict(
        wh=jax.random.normal(kh, (d_model, num_classes), jnp.float32) * 0.02,
        bh=jax.random.normal(kb, (1, num_classes), jnp.float32) * 0.01,
    )
    return layers, head


def positional_encoding(seq_len, d_model):
    pos = jnp.arange(seq_len, dtype=jnp.float32)[:, None]
    div = jnp.exp(jnp.arange(0, d_model, 2, dtype=jnp.float32)
                  * (-math.log(10000.0) / d_model))
    pe = jnp.zeros((seq_len, d_model), jnp.float32)
    pe = pe.at[:, 0::2].set(jnp.sin(pos * div))
    pe = pe.at[:, 1::2].set(jnp.cos(pos * div))
    return pe                                        # (S, D)


def pack_params(layer_params, head_params, d_model, dim_feedforward,
                num_classes, seq_len, lane=LANE):
    """Repack params into stacked bf16 weights + ONE packed f32 consts array."""
    L = len(layer_params)
    D, F = d_model, dim_feedforward
    Cp = ((num_classes + lane - 1) // lane) * lane
    W = max(3 * D, F, D, Cp)

    # Big matmul operands: stacked per layer, bf16, PyTorch in_proj layout kept
    # (q | k | v along output lanes, heads contiguous within each D block).
    wqkv = jnp.stack([p['wqkv'] for p in layer_params]).astype(jnp.bfloat16)  # (L, D, 3D)
    wo = jnp.stack([p['wo'] for p in layer_params]).astype(jnp.bfloat16)      # (L, D, D)
    w1 = jnp.stack([p['w1'] for p in layer_params]).astype(jnp.bfloat16)      # (L, D, F)
    w2 = jnp.stack([p['w2'] for p in layer_params]).astype(jnp.bfloat16)      # (L, F, D)

    # Classifier head padded to a lane-dense (multiple of 128) output width.
    wh = jnp.pad(head_params['wh'],
                 ((0, 0), (0, Cp - num_classes))).astype(jnp.bfloat16)        # (D, Cp)

    # All small vectors packed into one f32 (R_pad, W) array (single operand).
    def row(v):
        v = jnp.asarray(v, jnp.float32).reshape(-1)
        return jnp.pad(v, (0, W - v.shape[0]))

    rows = []
    for p in layer_params:
        rows += [row(p['bqkv']), row(p['bo']), row(p['b1']), row(p['b2']),
                 row(p['g1']), row(p['be1']), row(p['g2']), row(p['be2'])]
    pe = positional_encoding(seq_len, D)
    rows += [row(pe[s]) for s in range(seq_len)]
    bh = jnp.pad(head_params['bh'].reshape(-1), (0, Cp - num_classes))
    rows += [row(bh)]
    R = len(rows)
    R_pad = ((R + 7) // 8) * 8
    rows += [jnp.zeros((W,), jnp.float32)] * (R_pad - R)
    consts = jnp.stack(rows)                                                  # (R_pad, W)

    return dict(wqkv=wqkv, wo=wo, w1=w1, w2=w2, wh=wh, consts=consts)


# ----------------------------------------------------------------------------
# Full VisionTransformer forward: one fused pallas_call (7 operands).
# ----------------------------------------------------------------------------
def vision_transformer_forward(x, patch_size, nhead, num_layers, packed,
                               num_classes):
    B, C, Him, Wim = x.shape
    patch_dim = C * patch_size ** 2
    num_patches = (Him // patch_size) * (Wim // patch_size)
    assert patch_dim % nhead == 0, "d_model must be divisible by nhead"
    assert patch_dim % 2 == 0, "positional encoding requires even d_model"

    # PyTorch: x.view(B, num_patches, patch_dim) (plain reshape, not a spatial
    # patchify — reproduced exactly).
    xs = x.reshape(B, num_patches, patch_dim).astype(jnp.float32)      # (B, S, D)

    c_pad = packed['wh'].shape[1]
    vmem = pl.BlockSpec(memory_space=pltpu.MemorySpace.VMEM)
    # TODO(synk): for large B on v7x add a "parallel" batch grid axis (2nd TC);
    #             for large models stream per-layer weights instead of keeping
    #             every layer resident in VMEM.
    logits_padded = pl.pallas_call(
        functools.partial(vit_fused_kernel, nhead=nhead, num_layers=num_layers),
        out_shape=jax.ShapeDtypeStruct((B, c_pad), jnp.float32),
        in_specs=[vmem] * 7,
        out_specs=vmem,
    )(xs, packed['wqkv'], packed['wo'], packed['w1'], packed['w2'],
      packed['wh'], packed['consts'])
    return logits_padded[:, :num_classes]


if __name__ == "__main__":
    # Small config: img 16x16, patch 4, 4 channels -> patch_dim = d_model = 64
    B, C, Him, Wim = 2, 4, 16, 16
    patch_size = 4
    d_model = C * patch_size ** 2          # 64
    nhead = 4
    num_layers = 2
    dim_feedforward = 128
    num_classes = 10
    seq_len = (Him // patch_size) * (Wim // patch_size)   # 16

    key = jax.random.PRNGKey(0)
    key, kx = jax.random.split(key)
    x = jax.random.normal(kx, (B, C, Him, Wim), jnp.float32)

    layer_params, head_params = init_params(
        key, d_model, nhead, num_layers, dim_feedforward, num_classes)
    packed = pack_params(layer_params, head_params, d_model, dim_feedforward,
                         num_classes, seq_len)

    out = vision_transformer_forward(x, patch_size, nhead, num_layers,
                                     packed, num_classes)
    out = jax.block_until_ready(out)
    assert out.shape == (B, num_classes), out.shape
    print("KERNEL_OK")
</pallas_src>

<mosaic_0001>
module attributes {stable_mosaic.version = 11 : i64} {
  func.func @vit_fused_kernel(%arg0: memref<2x16x64xf32, #tpu.memory_space<vmem>>, %arg1: memref<2x64x192xbf16, #tpu.memory_space<vmem>>, %arg2: memref<2x64x64xbf16, #tpu.memory_space<vmem>>, %arg3: memref<2x64x128xbf16, #tpu.memory_space<vmem>>, %arg4: memref<2x128x64xbf16, #tpu.memory_space<vmem>>, %arg5: memref<64x128xbf16, #tpu.memory_space<vmem>>, %arg6: memref<40x192xf32, #tpu.memory_space<vmem>>, %arg7: memref<2x128xf32, #tpu.memory_space<vmem>>) attributes {dimension_semantics = [], scalar_prefetch = 0 : i64, scratch_operands = 0 : i64, tpu.core_type = #tpu.core_type<tc>} {
    %c16 = arith.constant 16 : index
    %c0 = arith.constant 0 : index
    %0 = vector.load %arg6[%c16, %c0] : memref<40x192xf32, #tpu.memory_space<vmem>>, vector<16x64xf32>
    %c0_0 = arith.constant 0 : index
    %c0_1 = arith.constant 0 : index
    %c0_2 = arith.constant 0 : index
    %1 = vector.load %arg0[%c0_0, %c0_1, %c0_2] : memref<2x16x64xf32, #tpu.memory_space<vmem>>, vector<2x16x64xf32>
    %2 = vector.shape_cast %0 : vector<16x64xf32> to vector<1x16x64xf32>
    %3 = vector.broadcast %2 : vector<1x16x64xf32> to vector<2x16x64xf32>
    %4 = arith.addf %1, %3 : vector<2x16x64xf32>
    %5 = vector.shape_cast %4 : vector<2x16x64xf32> to vector<32x64xf32>
    %c0_3 = arith.constant 0 : index
    %c0_4 = arith.constant 0 : index
    %6 = vector.load %arg6[%c0_3, %c0_4] : memref<40x192xf32, #tpu.memory_space<vmem>>, vector<1x192xf32>
    %c1 = arith.constant 1 : index
    %c0_5 = arith.constant 0 : index
    %7 = vector.load %arg6[%c1, %c0_5] : memref<40x192xf32, #tpu.memory_space<vmem>>, vector<1x64xf32>
    %c2 = arith.constant 2 : index
    %c0_6 = arith.constant 0 : index
    %8 = vector.load %arg6[%c2, %c0_6] : memref<40x192xf32, #tpu.memory_space<vmem>>, vector<1x128xf32>
    %c3 = arith.constant 3 : index
    %c0_7 = arith.constant 0 : index
    %9 = vector.load %arg6[%c3, %c0_7] : memref<40x192xf32, #tpu.memory_space<vmem>>, vector<1x64xf32>
    %c4 = arith.constant 4 : index
    %c0_8 = arith.constant 0 : index
    %10 = vector.load %arg6[%c4, %c0_8] : memref<40x192xf32, #tpu.memory_space<vmem>>, vector<1x64xf32>
    %c5 = arith.constant 5 : index
    %c0_9 = arith.constant 0 : index
    %11 = vector.load %arg6[%c5, %c0_9] : memref<40x192xf32, #tpu.memory_space<vmem>>, vector<1x64xf32>
    %c6 = arith.constant 6 : index
    %c0_10 = arith.constant 0 : index
    %12 = vector.load %arg6[%c6, %c0_10] : memref<40x192xf32, #tpu.memory_space<vmem>>, vector<1x64xf32>
    %c7 = arith.constant 7 : index
    %c0_11 = arith.constant 0 : index
    %13 = vector.load %arg6[%c7, %c0_11] : memref<40x192xf32, #tpu.memory_space<vmem>>, vector<1x64xf32>
    %14 = arith.truncf %5 : vector<32x64xf32> to vector<32x64xbf16>
    %c0_12 = arith.constant 0 : index
    %c0_13 = arith.constant 0 : index
    %c0_14 = arith.constant 0 : index
    %15 = vector.load %arg1[%c0_12, %c0_13, %c0_14] : memref<2x64x192xbf16, #tpu.memory_space<vmem>>, vector<1x64x192xbf16>
    %16 = vector.shape_cast %15 : vector<1x64x192xbf16> to vector<64x192xbf16>
    %cst = arith.constant dense<0.000000e+00> : vector<32x192xf32>
    %17 = tpu.matmul %14, %16, %cst {dimension_numbers = #tpu.dot_dimension_numbers<[1], [0], [0], [1], [0, 0, 1, 1], [], []>} : vector<32x64xbf16>, vector<64x192xbf16>, vector<32x192xf32> -> vector<32x192xf32>
    %18 = vector.broadcast %6 : vector<1x192xf32> to vector<32x192xf32>
    %19 = arith.addf %17, %18 : vector<32x192xf32>
    %20 = vector.shape_cast %19 : vector<32x192xf32> to vector<2x16x192xf32>
    %21 = vector.extract_strided_slice %20 {offsets = [0, 0, 0], sizes = [2, 16, 16], strides = [1, 1, 1]} : vector<2x16x192xf32> to vector<2x16x16xf32>
    %22 = vector.extract_strided_slice %20 {offsets = [0, 0, 16], sizes = [2, 16, 16], strides = [1, 1, 1]} : vector<2x16x192xf32> to vector<2x16x16xf32>
    %23 = vector.extract_strided_slice %20 {offsets = [0, 0, 32], sizes = [2, 16, 16], strides = [1, 1, 1]} : vector<2x16x192xf32> to vector<2x16x16xf32>
    %24 = vector.extract_strided_slice %20 {offsets = [0, 0, 48], sizes = [2, 16, 16], strides = [1, 1, 1]} : vector<2x16x192xf32> to vector<2x16x16xf32>
    %25 = tpu.concatenate %21, %22, %23, %24 in 0 : vector<2x16x16xf32>, vector<2x16x16xf32>, vector<2x16x16xf32>, vector<2x16x16xf32> -> vector<8x16x16xf32>
    %cst_15 = arith.constant 2.500000e-01 : f32
    %26 = vector.broadcast %cst_15 : f32 to vector<8x16x16xf32>
    %27 = arith.mulf %25, %26 : vector<8x16x16xf32>
    %28 = vector.extract_strided_slice %20 {offsets = [0, 0, 64], sizes = [2, 16, 16], strides = [1, 1, 1]} : vector<2x16x192xf32> to vector<2x16x16xf32>
    %29 = vector.extract_strided_slice %20 {offsets = [0, 0, 80], sizes = [2, 16, 16], strides = [1, 1, 1]} : vector<2x16x192xf32> to vector<2x16x16xf32>
    %30 = vector.extract_strided_slice %20 {offsets = [0, 0, 96], sizes = [2, 16, 16], strides = [1, 1, 1]} : vector<2x16x192xf32> to vector<2x16x16xf32>
    %31 = vector.extract_strided_slice %20 {offsets = [0, 0, 112], sizes = [2, 16, 16], strides = [1, 1, 1]} : vector<2x16x192xf32> to vector<2x16x16xf32>
    %32 = tpu.concatenate %28, %29, %30, %31 in 0 : vector<2x16x16xf32>, vector<2x16x16xf32>, vector<2x16x16xf32>, vector<2x16x16xf32> -> vector<8x16x16xf32>
    %33 = vector.extract_strided_slice %20 {offsets = [0, 0, 128], sizes = [2, 16, 16], strides = [1, 1, 1]} : vector<2x16x192xf32> to vector<2x16x16xf32>
    %34 = vector.extract_strided_slice %20 {offsets = [0, 0, 144], sizes = [2, 16, 16], strides = [1, 1, 1]} : vector<2x16x192xf32> to vector<2x16x16xf32>
    %35 = vector.extract_strided_slice %20 {offsets = [0, 0, 160], sizes = [2, 16, 16], strides = [1, 1, 1]} : vector<2x16x192xf32> to vector<2x16x16xf32>
    %36 = vector.extract_strided_slice %20 {offsets = [0, 0, 176], sizes = [2, 16, 16], strides = [1, 1, 1]} : vector<2x16x192xf32> to vector<2x16x16xf32>
    %37 = tpu.concatenate %33, %34, %35, %36 in 0 : vector<2x16x16xf32>, vector<2x16x16xf32>, vector<2x16x16xf32>, vector<2x16x16xf32> -> vector<8x16x16xf32>
    %38 = arith.truncf %27 : vector<8x16x16xf32> to vector<8x16x16xbf16>
    %39 = arith.truncf %32 : vector<8x16x16xf32> to vector<8x16x16xbf16>
    %40 = arith.truncf %37 : vector<8x16x16xf32> to vector<8x16x16xbf16>
    "tpu.trace_start"() <{level = 10 : i32, message = "bqd,bkd->bqk"}> : () -> ()
    %cst_16 = arith.constant dense<0.000000e+00> : vector<8x16x16xf32>
    %41 = tpu.matmul %38, %39, %cst_16 {dimension_numbers = #tpu.dot_dimension_numbers<[2], [2], [1], [1], [0, 0, 0, 1, 1, 1], [0], [0]>} : vector<8x16x16xbf16>, vector<8x16x16xbf16>, vector<8x16x16xf32> -> vector<8x16x16xf32>
    "tpu.trace_stop"() : () -> ()
    %cst_17 = arith.constant dense<0xFF800000> : vector<8x16xf32>
    %42 = vector.multi_reduction <maximumf>, %41, %cst_17 [2] : vector<8x16x16xf32> to vector<8x16xf32>
    %43 = vector.shape_cast %42 : vector<8x16xf32> to vector<8x16x1xf32>
    %44 = vector.broadcast %43 : vector<8x16x1xf32> to vector<8x16x16xf32>
    %45 = arith.subf %41, %44 : vector<8x16x16xf32>
    %46 = math.exp %45 : vector<8x16x16xf32>
    %cst_18 = arith.constant dense<0.000000e+00> : vector<8x16xf32>
    %47 = vector.multi_reduction <add>, %46, %cst_18 [2] : vector<8x16x16xf32> to vector<8x16xf32>
    %48 = vector.shape_cast %47 : vector<8x16xf32> to vector<8x16x1xf32>
    %49 = tpu.reciprocal %48 {approx = true} : vector<8x16x1xf32> -> vector<8x16x1xf32>
    %50 = vector.broadcast %49 : vector<8x16x1xf32> to vector<8x16x16xf32>
    %51 = arith.mulf %46, %50 : vector<8x16x16xf32>
    %52 = arith.truncf %51 : vector<8x16x16xf32> to vector<8x16x16xbf16>
    "tpu.trace_start"() <{level = 10 : i32, message = "bqk,bkd->bqd"}> : () -> ()
    %cst_19 = arith.constant dense<0.000000e+00> : vector<8x16x16xf32>
    %53 = tpu.matmul %52, %40, %cst_19 {dimension_numbers = #tpu.dot_dimension_numbers<[2], [1], [1], [2], [0, 0, 0, 1, 1, 2], [0], [0]>} : vector<8x16x16xbf16>, vector<8x16x16xbf16>, vector<8x16x16xf32> -> vector<8x16x16xf32>
    "tpu.trace_stop"() : () -> ()
    %54 = vector.extract_strided_slice %53 {offsets = [0, 0, 0], sizes = [2, 16, 16], strides = [1, 1, 1]} : vector<8x16x16xf32> to vector<2x16x16xf32>
    %55 = vector.extract_strided_slice %53 {offsets = [2, 0, 0], sizes = [2, 16, 16], strides = [1, 1, 1]} : vector<8x16x16xf32> to vector<2x16x16xf32>
    %56 = vector.extract_strided_slice %53 {offsets = [4, 0, 0], sizes = [2, 16, 16], strides = [1, 1, 1]} : vector<8x16x16xf32> to vector<2x16x16xf32>
    %57 = vector.extract_strided_slice %53 {offsets = [6, 0, 0], sizes = [2, 16, 16], strides = [1, 1, 1]} : vector<8x16x16xf32> to vector<2x16x16xf32>
    %58 = tpu.concatenate %54, %55, %56, %57 in 2 : vector<2x16x16xf32>, vector<2x16x16xf32>, vector<2x16x16xf32>, vector<2x16x16xf32> -> vector<2x16x64xf32>
    %59 = vector.shape_cast %58 : vector<2x16x64xf32> to vector<32x64xf32>
    %60 = arith.truncf %59 : vector<32x64xf32> to vector<32x64xbf16>
    %c0_20 = arith.constant 0 : index
    %c0_21 = arith.constant 0 : index
    %c0_22 = arith.constant 0 : index
    %61 = vector.load %arg2[%c0_20, %c0_21, %c0_22] : memref<2x64x64xbf16, #tpu.memory_space<vmem>>, vector<1x64x64xbf16>
    %62 = vector.shape_cast %61 : vector<1x64x64xbf16> to vector<64x64xbf16>
    %cst_23 = arith.constant dense<0.000000e+00> : vector<32x64xf32>
    %63 = tpu.matmul %60, %62, %cst_23 {dimension_numbers = #tpu.dot_dimension_numbers<[1], [0], [0], [1], [0, 0, 1, 1], [], []>} : vector<32x64xbf16>, vector<64x64xbf16>, vector<32x64xf32> -> vector<32x64xf32>
    %64 = vector.broadcast %7 : vector<1x64xf32> to vector<32x64xf32>
    %65 = arith.addf %63, %64 : vector<32x64xf32>
    %66 = arith.addf %5, %65 : vector<32x64xf32>
    %cst_24 = arith.constant dense<0.000000e+00> : vector<32xf32>
    %67 = vector.multi_reduction <add>, %66, %cst_24 [1] : vector<32x64xf32> to vector<32xf32>
    %68 = vector.shape_cast %67 : vector<32xf32> to vector<32x1xf32>
    %cst_25 = arith.constant 6.400000e+01 : f32
    %69 = vector.broadcast %cst_25 : f32 to vector<32x1xf32>
    %70 = arith.divf %68, %69 : vector<32x1xf32>
    %71 = vector.broadcast %70 : vector<32x1xf32> to vector<32x64xf32>
    %72 = arith.subf %66, %71 : vector<32x64xf32>
    %73 = arith.mulf %72, %72 : vector<32x64xf32>
    %cst_26 = arith.constant dense<0.000000e+00> : vector<32xf32>
    %74 = vector.multi_reduction <add>, %73, %cst_26 [1] : vector<32x64xf32> to vector<32xf32>
    %75 = vector.shape_cast %74 : vector<32xf32> to vector<32x1xf32>
    %cst_27 = arith.constant 6.400000e+01 : f32
    %76 = vector.broadcast %cst_27 : f32 to vector<32x1xf32>
    %77 = arith.divf %75, %76 : vector<32x1xf32>
    %78 = vector.broadcast %70 : vector<32x1xf32> to vector<32x64xf32>
    %79 = arith.subf %66, %78 : vector<32x64xf32>
    %cst_28 = arith.constant 9.99999974E-6 : f32
    %80 = vector.broadcast %cst_28 : f32 to vector<32x1xf32>
    %81 = arith.addf %77, %80 : vector<32x1xf32>
    %82 = math.rsqrt %81 : vector<32x1xf32>
    %83 = vector.broadcast %82 : vector<32x1xf32> to vector<32x64xf32>
    %84 = arith.mulf %79, %83 : vector<32x64xf32>
    %85 = vector.broadcast %10 : vector<1x64xf32> to vector<32x64xf32>
    %86 = arith.mulf %84, %85 : vector<32x64xf32>
    %87 = vector.broadcast %11 : vector<1x64xf32> to vector<32x64xf32>
    %88 = arith.addf %86, %87 : vector<32x64xf32>
    %89 = arith.truncf %88 : vector<32x64xf32> to vector<32x64xbf16>
    %c0_29 = arith.constant 0 : index
    %c0_30 = arith.constant 0 : index
    %c0_31 = arith.constant 0 : index
    %90 = vector.load %arg3[%c0_29, %c0_30, %c0_31] : memref<2x64x128xbf16, #tpu.memory_space<vmem>>, vector<1x64x128xbf16>
    %91 = vector.shape_cast %90 : vector<1x64x128xbf16> to vector<64x128xbf16>
    %cst_32 = arith.constant dense<0.000000e+00> : vector<32x128xf32>
    %92 = tpu.matmul %89, %91, %cst_32 {dimension_numbers = #tpu.dot_dimension_numbers<[1], [0], [0], [1], [0, 0, 1, 1], [], []>} : vector<32x64xbf16>, vector<64x128xbf16>, vector<32x128xf32> -> vector<32x128xf32>
    %93 = vector.broadcast %8 : vector<1x128xf32> to vector<32x128xf32>
    %94 = arith.addf %92, %93 : vector<32x128xf32>
    %cst_33 = arith.constant 0.000000e+00 : f32
    %95 = vector.broadcast %cst_33 : f32 to vector<32x128xf32>
    %96 = arith.maximumf %94, %95 : vector<32x128xf32>
    %97 = arith.truncf %96 : vector<32x128xf32> to vector<32x128xbf16>
    %c0_34 = arith.constant 0 : index
    %c0_35 = arith.constant 0 : index
    %c0_36 = arith.constant 0 : index
    %98 = vector.load %arg4[%c0_34, %c0_35, %c0_36] : memref<2x128x64xbf16, #tpu.memory_space<vmem>>, vector<1x128x64xbf16>
    %99 = vector.shape_cast %98 : vector<1x128x64xbf16> to vector<128x64xbf16>
    %cst_37 = arith.constant dense<0.000000e+00> : vector<32x64xf32>
    %100 = tpu.matmul %97, %99, %cst_37 {dimension_numbers = #tpu.dot_dimension_numbers<[1], [0], [0], [1], [0, 0, 1, 1], [], []>} : vector<32x128xbf16>, vector<128x64xbf16>, vector<32x64xf32> -> vector<32x64xf32>
    %101 = vector.broadcast %9 : vector<1x64xf32> to vector<32x64xf32>
    %102 = arith.addf %100, %101 : vector<32x64xf32>
    %103 = arith.addf %88, %102 : vector<32x64xf32>
    %cst_38 = arith.constant dense<0.000000e+00> : vector<32xf32>
    %104 = vector.multi_reduction <add>, %103, %cst_38 [1] : vector<32x64xf32> to vector<32xf32>
    %105 = vector.shape_cast %104 : vector<32xf32> to vector<32x1xf32>
    %cst_39 = arith.constant 6.400000e+01 : f32
    %106 = vector.broadcast %cst_39 : f32 to vector<32x1xf32>
    %107 = arith.divf %105, %106 : vector<32x1xf32>
    %108 = vector.broadcast %107 : vector<32x1xf32> to vector<32x64xf32>
    %109 = arith.subf %103, %108 : vector<32x64xf32>
    %110 = arith.mulf %109, %109 : vector<32x64xf32>
    %cst_40 = arith.constant dense<0.000000e+00> : vector<32xf32>
    %111 = vector.multi_reduction <add>, %110, %cst_40 [1] : vector<32x64xf32> to vector<32xf32>
    %112 = vector.shape_cast %111 : vector<32xf32> to vector<32x1xf32>
    %cst_41 = arith.constant 6.400000e+01 : f32
    %113 = vector.broadcast %cst_41 : f32 to vector<32x1xf32>
    %114 = arith.divf %112, %113 : vector<32x1xf32>
    %115 = vector.broadcast %107 : vector<32x1xf32> to vector<32x64xf32>
    %116 = arith.subf %103, %115 : vector<32x64xf32>
    %cst_42 = arith.constant 9.99999974E-6 : f32
    %117 = vector.broadcast %cst_42 : f32 to vector<32x1xf32>
    %118 = arith.addf %114, %117 : vector<32x1xf32>
    %119 = math.rsqrt %118 : vector<32x1xf32>
    %120 = vector.broadcast %119 : vector<32x1xf32> to vector<32x64xf32>
    %121 = arith.mulf %116, %120 : vector<32x64xf32>
    %122 = vector.broadcast %12 : vector<1x64xf32> to vector<32x64xf32>
    %123 = arith.mulf %121, %122 : vector<32x64xf32>
    %124 = vector.broadcast %13 : vector<1x64xf32> to vector<32x64xf32>
    %125 = arith.addf %123, %124 : vector<32x64xf32>
    %c8 = arith.constant 8 : index
    %c0_43 = arith.constant 0 : index
    %126 = vector.load %arg6[%c8, %c0_43] : memref<40x192xf32, #tpu.memory_space<vmem>>, vector<1x192xf32>
    %c9 = arith.constant 9 : index
    %c0_44 = arith.constant 0 : index
    %127 = vector.load %arg6[%c9, %c0_44] : memref<40x192xf32, #tpu.memory_space<vmem>>, vector<1x64xf32>
    %c10 = arith.constant 10 : index
    %c0_45 = arith.constant 0 : index
    %128 = vector.load %arg6[%c10, %c0_45] : memref<40x192xf32, #tpu.memory_space<vmem>>, vector<1x128xf32>
    %c11 = arith.constant 11 : index
    %c0_46 = arith.constant 0 : index
    %129 = vector.load %arg6[%c11, %c0_46] : memref<40x192xf32, #tpu.memory_space<vmem>>, vector<1x64xf32>
    %c12 = arith.constant 12 : index
    %c0_47 = arith.constant 0 : index
    %130 = vector.load %arg6[%c12, %c0_47] : memref<40x192xf32, #tpu.memory_space<vmem>>, vector<1x64xf32>
    %c13 = arith.constant 13 : index
    %c0_48 = arith.constant 0 : index
    %131 = vector.load %arg6[%c13, %c0_48] : memref<40x192xf32, #tpu.memory_space<vmem>>, vector<1x64xf32>
    %c14 = arith.constant 14 : index
    %c0_49 = arith.constant 0 : index
    %132 = vector.load %arg6[%c14, %c0_49] : memref<40x192xf32, #tpu.memory_space<vmem>>, vector<1x64xf32>
    %c15 = arith.constant 15 : index
    %c0_50 = arith.constant 0 : index
    %133 = vector.load %arg6[%c15, %c0_50] : memref<40x192xf32, #tpu.memory_space<vmem>>, vector<1x64xf32>
    %134 = arith.truncf %125 : vector<32x64xf32> to vector<32x64xbf16>
    %c1_51 = arith.constant 1 : index
    %c0_52 = arith.constant 0 : index
    %c0_53 = arith.constant 0 : index
    %135 = vector.load %arg1[%c1_51, %c0_52, %c0_53] : memref<2x64x192xbf16, #tpu.memory_space<vmem>>, vector<1x64x192xbf16>
    %136 = vector.shape_cast %135 : vector<1x64x192xbf16> to vector<64x192xbf16>
    %cst_54 = arith.constant dense<0.000000e+00> : vector<32x192xf32>
    %137 = tpu.matmul %134, %136, %cst_54 {dimension_numbers = #tpu.dot_dimension_numbers<[1], [0], [0], [1], [0, 0, 1, 1], [], []>} : vector<32x64xbf16>, vector<64x192xbf16>, vector<32x192xf32> -> vector<32x192xf32>
    %138 = vector.broadcast %126 : vector<1x192xf32> to vector<32x192xf32>
    %139 = arith.addf %137, %138 : vector<32x192xf32>
    %140 = vector.shape_cast %139 : vector<32x192xf32> to vector<2x16x192xf32>
    %141 = vector.extract_strided_slice %140 {offsets = [0, 0, 0], sizes = [2, 16, 16], strides = [1, 1, 1]} : vector<2x16x192xf32> to vector<2x16x16xf32>
    %142 = vector.extract_strided_slice %140 {offsets = [0, 0, 16], sizes = [2, 16, 16], strides = [1, 1, 1]} : vector<2x16x192xf32> to vector<2x16x16xf32>
    %143 = vector.extract_strided_slice %140 {offsets = [0, 0, 32], sizes = [2, 16, 16], strides = [1, 1, 1]} : vector<2x16x192xf32> to vector<2x16x16xf32>
    %144 = vector.extract_strided_slice %140 {offsets = [0, 0, 48], sizes = [2, 16, 16], strides = [1, 1, 1]} : vector<2x16x192xf32> to vector<2x16x16xf32>
    %145 = tpu.concatenate %141, %142, %143, %144 in 0 : vector<2x16x16xf32>, vector<2x16x16xf32>, vector<2x16x16xf32>, vector<2x16x16xf32> -> vector<8x16x16xf32>
    %cst_55 = arith.constant 2.500000e-01 : f32
    %146 = vector.broadcast %cst_55 : f32 to vector<8x16x16xf32>
    %147 = arith.mulf %145, %146 : vector<8x16x16xf32>
    %148 = vector.extract_strided_slice %140 {offsets = [0, 0, 64], sizes = [2, 16, 16], strides = [1, 1, 1]} : vector<2x16x192xf32> to vector<2x16x16xf32>
    %149 = vector.extract_strided_slice %140 {offsets = [0, 0, 80], sizes = [2, 16, 16], strides = [1, 1, 1]} : vector<2x16x192xf32> to vector<2x16x16xf32>
    %150 = vector.extract_strided_slice %140 {offsets = [0, 0, 96], sizes = [2, 16, 16], strides = [1, 1, 1]} : vector<2x16x192xf32> to vector<2x16x16xf32>
    %151 = vector.extract_strided_slice %140 {offsets = [0, 0, 112], sizes = [2, 16, 16], strides = [1, 1, 1]} : vector<2x16x192xf32> to vector<2x16x16xf32>
    %152 = tpu.concatenate %148, %149, %150, %151 in 0 : vector<2x16x16xf32>, vector<2x16x16xf32>, vector<2x16x16xf32>, vector<2x16x16xf32> -> vector<8x16x16xf32>
    %153 = vector.extract_strided_slice %140 {offsets = [0, 0, 128], sizes = [2, 16, 16], strides = [1, 1, 1]} : vector<2x16x192xf32> to vector<2x16x16xf32>
    %154 = vector.extract_strided_slice %140 {offsets = [0, 0, 144], sizes = [2, 16, 16], strides = [1, 1, 1]} : vector<2x16x192xf32> to vector<2x16x16xf32>
    %155 = vector.extract_strided_slice %140 {offsets = [0, 0, 160], sizes = [2, 16, 16], strides = [1, 1, 1]} : vector<2x16x192xf32> to vector<2x16x16xf32>
    %156 = vector.extract_strided_slice %140 {offsets = [0, 0, 176], sizes = [2, 16, 16], strides = [1, 1, 1]} : vector<2x16x192xf32> to vector<2x16x16xf32>
    %157 = tpu.concatenate %153, %154, %155, %156 in 0 : vector<2x16x16xf32>, vector<2x16x16xf32>, vector<2x16x16xf32>, vector<2x16x16xf32> -> vector<8x16x16xf32>
    %158 = arith.truncf %147 : vector<8x16x16xf32> to vector<8x16x16xbf16>
    %159 = arith.truncf %152 : vector<8x16x16xf32> to vector<8x16x16xbf16>
    %160 = arith.truncf %157 : vector<8x16x16xf32> to vector<8x16x16xbf16>
    "tpu.trace_start"() <{level = 10 : i32, message = "bqd,bkd->bqk"}> : () -> ()
    %cst_56 = arith.constant dense<0.000000e+00> : vector<8x16x16xf32>
    %161 = tpu.matmul %158, %159, %cst_56 {dimension_numbers = #tpu.dot_dimension_numbers<[2], [2], [1], [1], [0, 0, 0, 1, 1, 1], [0], [0]>} : vector<8x16x16xbf16>, vector<8x16x16xbf16>, vector<8x16x16xf32> -> vector<8x16x16xf32>
    "tpu.trace_stop"() : () -> ()
    %cst_57 = arith.constant dense<0xFF800000> : vector<8x16xf32>
    %162 = vector.multi_reduction <maximumf>, %161, %cst_57 [2] : vector<8x16x16xf32> to vector<8x16xf32>
    %163 = vector.shape_cast %162 : vector<8x16xf32> to vector<8x16x1xf32>
    %164 = vector.broadcast %163 : vector<8x16x1xf32> to vector<8x16x16xf32>
    %165 = arith.subf %161, %164 : vector<8x16x16xf32>
    %166 = math.exp %165 : vector<8x16x16xf32>
    %cst_58 = arith.constant dense<0.000000e+00> : vector<8x16xf32>
    %167 = vector.multi_reduction <add>, %166, %cst_58 [2] : vector<8x16x16xf32> to vector<8x16xf32>
    %168 = vector.shape_cast %167 : vector<8x16xf32> to vector<8x16x1xf32>
    %169 = tpu.reciprocal %168 {approx = true} : vector<8x16x1xf32> -> vector<8x16x1xf32>
    %170 = vector.broadcast %169 : vector<8x16x1xf32> to vector<8x16x16xf32>
    %171 = arith.mulf %166, %170 : vector<8x16x16xf32>
    %172 = arith.truncf %171 : vector<8x16x16xf32> to vector<8x16x16xbf16>
    "tpu.trace_start"() <{level = 10 : i32, message = "bqk,bkd->bqd"}> : () -> ()
    %cst_59 = arith.constant dense<0.000000e+00> : vector<8x16x16xf32>
    %173 = tpu.matmul %172, %160, %cst_59 {dimension_numbers = #tpu.dot_dimension_numbers<[2], [1], [1], [2], [0, 0, 0, 1, 1, 2], [0], [0]>} : vector<8x16x16xbf16>, vector<8x16x16xbf16>, vector<8x16x16xf32> -> vector<8x16x16xf32>
    "tpu.trace_stop"() : () -> ()
    %174 = vector.extract_strided_slice %173 {offsets = [0, 0, 0], sizes = [2, 16, 16], strides = [1, 1, 1]} : vector<8x16x16xf32> to vector<2x16x16xf32>
    %175 = vector.extract_strided_slice %173 {offsets = [2, 0, 0], sizes = [2, 16, 16], strides = [1, 1, 1]} : vector<8x16x16xf32> to vector<2x16x16xf32>
    %176 = vector.extract_strided_slice %173 {offsets = [4, 0, 0], sizes = [2, 16, 16], strides = [1, 1, 1]} : vector<8x16x16xf32> to vector<2x16x16xf32>
    %177 = vector.extract_strided_slice %173 {offsets = [6, 0, 0], sizes = [2, 16, 16], strides = [1, 1, 1]} : vector<8x16x16xf32> to vector<2x16x16xf32>
    %178 = tpu.concatenate %174, %175, %176, %177 in 2 : vector<2x16x16xf32>, vector<2x16x16xf32>, vector<2x16x16xf32>, vector<2x16x16xf32> -> vector<2x16x64xf32>
    %179 = vector.shape_cast %178 : vector<2x16x64xf32> to vector<32x64xf32>
    %180 = arith.truncf %179 : vector<32x64xf32> to vector<32x64xbf16>
    %c1_60 = arith.constant 1 : index
    %c0_61 = arith.constant 0 : index
    %c0_62 = arith.constant 0 : index
    %181 = vector.load %arg2[%c1_60, %c0_61, %c0_62] : memref<2x64x64xbf16, #tpu.memory_space<vmem>>, vector<1x64x64xbf16>
    %182 = vector.shape_cast %181 : vector<1x64x64xbf16> to vector<64x64xbf16>
    %cst_63 = arith.constant dense<0.000000e+00> : vector<32x64xf32>
    %183 = tpu.matmul %180, %182, %cst_63 {dimension_numbers = #tpu.dot_dimension_numbers<[1], [0], [0], [1], [0, 0, 1, 1], [], []>} : vector<32x64xbf16>, vector<64x64xbf16>, vector<32x64xf32> -> vector<32x64xf32>
    %184 = vector.broadcast %127 : vector<1x64xf32> to vector<32x64xf32>
    %185 = arith.addf %183, %184 : vector<32x64xf32>
    %186 = arith.addf %125, %185 : vector<32x64xf32>
    %cst_64 = arith.constant dense<0.000000e+00> : vector<32xf32>
    %187 = vector.multi_reduction <add>, %186, %cst_64 [1] : vector<32x64xf32> to vector<32xf32>
    %188 = vector.shape_cast %187 : vector<32xf32> to vector<32x1xf32>
    %cst_65 = arith.constant 6.400000e+01 : f32
    %189 = vector.broadcast %cst_65 : f32 to vector<32x1xf32>
    %190 = arith.divf %188, %189 : vector<32x1xf32>
    %191 = vector.broadcast %190 : vector<32x1xf32> to vector<32x64xf32>
    %192 = arith.subf %186, %191 : vector<32x64xf32>
    %193 = arith.mulf %192, %192 : vector<32x64xf32>
    %cst_66 = arith.constant dense<0.000000e+00> : vector<32xf32>
    %194 = vector.multi_reduction <add>, %193, %cst_66 [1] : vector<32x64xf32> to vector<32xf32>
    %195 = vector.shape_cast %194 : vector<32xf32> to vector<32x1xf32>
    %cst_67 = arith.constant 6.400000e+01 : f32
    %196 = vector.broadcast %cst_67 : f32 to vector<32x1xf32>
    %197 = arith.divf %195, %196 : vector<32x1xf32>
    %198 = vector.broadcast %190 : vector<32x1xf32> to vector<32x64xf32>
    %199 = arith.subf %186, %198 : vector<32x64xf32>
    %cst_68 = arith.constant 9.99999974E-6 : f32
    %200 = vector.broadcast %cst_68 : f32 to vector<32x1xf32>
    %201 = arith.addf %197, %200 : vector<32x1xf32>
    %202 = math.rsqrt %201 : vector<32x1xf32>
    %203 = vector.broadcast %202 : vector<32x1xf32> to vector<32x64xf32>
    %204 = arith.mulf %199, %203 : vector<32x64xf32>
    %205 = vector.broadcast %130 : vector<1x64xf32> to vector<32x64xf32>
    %206 = arith.mulf %204, %205 : vector<32x64xf32>
    %207 = vector.broadcast %131 : vector<1x64xf32> to vector<32x64xf32>
    %208 = arith.addf %206, %207 : vector<32x64xf32>
    %209 = arith.truncf %208 : vector<32x64xf32> to vector<32x64xbf16>
    %c1_69 = arith.constant 1 : index
    %c0_70 = arith.constant 0 : index
    %c0_71 = arith.constant 0 : index
    %210 = vector.load %arg3[%c1_69, %c0_70, %c0_71] : memref<2x64x128xbf16, #tpu.memory_space<vmem>>, vector<1x64x128xbf16>
    %211 = vector.shape_cast %210 : vector<1x64x128xbf16> to vector<64x128xbf16>
    %cst_72 = arith.constant dense<0.000000e+00> : vector<32x128xf32>
    %212 = tpu.matmul %209, %211, %cst_72 {dimension_numbers = #tpu.dot_dimension_numbers<[1], [0], [0], [1], [0, 0, 1, 1], [], []>} : vector<32x64xbf16>, vector<64x128xbf16>, vector<32x128xf32> -> vector<32x128xf32>
    %213 = vector.broadcast %128 : vector<1x128xf32> to vector<32x128xf32>
    %214 = arith.addf %212, %213 : vector<32x128xf32>
    %cst_73 = arith.constant 0.000000e+00 : f32
    %215 = vector.broadcast %cst_73 : f32 to vector<32x128xf32>
    %216 = arith.maximumf %214, %215 : vector<32x128xf32>
    %217 = arith.truncf %216 : vector<32x128xf32> to vector<32x128xbf16>
    %c1_74 = arith.constant 1 : index
    %c0_75 = arith.constant 0 : index
    %c0_76 = arith.constant 0 : index
    %218 = vector.load %arg4[%c1_74, %c0_75, %c0_76] : memref<2x128x64xbf16, #tpu.memory_space<vmem>>, vector<1x128x64xbf16>
    %219 = vector.shape_cast %218 : vector<1x128x64xbf16> to vector<128x64xbf16>
    %cst_77 = arith.constant dense<0.000000e+00> : vector<32x64xf32>
    %220 = tpu.matmul %217, %219, %cst_77 {dimension_numbers = #tpu.dot_dimension_numbers<[1], [0], [0], [1], [0, 0, 1, 1], [], []>} : vector<32x128xbf16>, vector<128x64xbf16>, vector<32x64xf32> -> vector<32x64xf32>
    %221 = vector.broadcast %129 : vector<1x64xf32> to vector<32x64xf32>
    %222 = arith.addf %220, %221 : vector<32x64xf32>
    %223 = arith.addf %208, %222 : vector<32x64xf32>
    %cst_78 = arith.constant dense<0.000000e+00> : vector<32xf32>
    %224 = vector.multi_reduction <add>, %223, %cst_78 [1] : vector<32x64xf32> to vector<32xf32>
    %225 = vector.shape_cast %224 : vector<32xf32> to vector<32x1xf32>
    %cst_79 = arith.constant 6.400000e+01 : f32
    %226 = vector.broadcast %cst_79 : f32 to vector<32x1xf32>
    %227 = arith.divf %225, %226 : vector<32x1xf32>
    %228 = vector.broadcast %227 : vector<32x1xf32> to vector<32x64xf32>
    %229 = arith.subf %223, %228 : vector<32x64xf32>
    %230 = arith.mulf %229, %229 : vector<32x64xf32>
    %cst_80 = arith.constant dense<0.000000e+00> : vector<32xf32>
    %231 = vector.multi_reduction <add>, %230, %cst_80 [1] : vector<32x64xf32> to vector<32xf32>
    %232 = vector.shape_cast %231 : vector<32xf32> to vector<32x1xf32>
    %cst_81 = arith.constant 6.400000e+01 : f32
    %233 = vector.broadcast %cst_81 : f32 to vector<32x1xf32>
    %234 = arith.divf %232, %233 : vector<32x1xf32>
    %235 = vector.broadcast %227 : vector<32x1xf32> to vector<32x64xf32>
    %236 = arith.subf %223, %235 : vector<32x64xf32>
    %cst_82 = arith.constant 9.99999974E-6 : f32
    %237 = vector.broadcast %cst_82 : f32 to vector<32x1xf32>
    %238 = arith.addf %234, %237 : vector<32x1xf32>
    %239 = math.rsqrt %238 : vector<32x1xf32>
    %240 = vector.broadcast %239 : vector<32x1xf32> to vector<32x64xf32>
    %241 = arith.mulf %236, %240 : vector<32x64xf32>
    %242 = vector.broadcast %132 : vector<1x64xf32> to vector<32x64xf32>
    %243 = arith.mulf %241, %242 : vector<32x64xf32>
    %244 = vector.broadcast %133 : vector<1x64xf32> to vector<32x64xf32>
    %245 = arith.addf %243, %244 : vector<32x64xf32>
    %246 = vector.shape_cast %245 : vector<32x64xf32> to vector<2x16x64xf32>
    %cst_83 = arith.constant dense<0.000000e+00> : vector<2x64xf32>
    %247 = vector.multi_reduction <add>, %246, %cst_83 [1] : vector<2x16x64xf32> to vector<2x64xf32>
    %cst_84 = arith.constant 1.600000e+01 : f32
    %248 = vector.broadcast %cst_84 : f32 to vector<2x64xf32>
    %249 = arith.divf %247, %248 : vector<2x64xf32>
    %250 = arith.truncf %249 : vector<2x64xf32> to vector<2x64xbf16>
    %c0_85 = arith.constant 0 : index
    %c0_86 = arith.constant 0 : index
    %251 = vector.load %arg5[%c0_85, %c0_86] : memref<64x128xbf16, #tpu.memory_space<vmem>>, vector<64x128xbf16>
    %cst_87 = arith.constant dense<0.000000e+00> : vector<2x128xf32>
    %252 = tpu.matmul %250, %251, %cst_87 {dimension_numbers = #tpu.dot_dimension_numbers<[1], [0], [0], [1], [0, 0, 1, 1], [], []>} : vector<2x64xbf16>, vector<64x128xbf16>, vector<2x128xf32> -> vector<2x128xf32>
    %c32 = arith.constant 32 : index
    %c0_88 = arith.constant 0 : index
    %253 = vector.load %arg6[%c32, %c0_88] : memref<40x192xf32, #tpu.memory_space<vmem>>, vector<1x128xf32>
    %254 = vector.broadcast %253 : vector<1x128xf32> to vector<2x128xf32>
    %255 = arith.addf %252, %254 : vector<2x128xf32>
    %c0_89 = arith.constant 0 : index
    %c0_90 = arith.constant 0 : index
    %256 = vector.load %arg7[%c0_89, %c0_90] : memref<2x128xf32, #tpu.memory_space<vmem>>, vector<2x128xf32>
    tpu.vector_store %arg7[%c0_89, %c0_90], %255 {strides = array<i32>} : memref<2x128xf32, #tpu.memory_space<vmem>>, vector<2x128xf32>,
    return
  }
}

</mosaic_0001>

<bundles_post_ra>
// kernel: tpu_custom_call.1
= control target key start
LH: loop header
LB: loop body
LE: loop exit
PB: predicated region body
PF: predicated region fallthrough
CT: control target
= control target key end

     0   :  { %12 = vsyncpa [#allocation3], 0  ;;  %s4815_s0 = inlined_call_operand.hbm [shape: f32[2,16,64], index: 0, kind: input, shape index: {}]   ;;  %s4816_s1 = inlined_call_operand.vmem [shape: bf16[2,64,192], index: 1, kind: input, shape index: {}]   ;;  %s4817_s2 = inlined_call_operand.vmem [shape: bf16[2,64,64], index: 2, kind: input, shape index: {}]   ;;  %s4818_s3 = inlined_call_operand.hbm [shape: bf16[2,64,128], index: 3, kind: input, shape index: {}]   ;;  %s4819_s4 = inlined_call_operand.vmem [shape: bf16[2,128,64], index: 4, kind: input, shape index: {}]   ;;  %s4820_s5 = inlined_call_operand.hbm [shape: bf16[64,128], index: 5, kind: input, shape index: {}]   ;;  %s4821_s6 = inlined_call_operand.hbm [shape: f32[40,192], index: 6, kind: input, shape index: {}]   ;;  %s4822_s7 = inlined_call_operand.hbm [shape: f32[2,128], index: 7, kind: output, shape index: {}]  }
   0x1   :  { %13 = vsyncpa [#allocation6], 0 }
   0x2   :  { %14 = vsyncpa [#allocation9], 0  ;;  %s37_s26 = sshll.u32 %s4818_s3, 4  ;;  %s38_s26 = int_to_ptr.hbm [resolvable:$true] %s37_s26 }
   0x3   :  { %15 = vsyncpa [#allocation4], 0  ;;  %s3773_s27 = smov [#allocation5]   ;;  %s20_s8 = sshll.u32 %s4815_s0, 4  ;;  %s21_s8 = int_to_ptr.hbm [resolvable:$true] %s20_s8 }
   0x4   :  { %s39_s28 = sshll.u32 %s3773_s27, 4  ;;  %s3774_s9 = smov 64   ;;  %s40_s28 = int_to_ptr.vmem [resolvable:$true] %s39_s28 }
   0x5   :  { %s3775_s10 = smov 4   ;;  %s3776_s11 = smov [#allocation2]  }
   0x6   :  { %45 = dma.hbm_to_vmem [thread:$0]  %s38_s26, 1024, %s40_s28, [#allocation6], %s3774_s9, %s3774_s9, %s3775_s10  }
   0x7   :  { %s22_s12 = sshll.u32 %s3776_s11, 4  ;;  %s3777_s13 = smov 128   ;;  %s23_s12 = int_to_ptr.vmem [resolvable:$true] %s22_s12 }
   0x8   :  { %s3778_s3 = smov 8   ;;  %s52_s16 = sshll.u32 %s4820_s5, 4  ;;  %s53_s16 = int_to_ptr.hbm [resolvable:$true] %s52_s16 }
   0x9   :  { %28 = dma.hbm_to_vmem [thread:$0]  %s21_s8, 512, %s23_s12, [#allocation3], %s3777_s13, %s3777_s13, %s3778_s3  }
   0xa   :  { %s3779_s17 = smov [#allocation7]   ;;  %s65_s20 = sshll.u32 %s4821_s6, 4  ;;  %s66_s20 = int_to_ptr.hbm [resolvable:$true] %s65_s20 }
   0xb   :  { %s54_s18 = sshll.u32 %s3779_s17, 4  ;;  %s3780_s21 = smov [#allocation8]   ;;  %s55_s18 = int_to_ptr.vmem [resolvable:$true] %s54_s18 }
   0xc   :  { %60 = dma.hbm_to_vmem [thread:$0]  %s53_s16, 512, %s55_s18, [#allocation6], %s3774_s9, %s3774_s9, %s3775_s10  }
   0xd   :  { %s67_s22 = sshll.u32 %s3780_s21, 4  ;;  %s3781_s23 = smov 256   ;;  %s68_s22 = int_to_ptr.vmem [resolvable:$true] %s67_s22 }
   0xe   :  { %s3782_s24 = smov 16  }
   0xf   :  { %73 = dma.hbm_to_vmem [thread:$0]  %s66_s20, 1280, %s68_s22, [#allocation9], %s3781_s23, %s3781_s23, %s3782_s24  }
  0x10   :  { %3765 = dma.done.wait [#allocation3], 512  }
  0x11   :  { %3766 = vsyncadd [#allocation3], 4294966784 }
  0x12   :  { %3767 = dma.done.wait [#allocation6], 1536  }
  0x13   :  { %3768 = vsyncadd [#allocation6], 4294965760 }
  0x14   :  { %3769 = dma.done.wait [#allocation9], 1280  }
  0x15   :  { %3770 = vsyncadd [#allocation9], 4294966016  ;;  %v3028_v0 = vld [vmem:[%s4816_s1 + $0x30] sm:$0xf]  ;;  %v3298_v1 = vld [vmem:[%s4816_s1 + $0x34] sm:$0xf0] }
  0x16   :  { %v3020_v2 = vld [vmem:[%s4816_s1 + $0x20] sm:$0xf]  ;;  %v3029_v3 = vor.u32 %v3298_v1, %v3028_v0  ;;  %v3296_v4 = vld [vmem:[%s4816_s1 + $0x24] sm:$0xf0]  ;;  %v3012_v6 = vld [vmem:[%s4816_s1 + $0x10] sm:$0xf] }
  0x17   :  { %v3021_v5 = vor.u32 %v3296_v4, %v3020_v2  ;;  %v3294_v7 = vld [vmem:[%s4816_s1 + $0x14] sm:$0xf0]  ;;  %v91_v8 = vld [vmem:[#allocation8 + $0x20] sm:$0xff]  ;;  %v92_v10 = vld [vmem:[#allocation8 + $0x30] sm:$0xff]  ;;  %vm164_vm0 = vcmask 523264   ;;  %s3783_s16 = smov 96  }
  0x18   :  { %175 = vmatpush.bf16.msra.mxu0 %v3029_v3  ;;  %v3013_v9 = vor.u32 %v3294_v7, %v3012_v6  ;;  %v93_v11 = vld [vmem:[#allocation2] sm:$0xff]  ;;  %v94_v12 = vld [vmem:[#allocation2 + $0x8] sm:$0xff]  ;;  %v95_v19 = vld [vmem:[#allocation2 + $0x10] sm:$0xff]  ;;  %s3784_s17 = smov 112   ;;  %s3785_s18 = smov 80   ;;  %vm365_vm1 = vcmask 130048  }
  0x19   :  { %v3004_v13 = vld [vmem:[%s4816_s1] sm:$0xf]  ;;  %v3292_v14 = vld [vmem:[%s4816_s1 + $0x4] sm:$0xf0]  ;;  %v3872_v15 = vadd.f32 %v93_v11, %v91_v8  ;;  %v3874_v16 = vadd.f32 %v94_v12, %v92_v10  ;;  %v96_v20 = vld [vmem:[#allocation2 + $0x18] sm:$0xff]  ;;  %v3882_v21 = vadd.f32 %v95_v19, %v91_v8  ;;  %s3786_s11 = smov 48  }
  0x1a   :  { %v3005_v17 = vor.u32 %v3292_v14, %v3004_v13  ;;  %v3884_v22 = vadd.f32 %v96_v20, %v92_v10  ;;  %v3892_v24 = vld [vmem:[#allocation8] ss:$8 sm:$0x3]  ;;  %s3787_s12 = smov 32   ;;  %vm1078_vm2 = vcmask 261120   ;;  %vm1083_vm3 = vcmask 392192  }
  0x1b   :  { %v3878_v18 = vpack.c.bf16 %v3874_v16, %v3872_v15  ;;  %v120_v25 = vperm.slane %v3892_v24, 0  ;;  %s2990_s27 = sshll.u32 %s4822_s7, 4  ;;  %s2991_s27 = int_to_ptr.hbm [resolvable:$true] %s2990_s27 }
  0x1c   :  { %176 = vmatpush.bf16.msra.mxu0 %v3021_v5  ;;  %v3888_v23 = vpack.c.bf16 %v3884_v22, %v3882_v21 }
  0x20   :  { %177 = vmatpush.bf16.msra.mxu0 %v3013_v9 }
  0x24   :  { %178 = vmatpush.bf16.msra.mxu0 %v3005_v17 }
  0x27   :  { %3034 = vmatmul.msk.bf16.vlgmr.msra.gmra.mxu0 %vm164_vm0, %v3878_v18 }
  0x37   :  { %3035 = vmatmul.msk.bf16.gmra.mxu0 %vm164_vm0, %v3888_v23 }
  0xa4   :  { %v180_v26 = vpop.f32.mrf.mxu0 }
  0xa5   :  { %v181_v27 = vadd.f32 %v180_v26, %v120_v25 }
  0xa7   :  { %225 = vrot.lane.b32.xlu1 %v181_v27, %s3783_s16  ;;  %213 = vrot.lane.b32.xlu0 %v181_v27, %s3784_s17  ;;  %v249_v28 = vmul.f32 0.25, %v181_v27  ;;  %v321_v45 = vpack.c.bf16 %v181_v27, %v181_v27 }
  0xa9   :  { %v305_v32 = vpack.c.bf16 %v249_v28, %v249_v28  ;;  %v360_v53 = vunpack.c.l.b16 %v321_v45 }
  0xab   :  { %v3899_v34 = vunpack.c.l.b16 %v305_v32 }
  0xac   :  { %v182_v29 = vpop.f32.mrf.mxu0 }
  0xad   :  { %v183_v30 = vadd.f32 %v182_v29, %v120_v25 }
  0xaf   :  { %227 = vrot.lane.b32.xlu1 %v183_v30, %s3783_s16  ;;  %215 = vrot.lane.b32.xlu0 %v183_v30, %s3784_s17  ;;  %v250_v31 = vmul.f32 0.25, %v183_v30  ;;  %v322_v43 = vpack.c.bf16 %v183_v30, %v183_v30 }
  0xb1   :  { %v306_v33 = vpack.c.bf16 %v250_v31, %v250_v31  ;;  %v361_v49 = vunpack.c.l.b16 %v322_v43 }
  0xb3   :  { %v3901_v35 = vunpack.c.l.b16 %v306_v33  ;;  %v362_v56 = vpack.c.b16 %v361_v49, %v360_v53  ;;  %v3297_v53 = vld [vmem:[%s4816_s1 + $0x34] sm:$0xf] }
  0xb4   :  { %v185_v36 = vpop.f32.mrf.mxu0 }
  0xb5   :  { %v186_v37 = vadd.f32 %v185_v36, %v120_v25  ;;  %v357_v38 = vpack.c.b16 %v3901_v35, %v3899_v34 }
  0xb7   :  { %217 = vrot.lane.b32.xlu2 %v186_v37, %s3784_s17  ;;  %239 = vrot.lane.b32.xlu1 %v183_v30, %s3785_s18  ;;  %v251_v39 = vmul.f32 0.25, %v186_v37  ;;  %v323_v40 = vpack.c.bf16 %v186_v37, %v186_v37 }
  0xb8   :  { %237 = vrot.lane.b32.xlu0 %v181_v27, %s3785_s18 }
  0xb9   :  { %v307_v44 = vpack.c.bf16 %v251_v39, %v251_v39  ;;  %v393_v47 = vunpack.c.l.b16 %v323_v40 }
  0xbb   :  { %v3911_v52 = vunpack.c.l.b16 %v307_v44 }
  0xbc   :  { %v187_v41 = vpop.f32.mrf.mxu0 }
  0xbd   :  { %v188_v42 = vadd.f32 %v187_v41, %v120_v25 }
  0xbf   :  { %219 = vrot.lane.b32.xlu2 %v188_v42, %s3784_s17  ;;  %231 = vrot.lane.b32.xlu1 %v188_v42, %s3783_s16  ;;  %v324_v46 = vpack.c.bf16 %v188_v42, %v188_v42  ;;  %v252_v48 = vmul.f32 0.25, %v188_v42 }
  0xc0   :  { %229 = vrot.lane.b32.xlu0 %v186_v37, %s3783_s16 }
  0xc1   :  { %v394_v50 = vunpack.c.l.b16 %v324_v46  ;;  %v308_v51 = vpack.c.bf16 %v252_v48, %v252_v48 }
  0xc3   :  { %v395_v54 = vpack.c.b16 %v394_v50, %v393_v47  ;;  %v3913_v55 = vunpack.c.l.b16 %v308_v51 }
  0xc5   :  { %v390_v57 = vpack.c.b16 %v3913_v55, %v3911_v52 }
  0xc7   :  { %243 = vrot.lane.b32.xlu1 %v188_v42, %s3785_s18  ;;  %363 = vrot.lane.b32.xlu2 %v362_v56, %s3774_s9 }
  0xc8   :  { %241 = vrot.lane.b32.xlu0 %v186_v37, %s3785_s18 }
 0x111   :  { %v3920_v58 = vpop.permute.xlu2 %217 }
 0x112   :  { %v327_v59 = vpack.c.bf16 %v3920_v58, %v3920_v58 }
 0x114   :  { %v457_v0 = vunpack.c.l.b16 %v327_v59  ;;  %v3295_v59 = vld [vmem:[%s4816_s1 + $0x24] sm:$0xf] }
 0x119   :  { %v3924_v60 = vpop.permute.xlu2 %219  ;;  %v226_v61 = vpop.permute.xlu1 %225 }
 0x11a   :  { %v328_v62 = vpack.c.bf16 %v3924_v60, %v3924_v60  ;;  %v3928_v63 = vpop.permute.xlu0 %213  ;;  %v257_v2 = vmul.f32 0.25, %v226_v61  ;;  %v329_v4 = vpack.c.bf16 %v226_v61, %v226_v61  ;;  %v3022_v61 = vld [vmem:[%s4816_s1 + $0x28] sm:$0xf0] }
 0x11b   :  { %v325_v5 = vpack.c.bf16 %v3928_v63, %v3928_v63 }
 0x11c   :  { %v458_v1 = vunpack.c.l.b16 %v328_v62  ;;  %v313_v8 = vpack.c.bf16 %v257_v2, %v257_v2  ;;  %v489_v14 = vunpack.c.l.b16 %v329_v4  ;;  %v3025_v62 = vor.u32 %v3295_v59, %v3022_v61  ;;  %v3006_v4 = vld [vmem:[%s4816_s1 + $0x8] sm:$0xf0] }
 0x11d   :  { %v425_v20 = vunpack.c.l.b16 %v325_v5 }
 0x11e   :  { %v459_v3 = vpack.c.b16 %v458_v1, %v457_v0  ;;  %v3934_v26 = vunpack.c.l.b16 %v313_v8  ;;  %v3293_v0 = vld [vmem:[%s4816_s1 + $0x14] sm:$0xf]  ;;  %v3014_v1 = vld [vmem:[%s4816_s1 + $0x18] sm:$0xf0] }
 0x11f   :  { %v3017_v2 = vor.u32 %v3293_v0, %v3014_v1 }
 0x120   :  { %460 = vrot.lane.b32.xlu1 %v459_v3, %s3774_s9  ;;  %v3291_v3 = vld [vmem:[%s4816_s1 + $0x4] sm:$0xf] }
 0x121   :  { %v228_v6 = vpop.permute.xlu1 %227  ;;  %v364_v7 = vpop.permute.xlu2 %363  ;;  %v3009_v5 = vor.u32 %v3291_v3, %v3006_v4 }
 0x122   :  { %v258_v9 = vmul.f32 0.25, %v228_v6  ;;  %v330_v10 = vpack.c.bf16 %v228_v6, %v228_v6  ;;  %v216_v11 = vpop.permute.xlu0 %215  ;;  %v370_v12 = vsel %vm365_vm1, %v364_v7, 0  ;;  %v253_v7 = vmul.f32 0.25, %v3928_v63 }
 0x123   :  { %v326_v13 = vpack.c.bf16 %v216_v11, %v216_v11  ;;  %379 = vmatpush.bf16.xpose.msra.mxu2 %v370_v12  ;;  %v254_v6 = vmul.f32 0.25, %v216_v11  ;;  %v256_v63 = vmul.f32 0.25, %v3924_v60 }
 0x124   :  { %v314_v17 = vpack.c.bf16 %v258_v9, %v258_v9  ;;  %v490_v19 = vunpack.c.l.b16 %v330_v10  ;;  %v309_v10 = vpack.c.bf16 %v253_v7, %v253_v7 }
 0x125   :  { %v426_v25 = vunpack.c.l.b16 %v326_v13  ;;  %v310_v8 = vpack.c.bf16 %v254_v6, %v254_v6 }
 0x126   :  { %v3936_v27 = vunpack.c.l.b16 %v314_v17  ;;  %v491_v28 = vpack.c.b16 %v490_v19, %v489_v14  ;;  %v420_v14 = vunpack.c.l.b16 %v309_v10 }
 0x127   :  { %v427_v29 = vpack.c.b16 %v426_v25, %v425_v20  ;;  %v421_v13 = vunpack.c.l.b16 %v310_v8  ;;  %v312_v25 = vpack.c.bf16 %v256_v63, %v256_v63 }
 0x128   :  { %v486_v30 = vpack.c.b16 %v3936_v27, %v3934_v26  ;;  %492 = vrot.lane.b32.xlu0 %v491_v28, %s3774_s9 }
 0x129   :  { %428 = vrot.lane.b32.xlu2 %v427_v29, %s3774_s9  ;;  %v3942_v31 = vpop.permute.xlu1 %239  ;;  %v422_v17 = vpack.c.b16 %v421_v13, %v420_v14 }
 0x12a   :  { %v3944_v32 = vpop.permute.xlu0 %237  ;;  %3038 = vmatmul.msk.bf16.vlgmr.msra.gmra.mxu2 %vm365_vm1, %v357_v38  ;;  %v334_v33 = vpack.c.bf16 %v3942_v31, %v3942_v31 }
 0x12b   :  { %v333_v36 = vpack.c.bf16 %v3944_v32, %v3944_v32  ;;  %v261_v60 = vmul.f32 0.25, %v3944_v32 }
 0x12c   :  { %v554_v41 = vunpack.c.l.b16 %v334_v33 }
 0x12d   :  { %v553_v35 = vunpack.c.l.b16 %v333_v36 }
 0x12f   :  { %v555_v44 = vpack.c.b16 %v554_v41, %v553_v35  ;;  %v317_v35 = vpack.c.bf16 %v261_v60, %v261_v60 }
 0x131   :  { %396 = vrot.lane.b32.xlu2 %v395_v54, %s3774_s9  ;;  %v3955_v37 = vpop.permute.xlu1 %231  ;;  %v3030_v54 = vld [vmem:[%s4816_s1 + $0x38] sm:$0xf0]  ;;  %v548_v55 = vunpack.c.l.b16 %v317_v35 }
 0x132   :  { %v332_v39 = vpack.c.bf16 %v3955_v37, %v3955_v37  ;;  %v3959_v40 = vpop.permute.xlu0 %229  ;;  %v3033_v56 = vor.u32 %v3297_v53, %v3030_v54 }
 0x133   :  { %v331_v34 = vpack.c.bf16 %v3959_v40, %v3959_v40  ;;  %v259_v32 = vmul.f32 0.25, %v3959_v40 }
 0x134   :  { %v522_v38 = vunpack.c.l.b16 %v332_v39  ;;  %194 = vmatpush.bf16.msra.mxu1 %v3033_v56  ;;  %v453_v39 = vunpack.c.l.b16 %v312_v25 }
 0x135   :  { %v521_v42 = vunpack.c.l.b16 %v331_v34 }
 0x137   :  { %v523_v43 = vpack.c.b16 %v522_v38, %v521_v42 }
 0x138   :  { %195 = vmatpush.bf16.msra.mxu1 %v3025_v62 }
 0x139   :  { %524 = vrot.lane.b32.xlu0 %v523_v43, %s3774_s9  ;;  %556 = vrot.lane.b32.xlu2 %v555_v44, %s3774_s9  ;;  %v3965_v45 = vpop.permute.xlu1 %243  ;;  %v315_v44 = vpack.c.bf16 %v259_v32, %v259_v32 }
 0x13a   :  { %v336_v46 = vpack.c.bf16 %v3965_v45, %v3965_v45  ;;  %v3969_v47 = vpop.permute.xlu0 %241  ;;  %v264_v53 = vmul.f32 0.25, %v3965_v45 }
 0x13b   :  { %v335_v48 = vpack.c.bf16 %v3969_v47, %v3969_v47  ;;  %v263_v26 = vmul.f32 0.25, %v3969_v47 }
 0x13c   :  { %v586_v49 = vunpack.c.l.b16 %v336_v46  ;;  %196 = vmatpush.bf16.msra.mxu1 %v3017_v2  ;;  %v121_v2 = vperm.slane %v3892_v24, 1 }
 0x13d   :  { %v585_v50 = vunpack.c.l.b16 %v335_v48  ;;  %v319_v54 = vpack.c.bf16 %v263_v26, %v263_v26 }
 0x13f   :  { %v587_v51 = vpack.c.b16 %v586_v49, %v585_v50  ;;  %v580_v62 = vunpack.c.l.b16 %v319_v54 }
 0x140   :  { %197 = vmatpush.bf16.msra.mxu1 %v3009_v5 }
 0x141   :  { %588 = vrot.lane.b32.xlu1 %v587_v51, %s3774_s9  ;;  %v516_v51 = vunpack.c.l.b16 %v315_v44 }
 0x143   :  { %3036 = vmatmul.msk.bf16.vlgmr.msra.gmra.mxu1 %vm164_vm0, %v3878_v18  ;;  %v255_v18 = vmul.f32 0.25, %v3920_v58  ;;  %v262_v58 = vmul.f32 0.25, %v3942_v31  ;;  %v260_v31 = vmul.f32 0.25, %v3955_v37  ;;  %v320_v37 = vpack.c.bf16 %v264_v53, %v264_v53 }
 0x145   :  { %v311_v11 = vpack.c.bf16 %v255_v18, %v255_v18  ;;  %v318_v34 = vpack.c.bf16 %v262_v58, %v262_v58  ;;  %v316_v43 = vpack.c.bf16 %v260_v31, %v260_v31  ;;  %v581_v61 = vunpack.c.l.b16 %v320_v37 }
 0x147   :  { %v549_v52 = vunpack.c.l.b16 %v318_v34  ;;  %v517_v49 = vunpack.c.l.b16 %v316_v43  ;;  %v582_v45 = vpack.c.b16 %v581_v61, %v580_v62 }
 0x153   :  { %3037 = vmatmul.msk.bf16.gmra.mxu1 %vm164_vm0, %v3888_v23  ;;  %v452_v23 = vunpack.c.l.b16 %v311_v11 }
 0x155   :  { %v454_v41 = vpack.c.b16 %v453_v39, %v452_v23 }
 0x183   :  { %v429_v9 = vpop.permute.xlu2 %428 }
 0x184   :  { %v434_v12 = vsel %vm365_vm1, %v429_v9, 0 }
 0x185   :  { %443 = vmatpush.bf16.xpose.msrb.mxu2 %v434_v12 }
 0x18b   :  { %v397_v19 = vpop.permute.xlu2 %396 }
 0x18c   :  { %3040 = vmatmul.msk.bf16.vlgmr.msrb.gmra.mxu2 %vm365_vm1, %v422_v17  ;;  %v402_v20 = vsel %vm365_vm1, %v397_v19, 0 }
 0x18d   :  { %411 = vmatpush.bf16.xpose.msrb.mxu0 %v402_v20 }
 0x192   :  { %v461_v28 = vpop.permute.xlu1 %460 }
 0x193   :  { %v557_v29 = vpop.permute.xlu2 %556  ;;  %v466_v33 = vsel %vm365_vm1, %v461_v28, 0 }
 0x194   :  { %v562_v36 = vsel %vm365_vm1, %v557_v29, 0  ;;  %3039 = vmatmul.msk.bf16.vlgmr.msrb.gmra.mxu0 %vm365_vm1, %v390_v57  ;;  %475 = vmatpush.bf16.xpose.msra.mxu3 %v466_v33  ;;  %v550_v57 = vpack.c.b16 %v549_v52, %v548_v55 }
 0x195   :  { %571 = vmatpush.bf16.xpose.msra.mxu0 %v562_v36 }
 0x19a   :  { %v493_v38 = vpop.permute.xlu0 %492 }
 0x19b   :  { %v498_v42 = vsel %vm365_vm1, %v493_v38, 0  ;;  %3041 = vmatmul.msk.bf16.vlgmr.msra.gmra.mxu3 %vm365_vm1, %v454_v41 }
 0x19c   :  { %507 = vmatpush.bf16.xpose.msra.mxu2 %v498_v42 }
 0x1a3   :  { %3042 = vmatmul.msk.bf16.vlgmr.msra.gmra.mxu2 %vm365_vm1, %v486_v30  ;;  %v518_v30 = vpack.c.b16 %v517_v49, %v516_v51 }
 0x1a4   :  { %3044 = vmatmul.msk.bf16.vlgmr.msra.gmra.mxu0 %vm365_vm1, %v550_v57 }
 0x1ab   :  { %v525_v46 = vpop.permute.xlu0 %524 }
 0x1ac   :  { %v530_v48 = vsel %vm365_vm1, %v525_v46, 0 }
 0x1ad   :  { %539 = vmatpush.bf16.xpose.msrb.mxu3 %v530_v48  ;;  %v381_v50 = vpop.f32.mrf.mxu2 }
 0x1ae   :  { %v610_v27 = vsel %vm365_vm1, %v381_v50, -inf }
 0x1af   :  { %611 = vmax.xlane.f32.xlu2 %v610_v27 }
 0x1b3   :  { %v589_v40 = vpop.permute.xlu1 %588 }
 0x1b4   :  { %3043 = vmatmul.msk.bf16.vlgmr.msrb.gmra.mxu3 %vm365_vm1, %v518_v30  ;;  %v594_v56 = vsel %vm365_vm1, %v589_v40, 0 }
 0x1b5   :  { %603 = vmatpush.bf16.xpose.msrb.mxu1 %v594_v56  ;;  %v383_v59 = vpop.f32.mrf.mxu2 }
 0x1b6   :  { %v613_v0 = vsel %vm365_vm1, %v383_v59, -inf }
 0x1b7   :  { %614 = vmax.xlane.f32.xlu0 %v613_v0 }
 0x1bc   :  { %3045 = vmatmul.msk.bf16.vlgmr.msrb.gmra.mxu1 %vm365_vm1, %v582_v45 }
 0x1c0   :  { %v199_v47 = vpop.f32.mrf.mxu1 }
 0x1c1   :  { %v200_v3 = vadd.f32 %v199_v47, %v121_v2 }
 0x1c3   :  { %v337_v6 = vpack.c.bf16 %v200_v3, %v200_v3 }
 0x1c5   :  { %v809_v10 = vunpack.c.l.b16 %v337_v6 }
 0x1c8   :  { %v201_v1 = vpop.f32.mrf.mxu1 }
 0x1c9   :  { %v202_v5 = vadd.f32 %v201_v1, %v121_v2 }
 0x1cb   :  { %v338_v9 = vpack.c.bf16 %v202_v5, %v202_v5  ;;  %v4038_v12 = vpack.i.bf16 %v202_v5, %v200_v3 }
 0x1cd   :  { %v810_v13 = vunpack.c.l.b16 %v338_v9 }
 0x1cf   :  { %v811_v20 = vpack.c.b16 %v810_v13, %v809_v10 }
 0x1d0   :  { %v204_v4 = vpop.f32.mrf.mxu1 }
 0x1d1   :  { %v205_v17 = vadd.f32 %v204_v4, %v121_v2  ;;  %823 = vmatpush.bf16.msrb.mxu2 %v811_v20 }
 0x1d3   :  { %v339_v63 = vpack.c.bf16 %v205_v17, %v205_v17 }
 0x1d5   :  { %v837_v25 = vunpack.c.l.b16 %v339_v63 }
 0x1d8   :  { %v206_v14 = vpop.f32.mrf.mxu1 }
 0x1d9   :  { %v207_v19 = vadd.f32 %v206_v14, %v121_v2 }
 0x1db   :  { %v340_v11 = vpack.c.bf16 %v207_v19, %v207_v19  ;;  %v4047_v39 = vpack.i.bf16 %v207_v19, %v205_v17 }
 0x1dd   :  { %v838_v28 = vunpack.c.l.b16 %v340_v11 }
 0x1df   :  { %v839_v36 = vpack.c.b16 %v838_v28, %v837_v25 }
 0x1e1   :  { %851 = vmatpush.bf16.msra.mxu3 %v839_v36 }
 0x20f   :  { %v4045_v23 = vpop.f32.mrf.mxu2 }
 0x210   :  { %v622_v35 = vsel %vm365_vm1, %v4045_v23, -inf }
 0x211   :  { %v4034_v7 = vpop.f32.mrf.mxu0 }
 0x212   :  { %v616_v8 = vsel %vm365_vm1, %v4034_v7, -inf }
 0x213   :  { %617 = vmax.xlane.f32.xlu0 %v616_v8 }
 0x217   :  { %v4052_v52 = vpop.f32.mrf.mxu2 }
 0x218   :  { %v625_v57 = vsel %vm365_vm1, %v4052_v52, -inf }
 0x219   :  { %v4040_v24 = vpop.f32.mrf.mxu0 }
 0x21a   :  { %v619_v18 = vsel %vm365_vm1, %v4040_v24, -inf }
 0x21b   :  { %620 = vmax.xlane.f32.xlu1 %v619_v18 }
 0x21e   :  { %v4056_v31 = vpop.f32.mrf.mxu3 }
 0x21f   :  { %v628_v56 = vsel %vm365_vm1, %v4056_v31, -inf }
 0x221   :  { %v573_v29 = vpop.f32.mrf.mxu0 }
 0x222   :  { %v646_v33 = vsel %vm365_vm1, %v573_v29, -inf  ;;  %v612_v58 = vpop.xlane.xlu2 %611 }
 0x223   :  { %647 = vmax.xlane.f32.xlu1 %v646_v33  ;;  %v658_v60 = vsub.f32 %v381_v50, %v612_v58 }
 0x225   :  { %v674_v38 = vmul.f32 1.442695, %v658_v60 }
 0x226   :  { %v4066_v49 = vpop.f32.mrf.mxu2  ;;  %v4068_v50 = vpop.f32.mrf.mxu3 }
 0x227   :  { %3481 = vpow2.f32 %v674_v38  ;;  %v634_v30 = vsel %vm365_vm1, %v4066_v49, -inf  ;;  %v631_v61 = vsel %vm365_vm1, %v4068_v50, -inf }
 0x229   :  { %v575_v41 = vpop.f32.mrf.mxu0 }
 0x22a   :  { %v649_v34 = vsel %vm365_vm1, %v575_v41, -inf  ;;  %v615_v42 = vpop.xlane.xlu0 %614 }
 0x22b   :  { %650 = vmax.xlane.f32.xlu2 %v649_v34  ;;  %623 = vmax.xlane.f32.xlu1 %v622_v35  ;;  %v659_v55 = vsub.f32 %v383_v59, %v615_v42 }
 0x22d   :  { %v676_v32 = vmul.f32 1.442695, %v659_v55  ;;  %v4058_v43 = vpop.eup %3481 }
 0x22e   :  { %v706_v48 = vsel %vm365_vm1, %v4058_v43, 0.0  ;;  %v4082_v54 = vpop.f32.mrf.mxu2 }
 0x22f   :  { %3483 = vpow2.f32 %v676_v32  ;;  %v637_v40 = vsel %vm365_vm1, %v4082_v54, -inf }
 0x233   :  { %626 = vmax.xlane.f32.xlu2 %v625_v57 }
 0x235   :  { %v4070_v51 = vpop.eup %3483 }
 0x236   :  { %v709_v26 = vsel %vm365_vm1, %v4070_v51, 0.0 }
 0x237   :  { %v4080_v37 = vpop.f32.mrf.mxu3 }
 0x238   :  { %v640_v0 = vsel %vm365_vm1, %v4080_v37, -inf }
 0x239   :  { %v4060_v44 = vpop.f32.mrf.mxu1 }
 0x23a   :  { %v652_v46 = vsel %vm365_vm1, %v4060_v44, -inf }
 0x23b   :  { %653 = vmax.xlane.f32.xlu0 %v652_v46  ;;  %707 = vadd.xlane.f32.xlu2 %v706_v48 }
 0x23f   :  { %v4088_v59 = vpop.f32.mrf.mxu3 }
 0x240   :  { %v643_v62 = vsel %vm365_vm1, %v4088_v59, -inf }
 0x241   :  { %v4072_v53 = vpop.f32.mrf.mxu1 }
 0x242   :  { %v655_v27 = vsel %vm365_vm1, %v4072_v53, -inf }
 0x243   :  { %710 = vadd.xlane.f32.xlu0 %v709_v26  ;;  %656 = vmax.xlane.f32.xlu1 %v655_v27 }
 0x244   :  { %635 = vmax.xlane.f32.xlu2 %v634_v30 }
 0x24b   :  { %638 = vmax.xlane.f32.xlu0 %v637_v40 }
 0x24c   :  { %629 = vmax.xlane.f32.xlu2 %v628_v56 }
 0x253   :  { %632 = vmax.xlane.f32.xlu0 %v631_v61 }
 0x254   :  { %644 = vmax.xlane.f32.xlu2 %v643_v62 }
 0x25c   :  { %3367 = vrot.lane.b32.xlu1 %v4038_v12, %s3783_s16 }
 0x267   :  { %3362 = vrot.lane.b32.xlu0 %v4038_v12, %s3784_s17 }
 0x286   :  { %641 = vmax.xlane.f32.xlu1 %v640_v0  ;;  %v618_v47 = vpop.xlane.xlu0 %617 }
 0x287   :  { %v660_v3 = vsub.f32 %v4034_v7, %v618_v47 }
 0x289   :  { %v678_v5 = vmul.f32 1.442695, %v660_v3 }
 0x28e   :  { %v621_v45 = vpop.xlane.xlu1 %620 }
 0x28f   :  { %v661_v14 = vsub.f32 %v4040_v24, %v621_v45 }
 0x291   :  { %v680_v7 = vmul.f32 1.442695, %v661_v14 }
 0x296   :  { %v648_v1 = vpop.xlane.xlu1 %647 }
 0x297   :  { %v670_v2 = vsub.f32 %v573_v29, %v648_v1 }
 0x299   :  { %v698_v4 = vmul.f32 1.442695, %v670_v2 }
 0x29b   :  { %3485 = vpow2.f32 %v698_v4 }
 0x29c   :  { %3487 = vpow2.f32 %v678_v5 }
 0x29e   :  { %v651_v6 = vpop.xlane.xlu2 %650  ;;  %v624_v8 = vpop.xlane.xlu1 %623 }
 0x29f   :  { %v671_v9 = vsub.f32 %v575_v41, %v651_v6  ;;  %v662_v10 = vsub.f32 %v4045_v23, %v624_v8 }
 0x2a1   :  { %v4102_v13 = vpop.eup %3485  ;;  %v700_v17 = vmul.f32 1.442695, %v671_v9  ;;  %v682_v19 = vmul.f32 1.442695, %v662_v10 }
 0x2a2   :  { %v742_v20 = vsel %vm365_vm1, %v4102_v13, 0.0  ;;  %v4107_v63 = vpop.eup %3487 }
 0x2a3   :  { %3489 = vpow2.f32 %v700_v17  ;;  %743 = vadd.xlane.f32.xlu2 %v742_v20  ;;  %v712_v24 = vsel %vm365_vm1, %v4107_v63, 0.0 }
 0x2a4   :  { %3491 = vpow2.f32 %v682_v19 }
 0x2a5   :  { %3493 = vpow2.f32 %v680_v7 }
 0x2a6   :  { %v627_v18 = vpop.xlane.xlu2 %626 }
 0x2a7   :  { %v663_v10 = vsub.f32 %v4052_v52, %v627_v18 }
 0x2a9   :  { %v4109_v11 = vpop.eup %3489  ;;  %v684_v17 = vmul.f32 1.442695, %v663_v10 }
 0x2aa   :  { %v4111_v25 = vpop.eup %3491  ;;  %v745_v28 = vsel %vm365_vm1, %v4109_v11, 0.0 }
 0x2ab   :  { %v718_v29 = vsel %vm365_vm1, %v4111_v25, 0.0  ;;  %713 = vadd.xlane.f32.xlu2 %v712_v24  ;;  %746 = vadd.xlane.f32.xlu0 %v745_v28  ;;  %v4121_v23 = vpop.eup %3493 }
 0x2ac   :  { %719 = vadd.xlane.f32.xlu1 %v718_v29  ;;  %v715_v58 = vsel %vm365_vm1, %v4121_v23, 0.0 }
 0x2ae   :  { %v4119_v33 = vpop.xlane.xlu0 %653  ;;  %v708_v36 = vpop.xlane.xlu2 %707 }
 0x2af   :  { %3495 = vrcp.f32 %v708_v36 }
 0x2b3   :  { %716 = vadd.xlane.f32.xlu2 %v715_v58 }
 0x2b5   :  { %v3496_v41 = vpop.eup %3495 }
 0x2b6   :  { %v711_v60 = vpop.xlane.xlu0 %710  ;;  %v770_v34 = vmul.f32 %v3496_v41, %v4058_v43  ;;  %v4129_v48 = vpop.xlane.xlu1 %656 }
 0x2b7   :  { %3497 = vrcp.f32 %v711_v60 }
 0x2b8   :  { %v786_v38 = vpack.c.bf16 %v770_v34, %v770_v34 }
 0x2ba   :  { %v804_v57 = vunpack.c.l.b16 %v786_v38 }
 0x2bd   :  { %v3498_v35 = vpop.eup %3497 }
 0x2be   :  { %v771_v42 = vmul.f32 %v3498_v35, %v4070_v51  ;;  %v639_v26 = vpop.xlane.xlu0 %638 }
 0x2bf   :  { %v667_v52 = vsub.f32 %v4082_v54, %v639_v26 }
 0x2c0   :  { %v787_v55 = vpack.c.bf16 %v771_v42, %v771_v42 }
 0x2c2   :  { %v805_v32 = vunpack.c.l.b16 %v787_v55 }
 0x2c4   :  { %v806_v46 = vpack.c.b16 %v805_v32, %v804_v57 }
 0x2c5   :  { %3372 = vrot.lane.b32.xlu1 %v4038_v12, %s3785_s18  ;;  %v636_v12 = vpop.xlane.xlu2 %635 }
 0x2c6   :  { %3046 = vmatmul.msk.bf16.vlgmr.msrb.gmra.mxu2 %vm365_vm1, %v806_v46  ;;  %v633_v40 = vpop.xlane.xlu0 %632  ;;  %v666_v4 = vsub.f32 %v4066_v49, %v636_v12  ;;  %v672_v46 = vsub.f32 %v4060_v44, %v4119_v33 }
 0x2c7   :  { %v665_v14 = vsub.f32 %v4068_v50, %v633_v40 }
 0x2c8   :  { %v690_v9 = vmul.f32 1.442695, %v666_v4 }
 0x2c9   :  { %v688_v20 = vmul.f32 1.442695, %v665_v14 }
 0x2ca   :  { %3499 = vpow2.f32 %v690_v9 }
 0x2cb   :  { %3377 = vrot.lane.b32.xlu2 %v4047_v39, %s3784_s17  ;;  %3501 = vpow2.f32 %v684_v17 }
 0x2cc   :  { %3503 = vpow2.f32 %v688_v20 }
 0x2cd   :  { %v630_v19 = vpop.xlane.xlu2 %629 }
 0x2ce   :  { %v3368_v43 = vpop.permute.xlu1 %3367  ;;  %v664_v7 = vsub.f32 %v4056_v31, %v630_v19  ;;  %v692_v31 = vmul.f32 1.442695, %v667_v52 }
 0x2cf   :  { %v3370_v27 = vunpack.i.h.bf16 %v3368_v43  ;;  %v3369_v30 = vunpack.i.l.bf16 %v3368_v43 }
 0x2d0   :  { %v4138_v24 = vpop.eup %3499  ;;  %v686_v49 = vmul.f32 1.442695, %v664_v7 }
 0x2d1   :  { %v346_v51 = vpack.c.bf16 %v3370_v27, %v3370_v27  ;;  %v345_v56 = vpack.c.bf16 %v3369_v30, %v3369_v30  ;;  %v730_v28 = vsel %vm365_vm1, %v4138_v24, 0.0  ;;  %v4142_v29 = vpop.eup %3501 }
 0x2d2   :  { %3505 = vpow2.f32 %v686_v49  ;;  %v4145_v50 = vpop.eup %3503  ;;  %v721_v18 = vsel %vm365_vm1, %v4142_v29, 0.0 }
 0x2d3   :  { %v922_v61 = vunpack.c.l.b16 %v346_v51  ;;  %v921_v62 = vunpack.c.l.b16 %v345_v56  ;;  %v727_v36 = vsel %vm365_vm1, %v4145_v50, 0.0  ;;  %3507 = vpow2.f32 %v692_v31 }
 0x2d5   :  { %v923_v0 = vpack.c.b16 %v922_v61, %v921_v62  ;;  %v645_v60 = vpop.xlane.xlu2 %644 }
 0x2d6   :  { %v669_v35 = vsub.f32 %v4088_v59, %v645_v60  ;;  %v702_v59 = vmul.f32 1.442695, %v672_v46 }
 0x2d7   :  { %935 = vmatpush.bf16.msra.mxu2 %v923_v0 }
 0x2d8   :  { %v4151_v58 = vpop.eup %3505  ;;  %v696_v55 = vmul.f32 1.442695, %v669_v35 }
 0x2d9   :  { %v3363_v45 = vpop.permute.xlu0 %3362  ;;  %v724_v54 = vsel %vm365_vm1, %v4151_v58, 0.0  ;;  %v4157_v42 = vpop.eup %3507 }
 0x2da   :  { %v3365_v47 = vunpack.i.h.bf16 %v3363_v45  ;;  %v3364_v1 = vunpack.i.l.bf16 %v3363_v45  ;;  %v733_v57 = vsel %vm365_vm1, %v4157_v42, 0.0 }
 0x2dc   :  { %v342_v2 = vpack.c.bf16 %v3365_v47, %v3365_v47  ;;  %v341_v3 = vpack.c.bf16 %v3364_v1, %v3364_v1 }
 0x2de   :  { %v866_v5 = vunpack.c.l.b16 %v342_v2  ;;  %v865_v6 = vunpack.c.l.b16 %v341_v3 }
 0x2e0   :  { %v867_v8 = vpack.c.b16 %v866_v5, %v865_v6  ;;  %v673_v6 = vsub.f32 %v4072_v53, %v4129_v48 }
 0x2e2   :  { %879 = vmatpush.bf16.msrb.mxu0 %v867_v8  ;;  %v704_v14 = vmul.f32 1.442695, %v673_v6 }
 0x2ef   :  { %731 = vadd.xlane.f32.xlu1 %v730_v28 }
 0x2f4   :  { %722 = vadd.xlane.f32.xlu2 %v721_v18 }
 0x2f7   :  { %728 = vadd.xlane.f32.xlu1 %v727_v36 }
 0x2f9   :  { %v642_v41 = vpop.xlane.xlu1 %641 }
 0x2fa   :  { %v668_v34 = vsub.f32 %v4080_v37, %v642_v41 }
 0x2fc   :  { %v694_v38 = vmul.f32 1.442695, %v668_v34  ;;  %725 = vadd.xlane.f32.xlu2 %v724_v54 }
 0x2fe   :  { %3509 = vpow2.f32 %v694_v38 }
 0x2ff   :  { %3511 = vpow2.f32 %v696_v55 }
 0x300   :  { %3513 = vpow2.f32 %v702_v59 }
 0x304   :  { %v4161_v32 = vpop.eup %3509  ;;  %734 = vadd.xlane.f32.xlu2 %v733_v57 }
 0x305   :  { %v736_v37 = vsel %vm365_vm1, %v4161_v32, 0.0  ;;  %v4167_v26 = vpop.eup %3511 }
 0x306   :  { %737 = vadd.xlane.f32.xlu0 %v736_v37  ;;  %v739_v43 = vsel %vm365_vm1, %v4167_v26, 0.0  ;;  %v4173_v27 = vpop.eup %3513 }
 0x307   :  { %v748_v44 = vsel %vm365_vm1, %v4173_v27, 0.0 }
 0x30e   :  { %740 = vadd.xlane.f32.xlu0 %v739_v43 }
 0x310   :  { %3387 = vrot.lane.b32.xlu1 %v4047_v39, %s3785_s18 }
 0x316   :  { %v744_v33 = vpop.xlane.xlu2 %743  ;;  %749 = vadd.xlane.f32.xlu0 %v748_v44 }
 0x31c   :  { %3382 = vrot.lane.b32.xlu2 %v4047_v39, %s3783_s16 }
 0x31e   :  { %v714_v30 = vpop.xlane.xlu2 %713  ;;  %v747_v34 = vpop.xlane.xlu0 %746 }
 0x31f   :  { %3515 = vrcp.f32 %v714_v30  ;;  %v720_v12 = vpop.xlane.xlu1 %719 }
 0x325   :  { %v3516_v51 = vpop.eup %3515 }
 0x326   :  { %v717_v40 = vpop.xlane.xlu2 %716  ;;  %v772_v56 = vmul.f32 %v3516_v51, %v4107_v63 }
 0x327   :  { %3517 = vrcp.f32 %v717_v40 }
 0x328   :  { %v788_v62 = vpack.c.bf16 %v772_v56, %v772_v56  ;;  %3519 = vpow2.f32 %v704_v14 }
 0x329   :  { %3521 = vrcp.f32 %v720_v12 }
 0x32a   :  { %v832_v5 = vunpack.c.l.b16 %v788_v62 }
 0x32d   :  { %v3518_v61 = vpop.eup %3517 }
 0x32e   :  { %v773_v0 = vmul.f32 %v3518_v61, %v4121_v23  ;;  %v3378_v45 = vpop.permute.xlu2 %3377  ;;  %v4184_v18 = vpop.eup %3519 }
 0x32f   :  { %v3380_v47 = vunpack.i.h.bf16 %v3378_v45  ;;  %v3379_v1 = vunpack.i.l.bf16 %v3378_v45  ;;  %v751_v53 = vsel %vm365_vm1, %v4184_v18, 0.0  ;;  %v3522_v36 = vpop.eup %3521 }
 0x330   :  { %v789_v2 = vpack.c.bf16 %v773_v0, %v773_v0  ;;  %v774_v41 = vmul.f32 %v3522_v36, %v4111_v25 }
 0x331   :  { %v344_v3 = vpack.c.bf16 %v3380_v47, %v3380_v47  ;;  %v343_v4 = vpack.c.bf16 %v3379_v1, %v3379_v1 }
 0x332   :  { %v833_v39 = vunpack.c.l.b16 %v789_v2  ;;  %v790_v35 = vpack.c.bf16 %v774_v41, %v774_v41 }
 0x333   :  { %v894_v8 = vunpack.c.l.b16 %v344_v3  ;;  %v893_v9 = vunpack.c.l.b16 %v343_v4 }
 0x334   :  { %v834_v10 = vpack.c.b16 %v833_v39, %v832_v5  ;;  %v860_v37 = vunpack.c.l.b16 %v790_v35 }
 0x335   :  { %v895_v63 = vpack.c.b16 %v894_v8, %v893_v9 }
 0x336   :  { %3047 = vmatmul.msk.bf16.vlgmr.msra.gmra.mxu3 %vm365_vm1, %v834_v10 }
 0x337   :  { %v3373_v23 = vpop.permute.xlu1 %3372  ;;  %907 = vmatpush.bf16.msra.mxu1 %v895_v63 }
 0x338   :  { %v3375_v17 = vunpack.i.h.bf16 %v3373_v23  ;;  %v3374_v19 = vunpack.i.l.bf16 %v3373_v23 }
 0x33a   :  { %v350_v20 = vpack.c.bf16 %v3375_v17, %v3375_v17  ;;  %v349_v7 = vpack.c.bf16 %v3374_v19, %v3374_v19 }
 0x33c   :  { %v978_v49 = vunpack.c.l.b16 %v350_v20  ;;  %v977_v28 = vunpack.c.l.b16 %v349_v7 }
 0x33e   :  { %v979_v52 = vpack.c.b16 %v978_v49, %v977_v28 }
 0x340   :  { %991 = vmatpush.bf16.msra.mxu0 %v979_v52 }
 0x345   :  { %752 = vadd.xlane.f32.xlu2 %v751_v53 }
 0x362   :  { %v732_v48 = vpop.xlane.xlu1 %731 }
 0x367   :  { %v723_v31 = vpop.xlane.xlu2 %722 }
 0x368   :  { %3523 = vrcp.f32 %v723_v31 }
 0x36a   :  { %v729_v60 = vpop.xlane.xlu1 %728 }
 0x36b   :  { %3525 = vrcp.f32 %v729_v60 }
 0x36c   :  { %3527 = vrcp.f32 %v747_v34 }
 0x36e   :  { %v3524_v54 = vpop.eup %3523 }
 0x36f   :  { %v775_v38 = vmul.f32 %v3524_v54, %v4142_v29  ;;  %v726_v55 = vpop.xlane.xlu2 %725 }
 0x370   :  { %3529 = vrcp.f32 %v726_v55 }
 0x371   :  { %v3526_v57 = vpop.eup %3525  ;;  %3531 = vrcp.f32 %v744_v33  ;;  %v791_v46 = vpack.c.bf16 %v775_v38, %v775_v38 }
 0x372   :  { %3533 = vrcp.f32 %v732_v48  ;;  %v777_v43 = vmul.f32 %v3526_v57, %v4145_v50  ;;  %v3528_v44 = vpop.eup %3527 }
 0x373   :  { %v861_v59 = vunpack.c.l.b16 %v791_v46  ;;  %v783_v62 = vmul.f32 %v3528_v44, %v4109_v11 }
 0x374   :  { %v793_v51 = vpack.c.bf16 %v777_v43, %v777_v43 }
 0x375   :  { %v862_v30 = vpack.c.b16 %v861_v59, %v860_v37  ;;  %v799_v1 = vpack.c.bf16 %v783_v62, %v783_v62  ;;  %v825_v62 = vpop.f32.mrf.mxu2 }
 0x376   :  { %v3530_v25 = vpop.eup %3529  ;;  %v889_v12 = vunpack.c.l.b16 %v793_v51 }
 0x377   :  { %v3532_v40 = vpop.eup %3531  ;;  %v776_v56 = vmul.f32 %v3530_v25, %v4151_v58  ;;  %v735_v61 = vpop.xlane.xlu2 %734  ;;  %3048 = vmatmul.msk.bf16.vlgmr.msrb.gmra.mxu0 %vm365_vm1, %v862_v30  ;;  %v973_v11 = vunpack.c.l.b16 %v799_v1 }
 0x378   :  { %v3534_v29 = vpop.eup %3533  ;;  %3535 = vrcp.f32 %v735_v61  ;;  %v782_v45 = vmul.f32 %v3532_v40, %v4102_v13 }
 0x379   :  { %v792_v33 = vpack.c.bf16 %v776_v56, %v776_v56  ;;  %v738_v0 = vpop.xlane.xlu0 %737  ;;  %v778_v50 = vmul.f32 %v3534_v29, %v4138_v24 }
 0x37a   :  { %3537 = vrcp.f32 %v738_v0  ;;  %v798_v58 = vpack.c.bf16 %v782_v45, %v782_v45 }
 0x37b   :  { %v888_v47 = vunpack.c.l.b16 %v792_v33  ;;  %v794_v4 = vpack.c.bf16 %v778_v50, %v778_v50 }
 0x37c   :  { %v972_v24 = vunpack.c.l.b16 %v798_v58 }
 0x37d   :  { %v890_v2 = vpack.c.b16 %v889_v12, %v888_v47  ;;  %v916_v17 = vunpack.c.l.b16 %v794_v4  ;;  %v827_v45 = vpop.f32.mrf.mxu2 }
 0x37e   :  { %v3536_v3 = vpop.eup %3535  ;;  %v974_v49 = vpack.c.b16 %v973_v11, %v972_v24  ;;  %v3301_v24 = vld [vmem:[%s4817_s2 + $0x10] sm:$0xff] }
 0x37f   :  { %v779_v5 = vmul.f32 %v3536_v3, %v4157_v42  ;;  %v3383_v39 = vpop.permute.xlu2 %3382  ;;  %3049 = vmatmul.msk.bf16.vlgmr.msra.gmra.mxu1 %vm365_vm1, %v890_v2 }
 0x380   :  { %v3385_v6 = vunpack.i.h.bf16 %v3383_v39  ;;  %v3384_v8 = vunpack.i.l.bf16 %v3383_v39  ;;  %v3538_v10 = vpop.eup %3537 }
 0x381   :  { %v795_v9 = vpack.c.bf16 %v779_v5, %v779_v5  ;;  %v741_v13 = vpop.xlane.xlu0 %740  ;;  %v780_v53 = vmul.f32 %v3538_v10, %v4161_v32  ;;  %v3302_v10 = vld [vmem:[%s4817_s2 + $0x18] sm:$0xff] }
 0x382   :  { %v348_v63 = vpack.c.bf16 %v3385_v6, %v3385_v6  ;;  %v347_v14 = vpack.c.bf16 %v3384_v8, %v3384_v8  ;;  %v3388_v23 = vpop.permute.xlu1 %3387  ;;  %3539 = vrcp.f32 %v741_v13  ;;  %1132 = vmatpush.bf16.msrb.mxu2 %v3302_v10 }
 0x383   :  { %v917_v19 = vunpack.c.l.b16 %v795_v9  ;;  %v3390_v20 = vunpack.i.h.bf16 %v3388_v23  ;;  %v3389_v7 = vunpack.i.l.bf16 %v3388_v23  ;;  %v796_v54 = vpack.c.bf16 %v780_v53, %v780_v53 }
 0x384   :  { %v950_v42 = vunpack.c.l.b16 %v348_v63  ;;  %v949_v28 = vunpack.c.l.b16 %v347_v14  ;;  %v3300_v63 = vld [vmem:[%s4817_s2 + $0x8] sm:$0xff]  ;;  %v3299_v14 = vld [vmem:[%s4817_s2] sm:$0xff] }
 0x385   :  { %v918_v52 = vpack.c.b16 %v917_v19, %v916_v17  ;;  %v352_v48 = vpack.c.bf16 %v3390_v20, %v3390_v20  ;;  %v351_v31 = vpack.c.bf16 %v3389_v7, %v3389_v7  ;;  %v944_v57 = vunpack.c.l.b16 %v796_v54 }
 0x386   :  { %v951_v36 = vpack.c.b16 %v950_v42, %v949_v28  ;;  %1133 = vmatpush.bf16.msrb.mxu2 %v3301_v24 }
 0x387   :  { %v1006_v60 = vunpack.c.l.b16 %v352_v48  ;;  %v1005_v41 = vunpack.c.l.b16 %v351_v31  ;;  %3050 = vmatmul.msk.bf16.vlgmr.msra.gmra.mxu2 %vm365_vm1, %v918_v52  ;;  %3052 = vmatmul.msk.bf16.vlgmr.msra.gmra.mxu0 %vm365_vm1, %v974_v49 }
 0x388   :  { %v3540_v34 = vpop.eup %3539  ;;  %963 = vmatpush.bf16.msrb.mxu3 %v951_v36 }
 0x389   :  { %v1007_v35 = vpack.c.b16 %v1006_v60, %v1005_v41  ;;  %v781_v38 = vmul.f32 %v3540_v34, %v4167_v26  ;;  %v750_v37 = vpop.xlane.xlu0 %749 }
 0x38a   :  { %3541 = vrcp.f32 %v750_v37  ;;  %1134 = vmatpush.bf16.msrb.mxu2 %v3300_v63 }
 0x38b   :  { %v797_v55 = vpack.c.bf16 %v781_v38, %v781_v38  ;;  %1019 = vmatpush.bf16.msrb.mxu1 %v1007_v35 }
 0x38d   :  { %v945_v46 = vunpack.c.l.b16 %v797_v55 }
 0x38e   :  { %1135 = vmatpush.bf16.msrb.mxu2 %v3299_v14 }
 0x38f   :  { %v946_v32 = vpack.c.b16 %v945_v46, %v944_v57 }
 0x390   :  { %v3542_v43 = vpop.eup %3541 }
 0x391   :  { %3051 = vmatmul.msk.bf16.vlgmr.msrb.gmra.mxu3 %vm365_vm1, %v946_v32  ;;  %v784_v44 = vmul.f32 %v3542_v43, %v4173_v27 }
 0x393   :  { %v800_v25 = vpack.c.bf16 %v784_v44, %v784_v44 }
 0x395   :  { %v1000_v26 = vunpack.c.l.b16 %v800_v25 }
 0x3b8   :  { %v753_v59 = vpop.xlane.xlu2 %752 }
 0x3b9   :  { %3543 = vrcp.f32 %v753_v59  ;;  %v853_v50 = vpop.f32.mrf.mxu3 }
 0x3bf   :  { %v3544_v30 = vpop.eup %3543 }
 0x3c0   :  { %v785_v40 = vmul.f32 %v3544_v30, %v4184_v18 }
 0x3c1   :  { %v855_v47 = vpop.f32.mrf.mxu3 }
 0x3c2   :  { %v801_v51 = vpack.c.bf16 %v785_v40, %v785_v40 }
 0x3c4   :  { %v1001_v56 = vunpack.c.l.b16 %v801_v51 }
 0x3c6   :  { %v1002_v61 = vpack.c.b16 %v1001_v56, %v1000_v26  ;;  %v102_v56 = vld [vmem:[#allocation8 + $0x1] ss:$0 sm:$0xff] }
 0x3c8   :  { %3053 = vmatmul.msk.bf16.vlgmr.msrb.gmra.mxu1 %vm365_vm1, %v1002_v61 }
 0x3f4   :  { %v881_v29 = vpop.f32.mrf.mxu0 }
 0x3fc   :  { %v883_v33 = vpop.f32.mrf.mxu0  ;;  %v909_v18 = vpop.f32.mrf.mxu1 }
 0x3fd   :  { %v3391_v0 = vpack.i.bf16 %v883_v33, %v881_v29 }
 0x3ff   :  { %3392 = vrot.lane.b32.xlu0 %v3391_v0, %s3782_s24 }
 0x404   :  { %v993_v12 = vpop.f32.mrf.mxu0  ;;  %v911_v5 = vpop.f32.mrf.mxu1 }
 0x405   :  { %v3406_v39 = vpack.i.bf16 %v911_v5, %v909_v18 }
 0x40a   :  { %v937_v27 = vpop.f32.mrf.mxu2 }
 0x40c   :  { %v995_v1 = vpop.f32.mrf.mxu0 }
 0x40d   :  { %v3401_v2 = vpack.i.bf16 %v995_v1, %v993_v12 }
 0x40f   :  { %3402 = vrot.lane.b32.xlu1 %v3401_v2, %s3786_s11 }
 0x412   :  { %v939_v3 = vpop.f32.mrf.mxu2 }
 0x413   :  { %v3396_v58 = vpack.i.bf16 %v939_v3, %v937_v27 }
 0x414   :  { %v965_v4 = vpop.f32.mrf.mxu3 }
 0x415   :  { %3397 = vrot.lane.b32.xlu0 %v3396_v58, %s3787_s12 }
 0x41c   :  { %v967_v11 = vpop.f32.mrf.mxu3 }
 0x41d   :  { %v3411_v6 = vpack.i.bf16 %v967_v11, %v965_v4  ;;  %3407 = vrot.lane.b32.xlu0 %v3406_v39, %s3782_s24  ;;  %v3788_v4 = vmov 64.0  }
 0x41e   :  { %3545 = vrcp.f32 %v3788_v4 }
 0x41f   :  { %3412 = vrot.lane.b32.xlu1 %v3411_v6, %s3787_s12 }
 0x445   :  { %v1021_v8 = vpop.f32.mrf.mxu1 }
 0x44d   :  { %v1023_v9 = vpop.f32.mrf.mxu1 }
 0x44e   :  { %v3416_v13 = vpack.i.bf16 %v1023_v9, %v1021_v8 }
 0x450   :  { %3417 = vrot.lane.b32.xlu2 %v3416_v13, %s3786_s11 }
 0x471   :  { %v3393_v23 = vpop.permute.xlu0 %3392 }
 0x472   :  { %v3395_v17 = vunpack.i.h.bf16 %v3393_v23  ;;  %v3394_v19 = vunpack.i.l.bf16 %v3393_v23 }
 0x474   :  { %v1075_v28 = vsel %vm365_vm1, %v827_v45, %v3395_v17  ;;  %v1074_v52 = vsel %vm365_vm1, %v825_v62, %v3394_v19 }
 0x481   :  { %v3403_v20 = vpop.permute.xlu1 %3402 }
 0x482   :  { %v3405_v53 = vunpack.i.h.bf16 %v3403_v20  ;;  %v3404_v48 = vunpack.i.l.bf16 %v3403_v20 }
 0x487   :  { %v3398_v7 = vpop.permute.xlu0 %3397 }
 0x488   :  { %v3400_v49 = vunpack.i.h.bf16 %v3398_v7  ;;  %v3399_v42 = vunpack.i.l.bf16 %v3398_v7 }
 0x48a   :  { %v1079_v31 = vsel %vm1078_vm2, %v1074_v52, %v3399_v42  ;;  %v1080_v36 = vsel %vm1078_vm2, %v1075_v28, %v3400_v49 }
 0x48b   :  { %v1084_v60 = vsel %vm1083_vm3, %v1079_v31, %v3404_v48  ;;  %v1085_v41 = vsel %vm1083_vm3, %v1080_v36, %v3405_v53  ;;  %v3306_v36 = vld [vmem:[#allocation5 + $0x18] sm:$0xff] }
 0x48c   :  { %v1088_v34 = vpack.c.bf16 %v1085_v41, %v1084_v60  ;;  %1298 = vmatpush.bf16.msra.mxu3 %v3306_v36  ;;  %v3305_v60 = vld [vmem:[#allocation5 + $0x10] sm:$0xff] }
 0x48e   :  { %3070 = vmatmul.msk.bf16.vlgmr.msrb.gmra.mxu2 %vm164_vm0, %v1088_v34  ;;  %v3304_v34 = vld [vmem:[#allocation5 + $0x8] sm:$0xff] }
 0x48f   :  { %v3408_v54 = vpop.permute.xlu0 %3407 }
 0x490   :  { %v3410_v35 = vunpack.i.h.bf16 %v3408_v54  ;;  %v3409_v38 = vunpack.i.l.bf16 %v3408_v54  ;;  %1299 = vmatpush.bf16.msra.mxu3 %v3305_v60 }
 0x491   :  { %v3413_v55 = vpop.permute.xlu1 %3412 }
 0x492   :  { %v3415_v57 = vunpack.i.h.bf16 %v3413_v55  ;;  %v3414_v46 = vunpack.i.l.bf16 %v3413_v55  ;;  %v1077_v32 = vsel %vm365_vm1, %v855_v47, %v3410_v35  ;;  %v1076_v37 = vsel %vm365_vm1, %v853_v50, %v3409_v38  ;;  %v3303_v38 = vld [vmem:[#allocation5] sm:$0xff] }
 0x494   :  { %v1082_v30 = vsel %vm1078_vm2, %v1077_v32, %v3415_v57  ;;  %v1081_v25 = vsel %vm1078_vm2, %v1076_v37, %v3414_v46  ;;  %1300 = vmatpush.bf16.msra.mxu3 %v3304_v34  ;;  %v3310_v34 = vld [vmem:[%s4819_s4 + $0x18] sm:$0xff] }
 0x498   :  { %1301 = vmatpush.bf16.msra.mxu3 %v3303_v38  ;;  %v103_v38 = vld [vmem:[#allocation8 + $0x2] ss:$0 sm:$0xff] }
 0x4aa   :  { %v3418_v59 = vpop.permute.xlu2 %3417 }
 0x4ab   :  { %v3420_v43 = vunpack.i.h.bf16 %v3418_v59  ;;  %v3419_v44 = vunpack.i.l.bf16 %v3418_v59 }
 0x4ad   :  { %v1086_v40 = vsel %vm1083_vm3, %v1081_v25, %v3419_v44  ;;  %v1087_v51 = vsel %vm1083_vm3, %v1082_v30, %v3420_v43 }
 0x4ae   :  { %v1089_v26 = vpack.c.bf16 %v1087_v51, %v1086_v40 }
 0x4b0   :  { %3071 = vmatmul.msk.bf16.gmra.mxu2 %vm164_vm0, %v1089_v26 }
 0x511   :  { %v1137_v61 = vpop.f32.mrf.mxu2 }
 0x512   :  { %v1138_v29 = vadd.f32 %v1137_v61, %v102_v56 }
 0x514   :  { %v1147_v62 = vadd.f32 %v1138_v29, %v3872_v15 }
 0x516   :  { %v1151_v33 = vsel %vm164_vm0, %v1147_v62, 0.0 }
 0x517   :  { %1152 = vadd.xlane.f32.xlu0 %v1151_v33 }
 0x519   :  { %v1139_v0 = vpop.f32.mrf.mxu2 }
 0x51a   :  { %v1140_v45 = vadd.f32 %v1139_v0, %v102_v56 }
 0x51c   :  { %v1148_v50 = vadd.f32 %v1140_v45, %v3874_v16  ;;  %v3546_v16 = vpop.eup %3545 }
 0x51d   :  { %v1164_v5 = vmul.f32 64.0, %v3546_v16  ;;  %vm1168_vm4 = vweird.f32 %v3546_v16 }
 0x51e   :  { %v1154_v12 = vsel %vm164_vm0, %v1148_v50, 0.0 }
 0x51f   :  { %1155 = vadd.xlane.f32.xlu1 %v1154_v12  ;;  %v1165_v39 = vsub.f32 1.0, %v1164_v5  ;;  %v106_v12 = vld [vmem:[#allocation8 + $0x5] ss:$0 sm:$0xff]  ;;  %v3313_v5 = vld [vmem:[%s4819_s4 + $0x30] sm:$0xff] }
 0x521   :  { %v1166_v11 = vmul.f32 %v3546_v16, %v1165_v39 }
 0x523   :  { %v1167_v6 = vadd.f32 %v3546_v16, %v1166_v11 }
 0x525   :  { %v4246_v8 = vsel %vm1168_vm4, %v3546_v16, %v1167_v6 }
 0x533   :  { %v1142_v27 = vpop.f32.mrf.mxu2 }
 0x534   :  { %v1143_v47 = vadd.f32 %v1142_v27, %v102_v56 }
 0x536   :  { %v1149_v1 = vadd.f32 %v1143_v47, %v3882_v21 }
 0x538   :  { %v1157_v2 = vsel %vm164_vm0, %v1149_v1, 0.0 }
 0x539   :  { %1158 = vadd.xlane.f32.xlu2 %v1157_v2 }
 0x53b   :  { %v1144_v18 = vpop.f32.mrf.mxu2 }
 0x53c   :  { %v1145_v3 = vadd.f32 %v1144_v18, %v102_v56 }
 0x53e   :  { %v1150_v15 = vadd.f32 %v1145_v3, %v3884_v22 }
 0x540   :  { %v1160_v58 = vsel %vm164_vm0, %v1150_v15, 0.0 }
 0x541   :  { %1161 = vadd.xlane.f32.xlu0 %v1160_v58  ;;  %v3314_v58 = vld [vmem:[%s4819_s4 + $0x38] sm:$0xff] }
 0x542   :  { %1383 = vmatpush.bf16.msrb.mxu0 %v3314_v58 }
 0x546   :  { %1384 = vmatpush.bf16.msrb.mxu0 %v3313_v5 }
 0x58a   :  { %v1153_v21 = vpop.xlane.xlu0 %1152 }
 0x58b   :  { %v1170_v9 = vmul.f32 %v4246_v8, %v1153_v21  ;;  %v3312_v21 = vld [vmem:[%s4819_s4 + $0x28] sm:$0xff] }
 0x58c   :  { %1385 = vmatpush.bf16.msrb.mxu0 %v3312_v21 }
 0x58d   :  { %v1174_v13 = vsub.f32 %v1147_v62, %v1170_v9  ;;  %v105_v62 = vld [vmem:[#allocation8 + $0x4] ss:$0 sm:$0xff] }
 0x58f   :  { %v1178_v10 = vmul.f32 %v1174_v13, %v1174_v13 }
 0x591   :  { %v1182_v22 = vsel %vm164_vm0, %v1178_v10, 0.0  ;;  %v3311_v10 = vld [vmem:[%s4819_s4 + $0x20] sm:$0xff] }
 0x592   :  { %v1156_v24 = vpop.xlane.xlu1 %1155  ;;  %1183 = vadd.xlane.f32.xlu1 %v1182_v22  ;;  %1386 = vmatpush.bf16.msrb.mxu0 %v3311_v10 }
 0x593   :  { %v1171_v63 = vmul.f32 %v4246_v8, %v1156_v24 }
 0x595   :  { %v1175_v14 = vsub.f32 %v1148_v50, %v1171_v63 }
 0x596   :  { %1387 = vmatpush.bf16.msrb.mxu0 %v3310_v34  ;;  %v3320_v34 = vld [vmem:[%s4816_s1 + $0x64] sm:$0xf0] }
 0x597   :  { %v1179_v23 = vmul.f32 %v1175_v14, %v1175_v14 }
 0x599   :  { %v1185_v17 = vsel %vm164_vm0, %v1179_v23, 0.0 }
 0x59a   :  { %1186 = vadd.xlane.f32.xlu0 %v1185_v17 }
 0x5ac   :  { %v1159_v19 = vpop.xlane.xlu2 %1158 }
 0x5ad   :  { %v1172_v20 = vmul.f32 %v4246_v8, %v1159_v19 }
 0x5af   :  { %v4253_v7 = vsub.f32 %v1149_v1, %v1172_v20 }
 0x5b1   :  { %v1180_v49 = vmul.f32 %v4253_v7, %v4253_v7 }
 0x5b3   :  { %v1188_v42 = vsel %vm164_vm0, %v1180_v49, 0.0 }
 0x5b4   :  { %1189 = vadd.xlane.f32.xlu1 %v1188_v42  ;;  %v1162_v28 = vpop.xlane.xlu0 %1161 }
 0x5b5   :  { %v1173_v52 = vmul.f32 %v4246_v8, %v1162_v28 }
 0x5b7   :  { %v4259_v53 = vsub.f32 %v1150_v15, %v1173_v52 }
 0x5b9   :  { %v1181_v48 = vmul.f32 %v4259_v53, %v4259_v53 }
 0x5bb   :  { %v1191_v31 = vsel %vm164_vm0, %v1181_v48, 0.0 }
 0x5bc   :  { %1192 = vadd.xlane.f32.xlu0 %v1191_v31 }
 0x605   :  { %v1184_v41 = vpop.xlane.xlu1 %1183 }
 0x606   :  { %v1194_v54 = vmul.f32 %v1184_v41, %v4246_v8 }
 0x608   :  { %v1198_v35 = vadd.f32 1e-05, %v1194_v54  ;;  %v3307_v54 = vld [vmem:[%s4819_s4] sm:$0xff] }
 0x60a   :  { %3547 = vrsqrt.f32 %v1198_v35  ;;  %vm1208_vm6 = vweird.f32 %v1198_v35 }
 0x60d   :  { %v1187_v55 = vpop.xlane.xlu0 %1186 }
 0x60e   :  { %v1195_v57 = vmul.f32 %v1187_v55, %v4246_v8 }
 0x610   :  { %v3548_v46 = vpop.eup %3547  ;;  %v1199_v32 = vadd.f32 1e-05, %v1195_v57 }
 0x611   :  { %v1203_v37 = vmul.f32 %v3548_v46, %v1198_v35  ;;  %vm1209_vm5 = vweird.f32 %v3548_v46 }
 0x612   :  { %3549 = vrsqrt.f32 %v1199_v32  ;;  %vm1210_vm7 = vmor %vm1208_vm6, %vm1209_vm5  ;;  %vm1218_vm9 = vweird.f32 %v1199_v32 }
 0x613   :  { %v1204_v59 = vmul.f32 %v3548_v46, %v1203_v37 }
 0x615   :  { %v1205_v43 = vmul.f32 0.5, %v1204_v59 }
 0x617   :  { %v1206_v44 = vsub.f32 1.5, %v1205_v43 }
 0x618   :  { %v3550_v30 = vpop.eup %3549 }
 0x619   :  { %v1207_v25 = vmul.f32 %v3548_v46, %v1206_v44  ;;  %v1213_v40 = vmul.f32 %v3550_v30, %v1199_v32  ;;  %vm1219_vm8 = vweird.f32 %v3550_v30 }
 0x61a   :  { %vm1220_vm10 = vmor %vm1218_vm9, %vm1219_vm8 }
 0x61b   :  { %v1214_v51 = vmul.f32 %v3550_v30, %v1213_v40  ;;  %v1211_v26 = vsel %vm1210_vm7, %v3548_v46, %v1207_v25 }
 0x61c   :  { %v1242_v29 = vmul.f32 %v1211_v26, %v1174_v13 }
 0x61d   :  { %v1215_v56 = vmul.f32 0.5, %v1214_v51 }
 0x61e   :  { %v1246_v45 = vmul.f32 %v1242_v29, %v105_v62 }
 0x61f   :  { %v1216_v61 = vsub.f32 1.5, %v1215_v56  ;;  %v104_v56 = vld [vmem:[#allocation8 + $0x3] ss:$0 sm:$0xff] }
 0x620   :  { %v4266_v1 = vadd.f32 %v1246_v45, %v106_v12 }
 0x621   :  { %v1217_v33 = vmul.f32 %v3550_v30, %v1216_v61 }
 0x623   :  { %v1221_v0 = vsel %vm1220_vm10, %v3550_v30, %v1217_v33 }
 0x624   :  { %v1243_v50 = vmul.f32 %v1221_v0, %v1175_v14 }
 0x626   :  { %v1247_v27 = vmul.f32 %v1243_v50, %v105_v62 }
 0x627   :  { %v1190_v47 = vpop.xlane.xlu1 %1189 }
 0x628   :  { %v4268_v2 = vadd.f32 %v1247_v27, %v106_v12  ;;  %v1196_v18 = vmul.f32 %v1190_v47, %v4246_v8 }
 0x62a   :  { %v1200_v3 = vadd.f32 1e-05, %v1196_v18  ;;  %v1254_v15 = vpack.c.bf16 %v4268_v2, %v4266_v1 }
 0x62c   :  { %3551 = vrsqrt.f32 %v1200_v3  ;;  %3088 = vmatmul.msk.bf16.vlgmr.msra.gmra.mxu3 %vm164_vm0, %v1254_v15  ;;  %vm1228_vm12 = vweird.f32 %v1200_v3 }
 0x62f   :  { %v1193_v4 = vpop.xlane.xlu0 %1192 }
 0x630   :  { %v1197_v16 = vmul.f32 %v1193_v4, %v4246_v8 }
 0x632   :  { %v3552_v39 = vpop.eup %3551  ;;  %v1201_v11 = vadd.f32 1e-05, %v1197_v16 }
 0x633   :  { %v1223_v6 = vmul.f32 %v3552_v39, %v1200_v3  ;;  %vm1229_vm11 = vweird.f32 %v3552_v39 }
 0x634   :  { %3553 = vrsqrt.f32 %v1201_v11  ;;  %vm1230_vm13 = vmor %vm1228_vm12, %vm1229_vm11  ;;  %vm1238_vm15 = vweird.f32 %v1201_v11 }
 0x635   :  { %v1224_v9 = vmul.f32 %v3552_v39, %v1223_v6 }
 0x637   :  { %v1225_v13 = vmul.f32 0.5, %v1224_v9 }
 0x639   :  { %v1226_v22 = vsub.f32 1.5, %v1225_v13 }
 0x63a   :  { %v3554_v24 = vpop.eup %3553 }
 0x63b   :  { %v1227_v63 = vmul.f32 %v3552_v39, %v1226_v22  ;;  %v1233_v14 = vmul.f32 %v3554_v24, %v1201_v11  ;;  %vm1239_vm14 = vweird.f32 %v3554_v24 }
 0x63c   :  { %vm1240_vm4 = vmor %vm1238_vm15, %vm1239_vm14 }
 0x63d   :  { %v1234_v23 = vmul.f32 %v3554_v24, %v1233_v14  ;;  %v1231_v17 = vsel %vm1230_vm13, %v3552_v39, %v1227_v63 }
 0x63e   :  { %v1244_v49 = vmul.f32 %v1231_v17, %v4253_v7  ;;  %v3309_v7 = vld [vmem:[%s4819_s4 + $0x10] sm:$0xff] }
 0x63f   :  { %v1235_v19 = vmul.f32 0.5, %v1234_v23  ;;  %1388 = vmatpush.bf16.msrb.mxu0 %v3309_v7  ;;  %v3319_v7 = vld [vmem:[%s4816_s1 + $0x64] sm:$0xf] }
 0x640   :  { %v1248_v48 = vmul.f32 %v1244_v49, %v105_v62 }
 0x641   :  { %v1236_v20 = vsub.f32 1.5, %v1235_v19 }
 0x642   :  { %v1252_v36 = vadd.f32 %v1248_v48, %v106_v12  ;;  %v3321_v48 = vld [vmem:[%s4816_s1 + $0x74] sm:$0xf] }
 0x643   :  { %v1237_v42 = vmul.f32 %v3554_v24, %v1236_v20 }
 0x645   :  { %v1241_v28 = vsel %vm1240_vm4, %v3554_v24, %v1237_v42 }
 0x646   :  { %v1245_v52 = vmul.f32 %v1241_v28, %v4259_v53  ;;  %v3308_v53 = vld [vmem:[%s4819_s4 + $0x8] sm:$0xff]  ;;  %v3156_v28 = vld [vmem:[%s4816_s1 + $0x70] sm:$0xf] }
 0x647   :  { %1389 = vmatpush.bf16.msrb.mxu0 %v3308_v53 }
 0x648   :  { %v1249_v31 = vmul.f32 %v1245_v52, %v105_v62  ;;  %v3322_v52 = vld [vmem:[%s4816_s1 + $0x74] sm:$0xf0] }
 0x64a   :  { %v1253_v60 = vadd.f32 %v1249_v31, %v106_v12  ;;  %v3157_v31 = vor.u32 %v3322_v52, %v3156_v28 }
 0x64b   :  { %1390 = vmatpush.bf16.msrb.mxu0 %v3307_v54  ;;  %v3150_v54 = vld [vmem:[%s4816_s1 + $0x68] sm:$0xf0] }
 0x64c   :  { %v1255_v41 = vpack.c.bf16 %v1253_v60, %v1252_v36  ;;  %1577 = vmatpush.bf16.msra.mxu1 %v3157_v31 }
 0x64e   :  { %3089 = vmatmul.msk.bf16.gmra.mxu3 %vm164_vm0, %v1255_v41  ;;  %v3148_v41 = vld [vmem:[%s4816_s1 + $0x60] sm:$0xf] }
 0x64f   :  { %v3149_v53 = vor.u32 %v3320_v34, %v3148_v41 }
 0x651   :  { %1578 = vmatpush.bf16.msra.mxu1 %v3149_v53 }
 0x6af   :  { %v1303_v35 = vpop.f32.mrf.mxu3 }
 0x6b0   :  { %v1304_v55 = vadd.f32 %v1303_v35, %v103_v38  ;;  %v3153_v35 = vor.u32 %v3319_v7, %v3150_v54 }
 0x6b2   :  { %v1313_v32 = vmax.f32 %v1304_v55, 0.0  ;;  %v3318_v55 = vld [vmem:[%s4816_s1 + $0x54] sm:$0xf0] }
 0x6b7   :  { %v1305_v57 = vpop.f32.mrf.mxu3 }
 0x6b8   :  { %v1306_v46 = vadd.f32 %v1305_v57, %v103_v38  ;;  %v3317_v57 = vld [vmem:[%s4816_s1 + $0x54] sm:$0xf] }
 0x6ba   :  { %v1314_v37 = vmax.f32 %v1306_v46, 0.0 }
 0x6bc   :  { %v1317_v59 = vpack.c.bf16 %v1314_v37, %v1313_v32  ;;  %v3142_v37 = vld [vmem:[%s4816_s1 + $0x58] sm:$0xf0] }
 0x6be   :  { %1391 = vmatmul.bf16.vlgmr.msrb.gmra.mxu0 %v1317_v59 }
 0x6d1   :  { %v1308_v43 = vpop.f32.mrf.mxu3 }
 0x6d2   :  { %v1309_v44 = vadd.f32 %v1308_v43, %v103_v38  ;;  %v3145_v43 = vor.u32 %v3317_v57, %v3142_v37 }
 0x6d4   :  { %v1315_v40 = vmax.f32 %v1309_v44, 0.0 }
 0x6d9   :  { %v1310_v30 = vpop.f32.mrf.mxu3 }
 0x6da   :  { %v1311_v25 = vadd.f32 %v1310_v30, %v103_v38  ;;  %v3140_v38 = vld [vmem:[%s4816_s1 + $0x50] sm:$0xf]  ;;  %v3132_v30 = vld [vmem:[%s4816_s1 + $0x40] sm:$0xf] }
 0x6db   :  { %v3141_v32 = vor.u32 %v3318_v55, %v3140_v38 }
 0x6dc   :  { %v1316_v51 = vmax.f32 %v1311_v25, 0.0  ;;  %v3316_v25 = vld [vmem:[%s4816_s1 + $0x44] sm:$0xf0] }
 0x6dd   :  { %1579 = vmatpush.bf16.msra.mxu1 %v3141_v32 }
 0x6de   :  { %v1318_v26 = vpack.c.bf16 %v1316_v51, %v1315_v40  ;;  %v3133_v40 = vor.u32 %v3316_v25, %v3132_v30  ;;  %v3315_v51 = vld [vmem:[%s4816_s1 + $0x44] sm:$0xf] }
 0x6e0   :  { %1396 = vmatmul.bf16.gmra.mxu0 %v1318_v26  ;;  %v3134_v26 = vld [vmem:[%s4816_s1 + $0x48] sm:$0xf0] }
 0x6e1   :  { %1580 = vmatpush.bf16.msra.mxu1 %v3133_v40 }
 0x73b   :  { %v1392_v61 = vpop.f32.mrf.mxu0 }
 0x73c   :  { %v1393_v29 = vadd.f32 %v1392_v61, %v104_v56 }
 0x73e   :  { %v1402_v62 = vadd.f32 %v1393_v29, %v4266_v1 }
 0x740   :  { %v1406_v33 = vsel %vm164_vm0, %v1402_v62, 0.0 }
 0x741   :  { %1407 = vadd.xlane.f32.xlu1 %v1406_v33 }
 0x743   :  { %v1394_v0 = vpop.f32.mrf.mxu0 }
 0x744   :  { %v1395_v45 = vadd.f32 %v1394_v0, %v104_v56 }
 0x746   :  { %v1403_v50 = vadd.f32 %v1395_v45, %v4268_v2 }
 0x748   :  { %v1409_v12 = vsel %vm164_vm0, %v1403_v50, 0.0 }
 0x749   :  { %1410 = vadd.xlane.f32.xlu2 %v1409_v12 }
 0x75d   :  { %v1397_v27 = vpop.f32.mrf.mxu0 }
 0x75e   :  { %v1398_v47 = vadd.f32 %v1397_v27, %v104_v56 }
 0x760   :  { %v1404_v18 = vadd.f32 %v1398_v47, %v1252_v36  ;;  %v3158_v36 = vld [vmem:[%s4816_s1 + $0x78] sm:$0xf0] }
 0x762   :  { %v1412_v3 = vsel %vm164_vm0, %v1404_v18, 0.0 }
 0x763   :  { %1413 = vadd.xlane.f32.xlu0 %v1412_v3 }
 0x765   :  { %v1399_v15 = vpop.f32.mrf.mxu0 }
 0x766   :  { %v1400_v58 = vadd.f32 %v1399_v15, %v104_v56  ;;  %v3137_v56 = vor.u32 %v3315_v51, %v3134_v26 }
 0x768   :  { %v1405_v4 = vadd.f32 %v1400_v58, %v1253_v60  ;;  %v3161_v60 = vor.u32 %v3321_v48, %v3158_v36 }
 0x76a   :  { %v1415_v1 = vsel %vm164_vm0, %v1405_v4, 0.0  ;;  %1596 = vmatpush.bf16.msra.mxu2 %v3161_v60 }
 0x76b   :  { %1416 = vadd.xlane.f32.xlu1 %v1415_v1 }
 0x76e   :  { %1597 = vmatpush.bf16.msra.mxu2 %v3153_v35 }
 0x772   :  { %1598 = vmatpush.bf16.msra.mxu2 %v3145_v43 }
 0x776   :  { %1599 = vmatpush.bf16.msra.mxu2 %v3137_v56 }
 0x7b4   :  { %v1408_v16 = vpop.xlane.xlu1 %1407 }
 0x7b5   :  { %v1418_v5 = vmul.f32 %v1408_v16, %v4246_v8  ;;  %v107_v16 = vld [vmem:[#allocation8 + $0x6] ss:$0 sm:$0xff] }
 0x7b7   :  { %v4309_v39 = vsub.f32 %v1402_v62, %v1418_v5 }
 0x7b9   :  { %v1426_v2 = vmul.f32 %v4309_v39, %v4309_v39 }
 0x7bb   :  { %v1430_v11 = vsel %vm164_vm0, %v1426_v2, 0.0 }
 0x7bc   :  { %v1411_v6 = vpop.xlane.xlu2 %1410  ;;  %1431 = vadd.xlane.f32.xlu2 %v1430_v11 }
 0x7bd   :  { %v1419_v21 = vmul.f32 %v1411_v6, %v4246_v8 }
 0x7bf   :  { %v4315_v9 = vsub.f32 %v1403_v50, %v1419_v21  ;;  %v108_v21 = vld [vmem:[#allocation8 + $0x7] ss:$0 sm:$0xff] }
 0x7c1   :  { %v1427_v13 = vmul.f32 %v4315_v9, %v4315_v9 }
 0x7c3   :  { %v1433_v10 = vsel %vm164_vm0, %v1427_v13, 0.0 }
 0x7c4   :  { %1434 = vadd.xlane.f32.xlu0 %v1433_v10 }
 0x7d6   :  { %v1414_v22 = vpop.xlane.xlu0 %1413 }
 0x7d7   :  { %v1420_v24 = vmul.f32 %v1414_v22, %v4246_v8 }
 0x7d9   :  { %v4321_v63 = vsub.f32 %v1404_v18, %v1420_v24 }
 0x7db   :  { %v1428_v14 = vmul.f32 %v4321_v63, %v4321_v63 }
 0x7dd   :  { %v1436_v23 = vsel %vm164_vm0, %v1428_v14, 0.0 }
 0x7de   :  { %v1417_v17 = vpop.xlane.xlu1 %1416  ;;  %1437 = vadd.xlane.f32.xlu1 %v1436_v23 }
 0x7df   :  { %v1421_v19 = vmul.f32 %v1417_v17, %v4246_v8 }
 0x7e1   :  { %v4327_v20 = vsub.f32 %v1405_v4, %v1421_v19 }
 0x7e3   :  { %v1429_v49 = vmul.f32 %v4327_v20, %v4327_v20 }
 0x7e5   :  { %v1439_v42 = vsel %vm164_vm0, %v1429_v49, 0.0 }
 0x7e6   :  { %1440 = vadd.xlane.f32.xlu2 %v1439_v42 }
 0x82f   :  { %v1432_v46 = vpop.xlane.xlu2 %1431 }
 0x830   :  { %v1442_v59 = vmul.f32 %v1432_v46, %v4246_v8 }
 0x832   :  { %v1446_v44 = vadd.f32 1e-05, %v1442_v59 }
 0x834   :  { %3555 = vrsqrt.f32 %v1446_v44  ;;  %vm1456_vm6 = vweird.f32 %v1446_v44 }
 0x837   :  { %v1435_v61 = vpop.xlane.xlu0 %1434 }
 0x838   :  { %v1443_v29 = vmul.f32 %v1435_v61, %v4246_v8 }
 0x83a   :  { %v3556_v62 = vpop.eup %3555  ;;  %v1447_v33 = vadd.f32 1e-05, %v1443_v29 }
 0x83b   :  { %v1451_v0 = vmul.f32 %v3556_v62, %v1446_v44  ;;  %vm1457_vm5 = vweird.f32 %v3556_v62 }
 0x83c   :  { %3557 = vrsqrt.f32 %v1447_v33  ;;  %vm1458_vm7 = vmor %vm1456_vm6, %vm1457_vm5  ;;  %vm1466_vm9 = vweird.f32 %v1447_v33 }
 0x83d   :  { %v1452_v45 = vmul.f32 %v3556_v62, %v1451_v0 }
 0x83f   :  { %v1453_v50 = vmul.f32 0.5, %v1452_v45 }
 0x841   :  { %v1454_v12 = vsub.f32 1.5, %v1453_v50 }
 0x842   :  { %v3558_v27 = vpop.eup %3557 }
 0x843   :  { %v1455_v47 = vmul.f32 %v3556_v62, %v1454_v12  ;;  %v1461_v18 = vmul.f32 %v3558_v27, %v1447_v33  ;;  %vm1467_vm8 = vweird.f32 %v3558_v27 }
 0x844   :  { %vm1468_vm10 = vmor %vm1466_vm9, %vm1467_vm8 }
 0x845   :  { %v1462_v3 = vmul.f32 %v3558_v27, %v1461_v18  ;;  %v1459_v15 = vsel %vm1458_vm7, %v3556_v62, %v1455_v47 }
 0x846   :  { %v1490_v1 = vmul.f32 %v1459_v15, %v4309_v39 }
 0x847   :  { %v1463_v58 = vmul.f32 0.5, %v1462_v3 }
 0x848   :  { %v1494_v11 = vmul.f32 %v1490_v1, %v107_v16 }
 0x849   :  { %v1464_v4 = vsub.f32 1.5, %v1463_v58 }
 0x84a   :  { %v4384_v22 = vadd.f32 %v1494_v11, %v108_v21 }
 0x84b   :  { %v1465_v5 = vmul.f32 %v3558_v27, %v1464_v4 }
 0x84d   :  { %v1469_v2 = vsel %vm1468_vm10, %v3558_v27, %v1465_v5 }
 0x84e   :  { %v1491_v6 = vmul.f32 %v1469_v2, %v4315_v9 }
 0x850   :  { %v1495_v13 = vmul.f32 %v1491_v6, %v107_v16 }
 0x851   :  { %v1438_v10 = vpop.xlane.xlu1 %1437 }
 0x852   :  { %v4386_v24 = vadd.f32 %v1495_v13, %v108_v21  ;;  %v1444_v14 = vmul.f32 %v1438_v10, %v4246_v8 }
 0x854   :  { %v1448_v23 = vadd.f32 1e-05, %v1444_v14  ;;  %v1511_v39 = vpack.c.bf16 %v4386_v24, %v4384_v22 }
 0x856   :  { %3559 = vrsqrt.f32 %v1448_v23  ;;  %3162 = vmatmul.msk.bf16.vlgmr.msra.gmra.mxu1 %vm164_vm0, %v1511_v39  ;;  %3164 = vmatmul.msk.bf16.vlgmr.msra.gmra.mxu2 %vm164_vm0, %v1511_v39  ;;  %vm1476_vm12 = vweird.f32 %v1448_v23 }
 0x859   :  { %v1441_v17 = vpop.xlane.xlu2 %1440 }
 0x85a   :  { %v1445_v9 = vmul.f32 %v1441_v17, %v4246_v8 }
 0x85c   :  { %v3560_v19 = vpop.eup %3559  ;;  %v1449_v49 = vadd.f32 1e-05, %v1445_v9 }
 0x85d   :  { %v1471_v42 = vmul.f32 %v3560_v19, %v1448_v23  ;;  %vm1477_vm11 = vweird.f32 %v3560_v19 }
 0x85e   :  { %3561 = vrsqrt.f32 %v1449_v49  ;;  %vm1478_vm13 = vmor %vm1476_vm12, %vm1477_vm11  ;;  %vm1486_vm15 = vweird.f32 %v1449_v49 }
 0x85f   :  { %v1472_v28 = vmul.f32 %v3560_v19, %v1471_v42 }
 0x861   :  { %v1473_v52 = vmul.f32 0.5, %v1472_v28 }
 0x863   :  { %v1474_v48 = vsub.f32 1.5, %v1473_v52 }
 0x864   :  { %v3562_v31 = vpop.eup %3561 }
 0x865   :  { %v1475_v36 = vmul.f32 %v3560_v19, %v1474_v48  ;;  %v1481_v60 = vmul.f32 %v3562_v31, %v1449_v49  ;;  %vm1487_vm14 = vweird.f32 %v3562_v31 }
 0x866   :  { %vm1488_vm4 = vmor %vm1486_vm15, %vm1487_vm14 }
 0x867   :  { %v1482_v41 = vmul.f32 %v3562_v31, %v1481_v60  ;;  %v1479_v34 = vsel %vm1478_vm13, %v3560_v19, %v1475_v36 }
 0x868   :  { %v1492_v54 = vmul.f32 %v1479_v34, %v4321_v63  ;;  %v1503_v63 = vld [vmem:[#allocation8 + $0x10] ss:$8 sm:$0x3] }
 0x869   :  { %v1483_v7 = vmul.f32 0.5, %v1482_v41  ;;  %v1523_v43 = vperm.slane %v1503_v63, 0  ;;  %v1524_v40 = vperm.slane %v1503_v63, 1 }
 0x86a   :  { %v1496_v57 = vmul.f32 %v1492_v54, %v107_v16 }
 0x86b   :  { %v1484_v53 = vsub.f32 1.5, %v1483_v7 }
 0x86c   :  { %v4396_v32 = vadd.f32 %v1496_v57, %v108_v21 }
 0x86d   :  { %v1485_v35 = vmul.f32 %v3562_v31, %v1484_v53 }
 0x86f   :  { %v1489_v38 = vsel %vm1488_vm4, %v3562_v31, %v1485_v35 }
 0x870   :  { %v1493_v55 = vmul.f32 %v1489_v38, %v4327_v20 }
 0x872   :  { %v1497_v46 = vmul.f32 %v1493_v55, %v107_v16 }
 0x874   :  { %v4398_v37 = vadd.f32 %v1497_v46, %v108_v21 }
 0x876   :  { %v1512_v59 = vpack.c.bf16 %v4398_v37, %v4396_v32 }
 0x878   :  { %3163 = vmatmul.msk.bf16.gmra.mxu1 %vm164_vm0, %v1512_v59  ;;  %3165 = vmatmul.msk.bf16.gmra.mxu2 %vm164_vm0, %v1512_v59 }
 0x8d3   :  { %v1582_v44 = vpop.f32.mrf.mxu1 }
 0x8d4   :  { %v1583_v30 = vadd.f32 %v1582_v44, %v1523_v43 }
 0x8d6   :  { %1639 = vrot.lane.b32.xlu2 %v1583_v30, %s3785_s18  ;;  %1615 = vrot.lane.b32.xlu0 %v1583_v30, %s3784_s17  ;;  %v1651_v25 = vmul.f32 0.25, %v1583_v30  ;;  %v1723_v4 = vpack.c.bf16 %v1583_v30, %v1583_v30 }
 0x8d8   :  { %v1707_v56 = vpack.c.bf16 %v1651_v25, %v1651_v25  ;;  %v1762_v5 = vunpack.c.l.b16 %v1723_v4 }
 0x8d9   :  { %v1601_v20 = vpop.f32.mrf.mxu2 }
 0x8da   :  { %v1602_v61 = vadd.f32 %v1601_v20, %v1524_v40  ;;  %v4408_v50 = vunpack.c.l.b16 %v1707_v56 }
 0x8db   :  { %v1584_v51 = vpop.f32.mrf.mxu1 }
 0x8dc   :  { %v1585_v26 = vadd.f32 %v1584_v51, %v1523_v43  ;;  %v1739_v0 = vpack.c.bf16 %v1602_v61, %v1602_v61 }
 0x8de   :  { %v1652_v29 = vmul.f32 0.25, %v1585_v26  ;;  %1617 = vrot.lane.b32.xlu1 %v1585_v26, %s3784_s17  ;;  %1641 = vrot.lane.b32.xlu0 %v1585_v26, %s3785_s18  ;;  %v1724_v47 = vpack.c.bf16 %v1585_v26, %v1585_v26  ;;  %v4416_v15 = vunpack.c.l.b16 %v1739_v0 }
 0x8e0   :  { %v1708_v62 = vpack.c.bf16 %v1652_v29, %v1652_v29  ;;  %v1763_v1 = vunpack.c.l.b16 %v1724_v47 }
 0x8e1   :  { %v1603_v33 = vpop.f32.mrf.mxu2 }
 0x8e2   :  { %v1604_v45 = vadd.f32 %v1603_v33, %v1524_v40  ;;  %v4410_v12 = vunpack.c.l.b16 %v1708_v62  ;;  %v1764_v2 = vpack.c.b16 %v1763_v1, %v1762_v5 }
 0x8e4   :  { %v1740_v27 = vpack.c.bf16 %v1604_v45, %v1604_v45  ;;  %v1759_v18 = vpack.c.b16 %v4410_v12, %v4408_v50  ;;  %v4414_v3 = vpack.i.bf16 %v1604_v45, %v1602_v61 }
 0x8e6   :  { %v4418_v58 = vunpack.c.l.b16 %v1740_v27  ;;  %1627 = vrot.lane.b32.xlu1 %v1583_v30, %s3783_s16  ;;  %1629 = vrot.lane.b32.xlu0 %v1585_v26, %s3783_s16 }
 0x8e8   :  { %v2212_v16 = vpack.c.b16 %v4418_v58, %v4416_v15 }
 0x8ee   :  { %1765 = vrot.lane.b32.xlu0 %v1764_v2, %s3774_s9 }
 0x8f5   :  { %v1587_v11 = vpop.f32.mrf.mxu1 }
 0x8f6   :  { %v1588_v6 = vadd.f32 %v1587_v11, %v1523_v43 }
 0x8f8   :  { %1619 = vrot.lane.b32.xlu2 %v1588_v6, %s3784_s17  ;;  %1643 = vrot.lane.b32.xlu0 %v1588_v6, %s3785_s18  ;;  %v1653_v13 = vmul.f32 0.25, %v1588_v6  ;;  %v1725_v23 = vpack.c.bf16 %v1588_v6, %v1588_v6 }
 0x8fa   :  { %v1709_v39 = vpack.c.bf16 %v1653_v13, %v1653_v13  ;;  %v1794_v49 = vunpack.c.l.b16 %v1725_v23 }
 0x8fb   :  { %v1606_v21 = vpop.f32.mrf.mxu2 }
 0x8fc   :  { %v4429_v28 = vadd.f32 %v1606_v21, %v1524_v40  ;;  %v4433_v36 = vunpack.c.l.b16 %v1709_v39 }
 0x8fd   :  { %v1589_v10 = vpop.f32.mrf.mxu1 }
 0x8fe   :  { %v1590_v14 = vadd.f32 %v1589_v10, %v1523_v43 }
 0x900   :  { %v1654_v17 = vmul.f32 0.25, %v1590_v14  ;;  %1621 = vrot.lane.b32.xlu1 %v1590_v14, %s3784_s17  ;;  %1631 = vrot.lane.b32.xlu2 %v1588_v6, %s3783_s16  ;;  %v1726_v9 = vpack.c.bf16 %v1590_v14, %v1590_v14 }
 0x902   :  { %v1710_v19 = vpack.c.bf16 %v1654_v17, %v1654_v17  ;;  %v1795_v42 = vunpack.c.l.b16 %v1726_v9 }
 0x903   :  { %v1608_v52 = vpop.f32.mrf.mxu2 }
 0x904   :  { %v4431_v48 = vadd.f32 %v1608_v52, %v1524_v40  ;;  %v1796_v31 = vpack.c.b16 %v1795_v42, %v1794_v49  ;;  %v4435_v60 = vunpack.c.l.b16 %v1710_v19 }
 0x906   :  { %1797 = vrot.lane.b32.xlu0 %v1796_v31, %s3774_s9  ;;  %v1791_v41 = vpack.c.b16 %v4435_v60, %v4433_v36  ;;  %v4442_v34 = vpack.i.bf16 %v4431_v48, %v4429_v28  ;;  %v1742_v36 = vpack.c.bf16 %v4431_v48, %v4431_v48  ;;  %v1741_v60 = vpack.c.bf16 %v4429_v28, %v4429_v28 }
 0x908   :  { %1633 = vrot.lane.b32.xlu1 %v1590_v14, %s3783_s16  ;;  %1645 = vrot.lane.b32.xlu2 %v1590_v14, %s3785_s18 }
 0x930   :  { %v1640_v53 = vpop.permute.xlu2 %1639 }
 0x931   :  { %v1663_v54 = vmul.f32 0.25, %v1640_v53  ;;  %v1735_v38 = vpack.c.bf16 %v1640_v53, %v1640_v53 }
 0x933   :  { %v1719_v57 = vpack.c.bf16 %v1663_v54, %v1663_v54  ;;  %v1954_v25 = vunpack.c.l.b16 %v1735_v38 }
 0x935   :  { %v4446_v62 = vunpack.c.l.b16 %v1719_v57 }
 0x948   :  { %v1616_v7 = vpop.permute.xlu0 %1615 }
 0x949   :  { %v1655_v35 = vmul.f32 0.25, %v1616_v7  ;;  %v1727_v55 = vpack.c.bf16 %v1616_v7, %v1616_v7 }
 0x94b   :  { %v1711_v46 = vpack.c.bf16 %v1655_v35, %v1655_v35  ;;  %v1826_v40 = vunpack.c.l.b16 %v1727_v55 }
 0x94d   :  { %v4448_v33 = vunpack.c.l.b16 %v1711_v46 }
 0x950   :  { %v1618_v59 = vpop.permute.xlu1 %1617  ;;  %v1642_v63 = vpop.permute.xlu0 %1641 }
 0x951   :  { %v1656_v43 = vmul.f32 0.25, %v1618_v59  ;;  %v1728_v44 = vpack.c.bf16 %v1618_v59, %v1618_v59  ;;  %v1664_v30 = vmul.f32 0.25, %v1642_v63  ;;  %v1736_v20 = vpack.c.bf16 %v1642_v63, %v1642_v63 }
 0x952   :  { %v1620_v51 = vpop.permute.xlu2 %1619 }
 0x953   :  { %v1712_v26 = vpack.c.bf16 %v1656_v43, %v1656_v43  ;;  %v1827_v56 = vunpack.c.l.b16 %v1728_v44  ;;  %v1720_v61 = vpack.c.bf16 %v1664_v30, %v1664_v30  ;;  %v1955_v29 = vunpack.c.l.b16 %v1736_v20 }
 0x954   :  { %v1657_v57 = vmul.f32 0.25, %v1620_v51  ;;  %v1729_v59 = vpack.c.bf16 %v1620_v51, %v1620_v51 }
 0x955   :  { %v4450_v0 = vunpack.c.l.b16 %v1712_v26  ;;  %v4452_v45 = vunpack.c.l.b16 %v1720_v61  ;;  %v1828_v27 = vpack.c.b16 %v1827_v56, %v1826_v40  ;;  %v1956_v47 = vpack.c.b16 %v1955_v29, %v1954_v25 }
 0x956   :  { %v1713_v43 = vpack.c.bf16 %v1657_v57, %v1657_v57  ;;  %v1858_v20 = vunpack.c.l.b16 %v1729_v59 }
 0x957   :  { %v1823_v4 = vpack.c.b16 %v4450_v0, %v4448_v33  ;;  %v1951_v1 = vpack.c.b16 %v4452_v45, %v4446_v62  ;;  %1829 = vrot.lane.b32.xlu1 %v1828_v27, %s3774_s9  ;;  %1957 = vrot.lane.b32.xlu2 %v1956_v47, %s3774_s9 }
 0x958   :  { %v1628_v5 = vpop.permute.xlu1 %1627  ;;  %v1630_v2 = vpop.permute.xlu0 %1629 }
 0x959   :  { %v1659_v11 = vmul.f32 0.25, %v1628_v5  ;;  %v1731_v6 = vpack.c.bf16 %v1628_v5, %v1628_v5  ;;  %v1660_v21 = vmul.f32 0.25, %v1630_v2  ;;  %v1732_v13 = vpack.c.bf16 %v1630_v2, %v1630_v2 }
 0x95a   :  { %v1632_v17 = vpop.permute.xlu2 %1631 }
 0x95b   :  { %v1715_v10 = vpack.c.bf16 %v1659_v11, %v1659_v11  ;;  %v1890_v14 = vunpack.c.l.b16 %v1731_v6  ;;  %v1716_v23 = vpack.c.bf16 %v1660_v21, %v1660_v21  ;;  %v1891_v39 = vunpack.c.l.b16 %v1732_v13 }
 0x95c   :  { %v1733_v56 = vpack.c.bf16 %v1632_v17, %v1632_v17 }
 0x95d   :  { %v4460_v9 = vunpack.c.l.b16 %v1715_v10  ;;  %v1886_v19 = vunpack.c.l.b16 %v1716_v23  ;;  %v1892_v49 = vpack.c.b16 %v1891_v39, %v1890_v14  ;;  %v2239_v23 = vunpack.c.l.b16 %v1742_v36 }
 0x95e   :  { %v1922_v47 = vunpack.c.l.b16 %v1733_v56  ;;  %v1661_v39 = vmul.f32 0.25, %v1632_v17 }
 0x95f   :  { %v1887_v42 = vpack.c.b16 %v1886_v19, %v4460_v9  ;;  %1893 = vrot.lane.b32.xlu1 %v1892_v49, %s3774_s9  ;;  %v2238_v9 = vunpack.c.l.b16 %v1741_v60 }
 0x960   :  { %v1766_v52 = vpop.permute.xlu0 %1765  ;;  %v1717_v0 = vpack.c.bf16 %v1661_v39, %v1661_v39 }
 0x961   :  { %v1771_v31 = vsel %vm365_vm1, %v1766_v52, 0  ;;  %v2240_v49 = vpack.c.b16 %v2239_v23, %v2238_v9 }
 0x962   :  { %1780 = vmatpush.bf16.xpose.msrb.mxu3 %v1771_v31  ;;  %v4465_v7 = vpop.permute.xlu2 %1645  ;;  %v1917_v15 = vunpack.c.l.b16 %v1717_v0 }
 0x963   :  { %v1738_v53 = vpack.c.bf16 %v4465_v7, %v4465_v7  ;;  %v1666_v56 = vmul.f32 0.25, %v4465_v7 }
 0x965   :  { %v1987_v38 = vunpack.c.l.b16 %v1738_v53 }
 0x969   :  { %3166 = vmatmul.msk.bf16.vlgmr.msrb.gmra.mxu3 %vm365_vm1, %v1759_v18  ;;  %v4478_v18 = vunpack.c.l.b16 %v1713_v43 }
 0x96a   :  { %v4473_v54 = vpop.permute.xlu0 %1643 }
 0x96b   :  { %v1737_v35 = vpack.c.bf16 %v4473_v54, %v4473_v54 }
 0x96d   :  { %v1986_v55 = vunpack.c.l.b16 %v1737_v35 }
 0x96f   :  { %v1988_v46 = vpack.c.b16 %v1987_v38, %v1986_v55 }
 0x971   :  { %1989 = vrot.lane.b32.xlu1 %v1988_v46, %s3774_s9 }
 0x972   :  { %v1622_v63 = vpop.permute.xlu1 %1621 }
 0x973   :  { %v1658_v44 = vmul.f32 0.25, %v1622_v63  ;;  %v1730_v30 = vpack.c.bf16 %v1622_v63, %v1622_v63 }
 0x975   :  { %v1714_v50 = vpack.c.bf16 %v1658_v44, %v1658_v44  ;;  %v1859_v12 = vunpack.c.l.b16 %v1730_v30 }
 0x977   :  { %v4480_v25 = vunpack.c.l.b16 %v1714_v50  ;;  %v1860_v40 = vpack.c.b16 %v1859_v12, %v1858_v20 }
 0x978   :  { %v1798_v26 = vpop.permute.xlu0 %1797 }
 0x979   :  { %v1855_v61 = vpack.c.b16 %v4480_v25, %v4478_v18  ;;  %v1803_v51 = vsel %vm365_vm1, %v1798_v26, 0  ;;  %1861 = vrot.lane.b32.xlu0 %v1860_v40, %s3774_s9  ;;  %3422 = vrot.lane.b32.xlu1 %v4414_v3, %s3784_s17  ;;  %v1665_v26 = vmul.f32 0.25, %v4473_v54 }
 0x97a   :  { %v1634_v29 = vpop.permute.xlu1 %1633  ;;  %1812 = vmatpush.bf16.xpose.msrb.mxu1 %v1803_v51 }
 0x97b   :  { %v1734_v27 = vpack.c.bf16 %v1634_v29, %v1634_v29  ;;  %v1721_v51 = vpack.c.bf16 %v1665_v26, %v1665_v26 }
 0x97d   :  { %v1923_v5 = vunpack.c.l.b16 %v1734_v27  ;;  %v1981_v27 = vunpack.c.l.b16 %v1721_v51 }
 0x97f   :  { %v1924_v2 = vpack.c.b16 %v1923_v5, %v1922_v47 }
 0x981   :  { %1925 = vrot.lane.b32.xlu2 %v1924_v2, %s3774_s9  ;;  %3167 = vmatmul.msk.bf16.vlgmr.msrb.gmra.mxu1 %vm365_vm1, %v1791_v41  ;;  %v1662_v41 = vmul.f32 0.25, %v1634_v29  ;;  %v1722_v29 = vpack.c.bf16 %v1666_v56, %v1666_v56 }
 0x983   :  { %v1718_v19 = vpack.c.bf16 %v1662_v41, %v1662_v41  ;;  %v1982_v2 = vunpack.c.l.b16 %v1722_v29 }
 0x985   :  { %v1918_v48 = vunpack.c.l.b16 %v1718_v19  ;;  %v1983_v18 = vpack.c.b16 %v1982_v2, %v1981_v27 }
 0x987   :  { %v1919_v58 = vpack.c.b16 %v1918_v48, %v1917_v15 }
 0x989   :  { %3427 = vrot.lane.b32.xlu2 %v4414_v3, %s3785_s18 }
 0x9b1   :  { %v1958_v11 = vpop.permute.xlu2 %1957 }
 0x9b2   :  { %v1963_v13 = vsel %vm365_vm1, %v1958_v11, 0 }
 0x9c9   :  { %v1830_v6 = vpop.permute.xlu1 %1829 }
 0x9ca   :  { %v1835_v21 = vsel %vm365_vm1, %v1830_v6, 0 }
 0x9cb   :  { %1844 = vmatpush.bf16.xpose.msra.mxu3 %v1835_v21 }
 0x9d1   :  { %v1894_v10 = vpop.permute.xlu1 %1893 }
 0x9d2   :  { %v1899_v14 = vsel %vm365_vm1, %v1894_v10, 0  ;;  %3168 = vmatmul.msk.bf16.vlgmr.msra.gmra.mxu3 %vm365_vm1, %v1823_v4 }
 0x9d3   :  { %1972 = vmatpush.bf16.xpose.msrb.mxu3 %v1963_v13  ;;  %1908 = vmatpush.bf16.xpose.msra.mxu1 %v1899_v14 }
 0x9da   :  { %3170 = vmatmul.msk.bf16.vlgmr.msra.gmra.mxu1 %vm365_vm1, %v1887_v42 }
 0x9db   :  { %2224 = vmatpush.bf16.msrb.mxu1 %v2212_v16  ;;  %v1926_v33 = vpop.permute.xlu2 %1925 }
 0x9dc   :  { %v1931_v4 = vsel %vm365_vm1, %v1926_v33, 0 }
 0x9dd   :  { %1940 = vmatpush.bf16.xpose.msrb.mxu2 %v1931_v4 }
 0x9e2   :  { %3172 = vmatmul.msk.bf16.vlgmr.msrb.gmra.mxu3 %vm365_vm1, %v1951_v1 }
 0x9e3   :  { %v1990_v16 = vpop.permute.xlu1 %1989  ;;  %v3428_v28 = vpop.permute.xlu2 %3427 }
 0x9e4   :  { %3171 = vmatmul.msk.bf16.vlgmr.msrb.gmra.mxu2 %vm365_vm1, %v1919_v58  ;;  %v3430_v17 = vunpack.i.h.bf16 %v3428_v28  ;;  %v3429_v42 = vunpack.i.l.bf16 %v3428_v28  ;;  %v1995_v59 = vsel %vm365_vm1, %v1990_v16, 0 }
 0x9e5   :  { %2252 = vmatpush.bf16.msra.mxu2 %v2240_v49 }
 0x9e6   :  { %v1752_v52 = vpack.c.bf16 %v3430_v17, %v3430_v17  ;;  %v1751_v31 = vpack.c.bf16 %v3429_v42, %v3429_v42 }
 0x9e8   :  { %v2379_v63 = vunpack.c.l.b16 %v1752_v52  ;;  %v2378_v43 = vunpack.c.l.b16 %v1751_v31 }
 0x9ea   :  { %v2380_v50 = vpack.c.b16 %v2379_v63, %v2378_v43 }
 0x9eb   :  { %v3423_v53 = vpop.permute.xlu1 %3422  ;;  %v1862_v35 = vpop.permute.xlu0 %1861 }
 0x9ec   :  { %v3425_v38 = vunpack.i.h.bf16 %v3423_v53  ;;  %v3424_v55 = vunpack.i.l.bf16 %v3423_v53  ;;  %v1867_v57 = vsel %vm365_vm1, %v1862_v35, 0  ;;  %v1782_v46 = vpop.f32.mrf.mxu3 }
 0x9ed   :  { %1876 = vmatpush.bf16.xpose.msra.mxu0 %v1867_v57  ;;  %v2011_v62 = vsel %vm365_vm1, %v1782_v46, -inf }
 0x9ee   :  { %v1744_v45 = vpack.c.bf16 %v3425_v38, %v3425_v38  ;;  %v1743_v1 = vpack.c.bf16 %v3424_v55, %v3424_v55  ;;  %2012 = vmax.xlane.f32.xlu1 %v2011_v62 }
 0x9f0   :  { %v2267_v44 = vunpack.c.l.b16 %v1744_v45  ;;  %v2266_v30 = vunpack.c.l.b16 %v1743_v1 }
 0x9f2   :  { %v2268_v20 = vpack.c.b16 %v2267_v44, %v2266_v30 }
 0x9f4   :  { %v1784_v12 = vpop.f32.mrf.mxu3  ;;  %3169 = vmatmul.msk.bf16.vlgmr.msra.gmra.mxu0 %vm365_vm1, %v1855_v61  ;;  %2280 = vmatpush.bf16.msra.mxu3 %v2268_v20 }
 0x9f5   :  { %2004 = vmatpush.bf16.xpose.msrb.mxu0 %v1995_v59  ;;  %v2014_v40 = vsel %vm365_vm1, %v1784_v12, -inf }
 0x9f6   :  { %2015 = vmax.xlane.f32.xlu0 %v2014_v40 }
 0x9f8   :  { %2392 = vmatpush.bf16.msrb.mxu3 %v2380_v50 }
 0x9fe   :  { %v1814_v47 = vpop.f32.mrf.mxu1 }
 0x9ff   :  { %v2017_v5 = vsel %vm365_vm1, %v1814_v47, -inf }
 0xa00   :  { %2018 = vmax.xlane.f32.xlu2 %v2017_v5 }
 0xa04   :  { %3173 = vmatmul.msk.bf16.vlgmr.msrb.gmra.mxu0 %vm365_vm1, %v1983_v18 }
 0xa06   :  { %v1816_v25 = vpop.f32.mrf.mxu1 }
 0xa07   :  { %v2020_v61 = vsel %vm365_vm1, %v1816_v25, -inf }
 0xa08   :  { %2021 = vmax.xlane.f32.xlu1 %v2020_v61 }
 0xa55   :  { %v4529_v11 = vpop.f32.mrf.mxu3 }
 0xa56   :  { %v2023_v7 = vsel %vm365_vm1, %v4529_v11, -inf }
 0xa57   :  { %v4533_v54 = vpop.f32.mrf.mxu1  ;;  %2024 = vmax.xlane.f32.xlu0 %v2023_v7 }
 0xa58   :  { %v2035_v6 = vsel %vm365_vm1, %v4533_v54, -inf }
 0xa59   :  { %2036 = vmax.xlane.f32.xlu1 %v2035_v6 }
 0xa5d   :  { %v4537_v21 = vpop.f32.mrf.mxu3 }
 0xa5e   :  { %v2026_v13 = vsel %vm365_vm1, %v4537_v21, -inf }
 0xa5f   :  { %v4541_v10 = vpop.f32.mrf.mxu1  ;;  %2027 = vmax.xlane.f32.xlu2 %v2026_v13 }
 0xa60   :  { %v2038_v14 = vsel %vm365_vm1, %v4541_v10, -inf }
 0xa61   :  { %v2013_v36 = vpop.xlane.xlu1 %2012  ;;  %2039 = vmax.xlane.f32.xlu0 %v2038_v14 }
 0xa62   :  { %v2059_v60 = vsub.f32 %v1782_v46, %v2013_v36 }
 0xa64   :  { %v2075_v41 = vmul.f32 1.442695, %v2059_v60 }
 0xa65   :  { %v4551_v4 = vpop.f32.mrf.mxu3 }
 0xa66   :  { %3563 = vpow2.f32 %v2075_v41  ;;  %v2047_v58 = vsel %vm365_vm1, %v4551_v4, -inf }
 0xa67   :  { %v4561_v42 = vpop.f32.mrf.mxu2 }
 0xa68   :  { %v2041_v53 = vsel %vm365_vm1, %v4561_v42, -inf }
 0xa69   :  { %v2016_v23 = vpop.xlane.xlu0 %2015 }
 0xa6a   :  { %v2060_v39 = vsub.f32 %v1784_v12, %v2016_v23 }
 0xa6c   :  { %v4545_v9 = vpop.eup %3563  ;;  %v2077_v19 = vmul.f32 1.442695, %v2060_v39 }
 0xa6d   :  { %v2107_v33 = vsel %vm365_vm1, %v4545_v9, 0.0  ;;  %v4569_v38 = vpop.f32.mrf.mxu3 }
 0xa6e   :  { %2108 = vadd.xlane.f32.xlu0 %v2107_v33  ;;  %3565 = vpow2.f32 %v2077_v19  ;;  %v2050_v62 = vsel %vm365_vm1, %v4569_v38, -inf }
 0xa6f   :  { %v4581_v63 = vpop.f32.mrf.mxu2 }
 0xa70   :  { %v2044_v44 = vsel %vm365_vm1, %v4581_v63, -inf }
 0xa71   :  { %v4549_v0 = vpop.f32.mrf.mxu0 }
 0xa72   :  { %v2029_v49 = vsel %vm365_vm1, %v4549_v0, -inf }
 0xa73   :  { %v2019_v48 = vpop.xlane.xlu2 %2018  ;;  %2030 = vmax.xlane.f32.xlu2 %v2029_v49 }
 0xa74   :  { %v2061_v15 = vsub.f32 %v1814_v47, %v2019_v48  ;;  %v4557_v16 = vpop.eup %3565 }
 0xa75   :  { %v2110_v31 = vsel %vm365_vm1, %v4557_v16, 0.0 }
 0xa76   :  { %2048 = vmax.xlane.f32.xlu0 %v2047_v58  ;;  %v2079_v28 = vmul.f32 1.442695, %v2061_v15 }
 0xa78   :  { %3567 = vpow2.f32 %v2079_v28 }
 0xa79   :  { %v4559_v17 = vpop.f32.mrf.mxu0 }
 0xa7a   :  { %v2032_v52 = vsel %vm365_vm1, %v4559_v17, -inf }
 0xa7b   :  { %2033 = vmax.xlane.f32.xlu1 %v2032_v52  ;;  %2111 = vadd.xlane.f32.xlu2 %v2110_v31  ;;  %v2022_v35 = vpop.xlane.xlu1 %2021 }
 0xa7c   :  { %v2062_v55 = vsub.f32 %v1816_v25, %v2022_v35 }
 0xa7e   :  { %2042 = vmax.xlane.f32.xlu0 %v2041_v53  ;;  %v4573_v46 = vpop.eup %3567  ;;  %v2081_v45 = vmul.f32 1.442695, %v2062_v55 }
 0xa7f   :  { %v2113_v1 = vsel %vm365_vm1, %v4573_v46, 0.0 }
 0xa80   :  { %3569 = vpow2.f32 %v2081_v45 }
 0xa81   :  { %v4571_v57 = vpop.f32.mrf.mxu0 }
 0xa82   :  { %v2053_v59 = vsel %vm365_vm1, %v4571_v57, -inf }
 0xa83   :  { %2054 = vmax.xlane.f32.xlu1 %v2053_v59  ;;  %2051 = vmax.xlane.f32.xlu2 %v2050_v62 }
 0xa86   :  { %2114 = vadd.xlane.f32.xlu0 %v2113_v1  ;;  %v4589_v20 = vpop.eup %3569 }
 0xa87   :  { %v2116_v50 = vsel %vm365_vm1, %v4589_v20, 0.0 }
 0xa89   :  { %v4583_v43 = vpop.f32.mrf.mxu0 }
 0xa8a   :  { %v2056_v30 = vsel %vm365_vm1, %v4583_v43, -inf }
 0xa8b   :  { %2045 = vmax.xlane.f32.xlu2 %v2044_v44 }
 0xa8e   :  { %2057 = vmax.xlane.f32.xlu0 %v2056_v30 }
 0xa93   :  { %2117 = vadd.xlane.f32.xlu2 %v2116_v50 }
 0xaca   :  { %v2025_v12 = vpop.xlane.xlu0 %2024 }
 0xacb   :  { %v2063_v40 = vsub.f32 %v4529_v11, %v2025_v12 }
 0xacc   :  { %v2037_v26 = vpop.xlane.xlu1 %2036 }
 0xacd   :  { %v2083_v56 = vmul.f32 1.442695, %v2063_v40  ;;  %v2067_v51 = vsub.f32 %v4533_v54, %v2037_v26 }
 0xacf   :  { %3571 = vpow2.f32 %v2083_v56  ;;  %v2091_v29 = vmul.f32 1.442695, %v2067_v51 }
 0xad1   :  { %3573 = vpow2.f32 %v2091_v29 }
 0xad2   :  { %v2028_v27 = vpop.xlane.xlu2 %2027 }
 0xad3   :  { %v2064_v47 = vsub.f32 %v4537_v21, %v2028_v27 }
 0xad4   :  { %v2040_v5 = vpop.xlane.xlu0 %2039 }
 0xad5   :  { %v4596_v2 = vpop.eup %3571  ;;  %v2085_v18 = vmul.f32 1.442695, %v2064_v47  ;;  %v2068_v25 = vsub.f32 %v4541_v10, %v2040_v5 }
 0xad6   :  { %v2119_v61 = vsel %vm365_vm1, %v4596_v2, 0.0 }
 0xad7   :  { %v4601_v11 = vpop.eup %3573  ;;  %3575 = vpow2.f32 %v2085_v18  ;;  %v2093_v7 = vmul.f32 1.442695, %v2068_v25  ;;  %2120 = vadd.xlane.f32.xlu2 %v2119_v61 }
 0xad8   :  { %v2131_v54 = vsel %vm365_vm1, %v4601_v11, 0.0 }
 0xad9   :  { %3577 = vpow2.f32 %v2093_v7  ;;  %2132 = vadd.xlane.f32.xlu0 %v2131_v54 }
 0xadd   :  { %v4605_v6 = vpop.eup %3575 }
 0xade   :  { %v2122_v21 = vsel %vm365_vm1, %v4605_v6, 0.0 }
 0xadf   :  { %v4609_v13 = vpop.eup %3577  ;;  %2123 = vadd.xlane.f32.xlu1 %v2122_v21 }
 0xae0   :  { %v2134_v10 = vsel %vm365_vm1, %v4609_v13, 0.0 }
 0xae1   :  { %v2109_v14 = vpop.xlane.xlu0 %2108  ;;  %2135 = vadd.xlane.f32.xlu2 %v2134_v10 }
 0xae2   :  { %3579 = vrcp.f32 %v2109_v14 }
 0xae6   :  { %v2031_v36 = vpop.xlane.xlu2 %2030 }
 0xae7   :  { %v2065_v60 = vsub.f32 %v4549_v0, %v2031_v36 }
 0xae8   :  { %v3580_v48 = vpop.eup %3579 }
 0xae9   :  { %v2087_v41 = vmul.f32 1.442695, %v2065_v60  ;;  %v2049_v23 = vpop.xlane.xlu0 %2048  ;;  %v2171_v52 = vmul.f32 %v3580_v48, %v4545_v9 }
 0xaea   :  { %v2071_v39 = vsub.f32 %v4551_v4, %v2049_v23 }
 0xaeb   :  { %3581 = vpow2.f32 %v2087_v41  ;;  %v2187_v53 = vpack.c.bf16 %v2171_v52, %v2171_v52 }
 0xaec   :  { %v2099_v19 = vmul.f32 1.442695, %v2071_v39 }
 0xaed   :  { %v2205_v9 = vunpack.c.l.b16 %v2187_v53 }
 0xaee   :  { %v2034_v33 = vpop.xlane.xlu1 %2033  ;;  %v2112_v49 = vpop.xlane.xlu2 %2111 }
 0xaef   :  { %v2066_v15 = vsub.f32 %v4559_v17, %v2034_v33  ;;  %3583 = vrcp.f32 %v2112_v49 }
 0xaf0   :  { %3585 = vpow2.f32 %v2099_v19 }
 0xaf1   :  { %v4616_v58 = vpop.eup %3581  ;;  %v2089_v28 = vmul.f32 1.442695, %v2066_v15  ;;  %v2043_v4 = vpop.xlane.xlu0 %2042 }
 0xaf2   :  { %v2125_v0 = vsel %vm365_vm1, %v4616_v58, 0.0  ;;  %v2069_v54 = vsub.f32 %v4561_v42, %v2043_v4 }
 0xaf3   :  { %3587 = vpow2.f32 %v2089_v28  ;;  %2126 = vadd.xlane.f32.xlu0 %v2125_v0 }
 0xaf4   :  { %v2095_v14 = vmul.f32 1.442695, %v2069_v54 }
 0xaf5   :  { %v3584_v31 = vpop.eup %3583 }
 0xaf6   :  { %v2172_v35 = vmul.f32 %v3584_v31, %v4557_v16  ;;  %v2052_v55 = vpop.xlane.xlu2 %2051  ;;  %v4622_v59 = vpop.eup %3585 }
 0xaf7   :  { %v2143_v44 = vsel %vm365_vm1, %v4622_v59, 0.0  ;;  %v2072_v27 = vsub.f32 %v4569_v38, %v2052_v55  ;;  %v2055_v21 = vpop.xlane.xlu1 %2054 }
 0xaf8   :  { %v2188_v17 = vpack.c.bf16 %v2172_v35, %v2172_v35 }
 0xaf9   :  { %v4624_v62 = vpop.eup %3587  ;;  %3437 = vrot.lane.b32.xlu2 %v4442_v34, %s3784_s17  ;;  %v2115_v30 = vpop.xlane.xlu0 %2114  ;;  %v2101_v25 = vmul.f32 1.442695, %v2072_v27 }
 0xafa   :  { %v2206_v45 = vunpack.c.l.b16 %v2188_v17  ;;  %v2128_v1 = vsel %vm365_vm1, %v4624_v62, 0.0  ;;  %3589 = vrcp.f32 %v2115_v30 }
 0xafb   :  { %2129 = vadd.xlane.f32.xlu1 %v2128_v1  ;;  %2144 = vadd.xlane.f32.xlu0 %v2143_v44 }
 0xafc   :  { %v2207_v16 = vpack.c.b16 %v2206_v45, %v2205_v9 }
 0xafe   :  { %3174 = vmatmul.msk.bf16.vlgmr.msrb.gmra.mxu1 %vm365_vm1, %v2207_v16  ;;  %v2046_v50 = vpop.xlane.xlu2 %2045 }
 0xb00   :  { %v3590_v40 = vpop.eup %3589 }
 0xb01   :  { %v2173_v26 = vmul.f32 %v3590_v40, %v4573_v46  ;;  %v2070_v46 = vsub.f32 %v4581_v63, %v2046_v50  ;;  %v2073_v63 = vsub.f32 %v4571_v57, %v2055_v21  ;;  %v2058_v36 = vpop.xlane.xlu0 %2057 }
 0xb02   :  { %v2074_v60 = vsub.f32 %v4583_v43, %v2058_v36 }
 0xb03   :  { %v2189_v51 = vpack.c.bf16 %v2173_v26, %v2173_v26  ;;  %v2097_v7 = vmul.f32 1.442695, %v2070_v46  ;;  %v2103_v41 = vmul.f32 1.442695, %v2073_v63 }
 0xb04   :  { %v2105_v23 = vmul.f32 1.442695, %v2074_v60 }
 0xb05   :  { %v2233_v5 = vunpack.c.l.b16 %v2189_v51 }
 0xb06   :  { %v2118_v12 = vpop.xlane.xlu2 %2117 }
 0xb07   :  { %3591 = vrcp.f32 %v2118_v12 }
 0xb08   :  { %3593 = vpow2.f32 %v2101_v25 }
 0xb09   :  { %3595 = vpow2.f32 %v2097_v7 }
 0xb0a   :  { %3597 = vpow2.f32 %v2095_v14 }
 0xb0b   :  { %3599 = vpow2.f32 %v2103_v41 }
 0xb0c   :  { %3601 = vpow2.f32 %v2105_v23 }
 0xb0d   :  { %v3592_v56 = vpop.eup %3591 }
 0xb0e   :  { %v2174_v29 = vmul.f32 %v3592_v56, %v4589_v20  ;;  %v4642_v20 = vpop.eup %3593 }
 0xb0f   :  { %3432 = vrot.lane.b32.xlu0 %v4414_v3, %s3783_s16  ;;  %v2146_v3 = vsel %vm365_vm1, %v4642_v20, 0.0  ;;  %v4646_v38 = vpop.eup %3595 }
 0xb10   :  { %v2190_v47 = vpack.c.bf16 %v2174_v29, %v2174_v29  ;;  %v2140_v10 = vsel %vm365_vm1, %v4646_v38, 0.0  ;;  %v4653_v39 = vpop.eup %3597 }
 0xb11   :  { %v2137_v42 = vsel %vm365_vm1, %v4653_v39, 0.0  ;;  %v4657_v19 = vpop.eup %3599 }
 0xb12   :  { %v2234_v18 = vunpack.c.l.b16 %v2190_v47  ;;  %v4659_v33 = vpop.eup %3601  ;;  %v2149_v57 = vsel %vm365_vm1, %v4657_v19, 0.0 }
 0xb13   :  { %v2152_v43 = vsel %vm365_vm1, %v4659_v33, 0.0 }
 0xb14   :  { %v2235_v61 = vpack.c.b16 %v2234_v18, %v2233_v5  ;;  %3442 = vrot.lane.b32.xlu1 %v4442_v34, %s3783_s16 }
 0xb16   :  { %3175 = vmatmul.msk.bf16.vlgmr.msra.gmra.mxu2 %vm365_vm1, %v2235_v61 }
 0xb22   :  { %2147 = vadd.xlane.f32.xlu2 %v2146_v3 }
 0xb2a   :  { %2141 = vadd.xlane.f32.xlu2 %v2140_v10 }
 0xb39   :  { %2138 = vadd.xlane.f32.xlu0 %v2137_v42 }
 0xb3e   :  { %2150 = vadd.xlane.f32.xlu1 %v2149_v57 }
 0xb41   :  { %2153 = vadd.xlane.f32.xlu0 %v2152_v43 }
 0xb42   :  { %3447 = vrot.lane.b32.xlu2 %v4442_v34, %s3785_s18 }
 0xb4a   :  { %v2121_v49 = vpop.xlane.xlu2 %2120 }
 0xb4b   :  { %3603 = vrcp.f32 %v2121_v49 }
 0xb4c   :  { %v2133_v45 = vpop.xlane.xlu0 %2132 }
 0xb51   :  { %v3604_v15 = vpop.eup %3603 }
 0xb52   :  { %v2124_v48 = vpop.xlane.xlu1 %2123  ;;  %v2175_v52 = vmul.f32 %v3604_v15, %v4596_v2 }
 0xb53   :  { %3605 = vrcp.f32 %v2124_v48 }
 0xb54   :  { %v2136_v28 = vpop.xlane.xlu2 %2135  ;;  %v2191_v4 = vpack.c.bf16 %v2175_v52, %v2175_v52 }
 0xb56   :  { %v2261_v9 = vunpack.c.l.b16 %v2191_v4 }
 0xb59   :  { %v3606_v0 = vpop.eup %3605 }
 0xb5a   :  { %v2176_v31 = vmul.f32 %v3606_v0, %v4605_v6 }
 0xb5c   :  { %v2192_v53 = vpack.c.bf16 %v2176_v31, %v2176_v31  ;;  %v3438_v35 = vpop.permute.xlu2 %3437 }
 0xb5d   :  { %v3440_v55 = vunpack.i.h.bf16 %v3438_v35  ;;  %v3439_v17 = vunpack.i.l.bf16 %v3438_v35 }
 0xb5e   :  { %v2262_v1 = vunpack.c.l.b16 %v2192_v53 }
 0xb5f   :  { %v1746_v34 = vpack.c.bf16 %v3440_v55, %v3440_v55  ;;  %v1745_v44 = vpack.c.bf16 %v3439_v17, %v3439_v17 }
 0xb60   :  { %v2263_v16 = vpack.c.b16 %v2262_v1, %v2261_v9 }
 0xb61   :  { %v2295_v30 = vunpack.c.l.b16 %v1746_v34  ;;  %v2294_v50 = vunpack.c.l.b16 %v1745_v44 }
 0xb62   :  { %3176 = vmatmul.msk.bf16.vlgmr.msra.gmra.mxu3 %vm365_vm1, %v2263_v16 }
 0xb63   :  { %v2296_v12 = vpack.c.b16 %v2295_v30, %v2294_v50 }
 0xb65   :  { %2308 = vmatpush.bf16.msra.mxu0 %v2296_v12 }
 0xb66   :  { %v2127_v2 = vpop.xlane.xlu0 %2126 }
 0xb67   :  { %3607 = vrcp.f32 %v2127_v2 }
 0xb6d   :  { %v3608_v6 = vpop.eup %3607 }
 0xb6e   :  { %v2130_v40 = vpop.xlane.xlu1 %2129  ;;  %v2177_v26 = vmul.f32 %v3608_v6, %v4616_v58  ;;  %v2145_v47 = vpop.xlane.xlu0 %2144 }
 0xb6f   :  { %3609 = vrcp.f32 %v2130_v40 }
 0xb70   :  { %3611 = vrcp.f32 %v2136_v28  ;;  %v2193_v51 = vpack.c.bf16 %v2177_v26, %v2177_v26 }
 0xb71   :  { %3613 = vrcp.f32 %v2133_v45 }
 0xb72   :  { %v2289_v5 = vunpack.c.l.b16 %v2193_v51  ;;  %3615 = vrcp.f32 %v2145_v47 }
 0xb75   :  { %v3610_v56 = vpop.eup %3609 }
 0xb76   :  { %v2178_v29 = vmul.f32 %v3610_v56, %v4624_v62  ;;  %v3612_v25 = vpop.eup %3611 }
 0xb77   :  { %v3614_v46 = vpop.eup %3613  ;;  %v2180_v7 = vmul.f32 %v3612_v25, %v4609_v13 }
 0xb78   :  { %v2194_v27 = vpack.c.bf16 %v2178_v29, %v2178_v29  ;;  %v2179_v3 = vmul.f32 %v3614_v46, %v4601_v11  ;;  %v3616_v4 = vpop.eup %3615 }
 0xb79   :  { %v2196_v10 = vpack.c.bf16 %v2180_v7, %v2180_v7  ;;  %v2183_v31 = vmul.f32 %v3616_v4, %v4622_v59 }
 0xb7a   :  { %v2290_v18 = vunpack.c.l.b16 %v2194_v27  ;;  %v2195_v63 = vpack.c.bf16 %v2179_v3, %v2179_v3 }
 0xb7b   :  { %v2318_v23 = vunpack.c.l.b16 %v2196_v10  ;;  %v2199_v35 = vpack.c.bf16 %v2183_v31, %v2183_v31 }
 0xb7c   :  { %v2291_v61 = vpack.c.b16 %v2290_v18, %v2289_v5  ;;  %v2317_v49 = vunpack.c.l.b16 %v2195_v63 }
 0xb7d   :  { %v2373_v45 = vunpack.c.l.b16 %v2199_v35  ;;  %v3325_v35 = vld [vmem:[%s4817_s2 + $0x30] sm:$0xff] }
 0xb7e   :  { %3177 = vmatmul.msk.bf16.vlgmr.msra.gmra.mxu0 %vm365_vm1, %v2291_v61  ;;  %v2319_v13 = vpack.c.b16 %v2318_v23, %v2317_v49 }
 0xb81   :  { %v3433_v58 = vpop.permute.xlu0 %3432 }
 0xb82   :  { %v3435_v54 = vunpack.i.h.bf16 %v3433_v58  ;;  %v3434_v21 = vunpack.i.l.bf16 %v3433_v58 }
 0xb84   :  { %v1748_v14 = vpack.c.bf16 %v3435_v54, %v3435_v54  ;;  %v1747_v62 = vpack.c.bf16 %v3434_v21, %v3434_v21 }
 0xb86   :  { %v2323_v36 = vunpack.c.l.b16 %v1748_v14  ;;  %v2322_v60 = vunpack.c.l.b16 %v1747_v62  ;;  %v3443_v41 = vpop.permute.xlu1 %3442 }
 0xb87   :  { %v3445_v42 = vunpack.i.h.bf16 %v3443_v41  ;;  %v3444_v57 = vunpack.i.l.bf16 %v3443_v41 }
 0xb88   :  { %v2324_v43 = vpack.c.b16 %v2323_v36, %v2322_v60  ;;  %v2226_v36 = vpop.f32.mrf.mxu1 }
 0xb89   :  { %v1750_v48 = vpack.c.bf16 %v3445_v42, %v3445_v42  ;;  %v1749_v15 = vpack.c.bf16 %v3444_v57, %v3444_v57 }
 0xb8a   :  { %2336 = vmatpush.bf16.msra.mxu1 %v2324_v43 }
 0xb8b   :  { %v2351_v11 = vunpack.c.l.b16 %v1750_v48  ;;  %v2350_v28 = vunpack.c.l.b16 %v1749_v15 }
 0xb8d   :  { %v2352_v52 = vpack.c.b16 %v2351_v11, %v2350_v28  ;;  %3178 = vmatmul.msk.bf16.vlgmr.msra.gmra.mxu1 %vm365_vm1, %v2319_v13 }
 0xb8f   :  { %2364 = vmatpush.bf16.msrb.mxu2 %v2352_v52 }
 0xb95   :  { %v2148_v0 = vpop.xlane.xlu2 %2147 }
 0xb96   :  { %3617 = vrcp.f32 %v2148_v0 }
 0xb99   :  { %v2254_v49 = vpop.f32.mrf.mxu2 }
 0xb9c   :  { %v3618_v53 = vpop.eup %3617 }
 0xb9d   :  { %v2184_v55 = vmul.f32 %v3618_v53, %v4642_v20  ;;  %v2142_v17 = vpop.xlane.xlu2 %2141  ;;  %v3326_v53 = vld [vmem:[%s4817_s2 + $0x38] sm:$0xff] }
 0xb9e   :  { %3619 = vrcp.f32 %v2142_v17  ;;  %2532 = vmatpush.bf16.msrb.mxu1 %v3326_v53  ;;  %v3323_v17 = vld [vmem:[%s4817_s2 + $0x20] sm:$0xff] }
 0xb9f   :  { %v2200_v9 = vpack.c.bf16 %v2184_v55, %v2184_v55  ;;  %v3324_v55 = vld [vmem:[%s4817_s2 + $0x28] sm:$0xff] }
 0xba1   :  { %v2374_v1 = vunpack.c.l.b16 %v2200_v9  ;;  %v2256_v13 = vpop.f32.mrf.mxu2 }
 0xba2   :  { %2533 = vmatpush.bf16.msrb.mxu1 %v3325_v35 }
 0xba3   :  { %v2375_v34 = vpack.c.b16 %v2374_v1, %v2373_v45 }
 0xba4   :  { %v3620_v26 = vpop.eup %3619 }
 0xba5   :  { %3180 = vmatmul.msk.bf16.vlgmr.msrb.gmra.mxu3 %vm365_vm1, %v2375_v34  ;;  %v3448_v44 = vpop.permute.xlu2 %3447  ;;  %v2182_v20 = vmul.f32 %v3620_v26, %v4646_v38 }
 0xba6   :  { %v3450_v16 = vunpack.i.h.bf16 %v3448_v44  ;;  %v3449_v30 = vunpack.i.l.bf16 %v3448_v44  ;;  %2534 = vmatpush.bf16.msrb.mxu1 %v3324_v55 }
 0xba7   :  { %v2198_v29 = vpack.c.bf16 %v2182_v20, %v2182_v20 }
 0xba8   :  { %v1754_v50 = vpack.c.bf16 %v3450_v16, %v3450_v16  ;;  %v1753_v12 = vpack.c.bf16 %v3449_v30, %v3449_v30 }
 0xba9   :  { %v2346_v25 = vunpack.c.l.b16 %v2198_v29 }
 0xbaa   :  { %v2407_v2 = vunpack.c.l.b16 %v1754_v50  ;;  %v2406_v40 = vunpack.c.l.b16 %v1753_v12  ;;  %2535 = vmatpush.bf16.msrb.mxu1 %v3323_v17 }
 0xbac   :  { %v2408_v59 = vpack.c.b16 %v2407_v2, %v2406_v40  ;;  %v2139_v6 = vpop.xlane.xlu0 %2138 }
 0xbad   :  { %3621 = vrcp.f32 %v2139_v6 }
 0xbae   :  { %2420 = vmatpush.bf16.msrb.mxu0 %v2408_v59 }
 0xbb1   :  { %v2151_v56 = vpop.xlane.xlu1 %2150 }
 0xbb2   :  { %3623 = vrcp.f32 %v2151_v56 }
 0xbb3   :  { %v3622_v51 = vpop.eup %3621 }
 0xbb4   :  { %v2181_v27 = vmul.f32 %v3622_v51, %v4653_v39  ;;  %v2154_v47 = vpop.xlane.xlu0 %2153 }
 0xbb5   :  { %3625 = vrcp.f32 %v2154_v47 }
 0xbb6   :  { %v2197_v5 = vpack.c.bf16 %v2181_v27, %v2181_v27 }
 0xbb8   :  { %v3624_v18 = vpop.eup %3623  ;;  %v2345_v61 = vunpack.c.l.b16 %v2197_v5 }
 0xbb9   :  { %v2185_v46 = vmul.f32 %v3624_v18, %v4657_v19  ;;  %v2228_v19 = vpop.f32.mrf.mxu1 }
 0xbba   :  { %v2347_v7 = vpack.c.b16 %v2346_v25, %v2345_v61 }
 0xbbb   :  { %v3626_v3 = vpop.eup %3625  ;;  %v2201_v58 = vpack.c.bf16 %v2185_v46, %v2185_v46 }
 0xbbc   :  { %v2186_v54 = vmul.f32 %v3626_v3, %v4659_v33  ;;  %3179 = vmatmul.msk.bf16.vlgmr.msrb.gmra.mxu2 %vm365_vm1, %v2347_v7 }
 0xbbd   :  { %v2401_v21 = vunpack.c.l.b16 %v2201_v58 }
 0xbbe   :  { %v2202_v38 = vpack.c.bf16 %v2186_v54, %v2186_v54 }
 0xbc0   :  { %v2402_v10 = vunpack.c.l.b16 %v2202_v38 }
 0xbc2   :  { %v2403_v14 = vpack.c.b16 %v2402_v10, %v2401_v21 }
 0xbc4   :  { %3181 = vmatmul.msk.bf16.vlgmr.msrb.gmra.mxu0 %vm365_vm1, %v2403_v14  ;;  %v1504_v14 = vld [vmem:[#allocation8 + $0x11] ss:$0 sm:$0xff] }
 0xbe5   :  { %v2282_v39 = vpop.f32.mrf.mxu3 }
 0xbed   :  { %v2284_v62 = vpop.f32.mrf.mxu3 }
 0xbee   :  { %v3456_v63 = vpack.i.bf16 %v2284_v62, %v2282_v39 }
 0xbf0   :  { %3457 = vrot.lane.b32.xlu0 %v3456_v63, %s3782_s24 }
 0xbfb   :  { %v2310_v41 = vpop.f32.mrf.mxu0 }
 0xc03   :  { %v2312_v33 = vpop.f32.mrf.mxu0 }
 0xc04   :  { %v3466_v57 = vpack.i.bf16 %v2312_v33, %v2310_v41 }
 0xc0a   :  { %v2338_v60 = vpop.f32.mrf.mxu1 }
 0xc12   :  { %v2340_v23 = vpop.f32.mrf.mxu1 }
 0xc13   :  { %v3451_v42 = vpack.i.bf16 %v2340_v23, %v2338_v60 }
 0xc15   :  { %3452 = vrot.lane.b32.xlu2 %v3451_v42, %s3787_s12 }
 0xc1d   :  { %3467 = vrot.lane.b32.xlu2 %v3466_v57, %s3782_s24 }
 0xc28   :  { %v2394_v43 = vpop.f32.mrf.mxu3 }
 0xc30   :  { %v2396_v48 = vpop.f32.mrf.mxu3 }
 0xc31   :  { %v3461_v15 = vpack.i.bf16 %v2396_v48, %v2394_v43 }
 0xc33   :  { %3462 = vrot.lane.b32.xlu0 %v3461_v15, %s3786_s11 }
 0xc3f   :  { %v2366_v11 = vpop.f32.mrf.mxu2 }
 0xc41   :  { %v2422_v28 = vpop.f32.mrf.mxu0 }
 0xc47   :  { %v2368_v52 = vpop.f32.mrf.mxu2 }
 0xc48   :  { %v3471_v0 = vpack.i.bf16 %v2368_v52, %v2366_v11 }
 0xc49   :  { %v2424_v4 = vpop.f32.mrf.mxu0 }
 0xc4a   :  { %v3476_v31 = vpack.i.bf16 %v2424_v4, %v2422_v28  ;;  %3472 = vrot.lane.b32.xlu0 %v3471_v0, %s3787_s12 }
 0xc4c   :  { %3477 = vrot.lane.b32.xlu1 %v3476_v31, %s3786_s11 }
 0xc62   :  { %v3458_v9 = vpop.permute.xlu0 %3457 }
 0xc63   :  { %v3460_v1 = vunpack.i.h.bf16 %v3458_v9  ;;  %v3459_v34 = vunpack.i.l.bf16 %v3458_v9 }
 0xc65   :  { %v2476_v50 = vsel %vm365_vm1, %v2228_v19, %v3460_v1  ;;  %v2475_v12 = vsel %vm365_vm1, %v2226_v36, %v3459_v34 }
 0xc6f   :  { %v3453_v45 = vpop.permute.xlu2 %3452 }
 0xc70   :  { %v3455_v44 = vunpack.i.h.bf16 %v3453_v45  ;;  %v3454_v16 = vunpack.i.l.bf16 %v3453_v45 }
 0xc72   :  { %v2480_v59 = vsel %vm1078_vm2, %v2476_v50, %v3455_v44  ;;  %v2479_v6 = vsel %vm1078_vm2, %v2475_v12, %v3454_v16  ;;  %v3329_v50 = vld [vmem:[#allocation5 + $0x30] sm:$0xff] }
 0xc77   :  { %v3468_v51 = vpop.permute.xlu2 %3467 }
 0xc78   :  { %v3470_v29 = vunpack.i.h.bf16 %v3468_v51  ;;  %v3469_v27 = vunpack.i.l.bf16 %v3468_v51 }
 0xc7a   :  { %v2478_v25 = vsel %vm365_vm1, %v2256_v13, %v3470_v29  ;;  %v2477_v61 = vsel %vm365_vm1, %v2254_v49, %v3469_v27 }
 0xca5   :  { %v3463_v30 = vpop.permute.xlu0 %3462 }
 0xca6   :  { %v3465_v2 = vunpack.i.h.bf16 %v3463_v30  ;;  %v3464_v40 = vunpack.i.l.bf16 %v3463_v30  ;;  %v3330_v30 = vld [vmem:[#allocation5 + $0x38] sm:$0xff] }
 0xca7   :  { %2692 = vmatpush.bf16.msra.mxu2 %v3330_v30 }
 0xca8   :  { %v2483_v26 = vsel %vm1083_vm3, %v2479_v6, %v3464_v40  ;;  %v2484_v20 = vsel %vm1083_vm3, %v2480_v59, %v3465_v2  ;;  %v3328_v2 = vld [vmem:[#allocation5 + $0x28] sm:$0xff]  ;;  %v3327_v6 = vld [vmem:[#allocation5 + $0x20] sm:$0xff] }
 0xca9   :  { %v2487_v56 = vpack.c.bf16 %v2484_v20, %v2483_v26 }
 0xcab   :  { %3206 = vmatmul.msk.bf16.vlgmr.msrb.gmra.mxu1 %vm164_vm0, %v2487_v56  ;;  %2693 = vmatpush.bf16.msra.mxu2 %v3329_v50 }
 0xcaf   :  { %2694 = vmatpush.bf16.msra.mxu2 %v3328_v2  ;;  %v3334_v2 = vld [vmem:[%s4819_s4 + $0x58] sm:$0xff] }
 0xcb3   :  { %2695 = vmatpush.bf16.msra.mxu2 %v3327_v6  ;;  %v1505_v6 = vld [vmem:[#allocation8 + $0x12] ss:$0 sm:$0xff] }
 0xcbc   :  { %v3473_v47 = vpop.permute.xlu0 %3472 }
 0xcbd   :  { %v3475_v5 = vunpack.i.h.bf16 %v3473_v47  ;;  %v3474_v18 = vunpack.i.l.bf16 %v3473_v47 }
 0xcbe   :  { %v3478_v46 = vpop.permute.xlu1 %3477 }
 0xcbf   :  { %v2481_v7 = vsel %vm1078_vm2, %v2477_v61, %v3474_v18  ;;  %v2482_v3 = vsel %vm1078_vm2, %v2478_v25, %v3475_v5  ;;  %v3480_v58 = vunpack.i.h.bf16 %v3478_v46  ;;  %v3479_v54 = vunpack.i.l.bf16 %v3478_v46 }
 0xcc1   :  { %v2486_v38 = vsel %vm1083_vm3, %v2482_v3, %v3480_v58  ;;  %v2485_v21 = vsel %vm1083_vm3, %v2481_v7, %v3479_v54 }
 0xcc2   :  { %v2488_v10 = vpack.c.bf16 %v2486_v38, %v2485_v21 }
 0xcc4   :  { %3207 = vmatmul.msk.bf16.gmra.mxu1 %vm164_vm0, %v2488_v10  ;;  %v1507_v10 = vld [vmem:[#allocation8 + $0x14] ss:$0 sm:$0xff] }
 0xd28   :  { %v2537_v39 = vpop.f32.mrf.mxu1 }
 0xd29   :  { %v2538_v62 = vadd.f32 %v2537_v39, %v1504_v14 }
 0xd2b   :  { %v2547_v63 = vadd.f32 %v2538_v62, %v4384_v22 }
 0xd2d   :  { %v2551_v36 = vsel %vm164_vm0, %v2547_v63, 0.0 }
 0xd2e   :  { %2552 = vadd.xlane.f32.xlu2 %v2551_v36 }
 0xd30   :  { %v2539_v19 = vpop.f32.mrf.mxu1 }
 0xd31   :  { %v2540_v60 = vadd.f32 %v2539_v19, %v1504_v14  ;;  %v1508_v19 = vld [vmem:[#allocation8 + $0x15] ss:$0 sm:$0xff] }
 0xd33   :  { %v2548_v41 = vadd.f32 %v2540_v60, %v4386_v24  ;;  %v3338_v60 = vld [vmem:[%s4819_s4 + $0x78] sm:$0xff] }
 0xd34   :  { %2778 = vmatpush.bf16.msra.mxu3 %v3338_v60 }
 0xd35   :  { %v2554_v23 = vsel %vm164_vm0, %v2548_v41, 0.0 }
 0xd36   :  { %2555 = vadd.xlane.f32.xlu0 %v2554_v23 }
 0xd41   :  { %v2542_v42 = vpop.f32.mrf.mxu1 }
 0xd42   :  { %v2543_v33 = vadd.f32 %v2542_v42, %v1504_v14 }
 0xd44   :  { %v2549_v57 = vadd.f32 %v2543_v33, %v4396_v32  ;;  %v3337_v33 = vld [vmem:[%s4819_s4 + $0x70] sm:$0xff] }
 0xd45   :  { %2779 = vmatpush.bf16.msra.mxu3 %v3337_v33 }
 0xd46   :  { %v2557_v43 = vsel %vm164_vm0, %v2549_v57, 0.0 }
 0xd47   :  { %2558 = vadd.xlane.f32.xlu1 %v2557_v43 }
 0xd49   :  { %v2544_v49 = vpop.f32.mrf.mxu1 }
 0xd4a   :  { %v2545_v48 = vadd.f32 %v2544_v49, %v1504_v14 }
 0xd4c   :  { %v2550_v22 = vadd.f32 %v2545_v48, %v4398_v37 }
 0xd4e   :  { %v2560_v15 = vsel %vm164_vm0, %v2550_v22, 0.0 }
 0xd4f   :  { %2561 = vadd.xlane.f32.xlu2 %v2560_v15 }
 0xda1   :  { %v2553_v13 = vpop.xlane.xlu2 %2552 }
 0xda2   :  { %v2563_v24 = vmul.f32 %v2553_v13, %v4246_v8  ;;  %v3336_v13 = vld [vmem:[%s4819_s4 + $0x68] sm:$0xff] }
 0xda3   :  { %2780 = vmatpush.bf16.msra.mxu3 %v3336_v13 }
 0xda4   :  { %v2567_v11 = vsub.f32 %v2547_v63, %v2563_v24 }
 0xda6   :  { %v2571_v28 = vmul.f32 %v2567_v11, %v2567_v11 }
 0xda8   :  { %v2575_v52 = vsel %vm164_vm0, %v2571_v28, 0.0  ;;  %v3335_v28 = vld [vmem:[%s4819_s4 + $0x60] sm:$0xff] }
 0xda9   :  { %v2556_v0 = vpop.xlane.xlu0 %2555  ;;  %2576 = vadd.xlane.f32.xlu0 %v2575_v52  ;;  %2781 = vmatpush.bf16.msra.mxu3 %v3335_v28 }
 0xdaa   :  { %v2564_v32 = vmul.f32 %v2556_v0, %v4246_v8 }
 0xdac   :  { %v2568_v4 = vsub.f32 %v2548_v41, %v2564_v32 }
 0xdad   :  { %2782 = vmatpush.bf16.msra.mxu3 %v3334_v2 }
 0xdae   :  { %v2572_v31 = vmul.f32 %v2568_v4, %v2568_v4 }
 0xdb0   :  { %v2578_v53 = vsel %vm164_vm0, %v2572_v31, 0.0 }
 0xdb1   :  { %2579 = vadd.xlane.f32.xlu2 %v2578_v53 }
 0xdba   :  { %v2559_v37 = vpop.xlane.xlu1 %2558 }
 0xdbb   :  { %v2565_v35 = vmul.f32 %v2559_v37, %v4246_v8 }
 0xdbd   :  { %v4730_v55 = vsub.f32 %v2549_v57, %v2565_v35 }
 0xdbf   :  { %v2573_v17 = vmul.f32 %v4730_v55, %v4730_v55 }
 0xdc1   :  { %v2581_v9 = vsel %vm164_vm0, %v2573_v17, 0.0 }
 0xdc2   :  { %v2562_v45 = vpop.xlane.xlu2 %2561  ;;  %2582 = vadd.xlane.f32.xlu0 %v2581_v9 }
 0xdc3   :  { %v2566_v1 = vmul.f32 %v2562_v45, %v4246_v8 }
 0xdc5   :  { %v4736_v34 = vsub.f32 %v2550_v22, %v2566_v1 }
 0xdc7   :  { %v2574_v44 = vmul.f32 %v4736_v34, %v4736_v34 }
 0xdc9   :  { %v2584_v16 = vsel %vm164_vm0, %v2574_v44, 0.0 }
 0xdca   :  { %2585 = vadd.xlane.f32.xlu2 %v2584_v16 }
 0xe1c   :  { %v2577_v12 = vpop.xlane.xlu0 %2576 }
 0xe1d   :  { %v2587_v40 = vmul.f32 %v2577_v12, %v4246_v8 }
 0xe1f   :  { %v2591_v59 = vadd.f32 1e-05, %v2587_v40  ;;  %v3331_v40 = vld [vmem:[%s4819_s4 + $0x40] sm:$0xff] }
 0xe21   :  { %3627 = vrsqrt.f32 %v2591_v59  ;;  %vm2601_vm2 = vweird.f32 %v2591_v59 }
 0xe24   :  { %v2580_v26 = vpop.xlane.xlu2 %2579 }
 0xe25   :  { %v2588_v20 = vmul.f32 %v2580_v26, %v4246_v8 }
 0xe27   :  { %v3628_v56 = vpop.eup %3627  ;;  %v2592_v51 = vadd.f32 1e-05, %v2588_v20 }
 0xe28   :  { %v2596_v29 = vmul.f32 %v3628_v56, %v2591_v59  ;;  %vm2602_vm1 = vweird.f32 %v3628_v56 }
 0xe29   :  { %3629 = vrsqrt.f32 %v2592_v51  ;;  %vm2603_vm3 = vmor %vm2601_vm2, %vm2602_vm1  ;;  %vm2611_vm6 = vweird.f32 %v2592_v51 }
 0xe2a   :  { %v2597_v27 = vmul.f32 %v3628_v56, %v2596_v29 }
 0xe2c   :  { %v2598_v47 = vmul.f32 0.5, %v2597_v27 }
 0xe2e   :  { %v2599_v5 = vsub.f32 1.5, %v2598_v47 }
 0xe2f   :  { %v3630_v18 = vpop.eup %3629 }
 0xe30   :  { %v2600_v25 = vmul.f32 %v3628_v56, %v2599_v5  ;;  %v2606_v61 = vmul.f32 %v3630_v18, %v2592_v51  ;;  %vm2612_vm5 = vweird.f32 %v3630_v18 }
 0xe31   :  { %vm2613_vm7 = vmor %vm2611_vm6, %vm2612_vm5 }
 0xe32   :  { %v2607_v46 = vmul.f32 %v3630_v18, %v2606_v61  ;;  %v2604_v7 = vsel %vm2603_vm3, %v3628_v56, %v2600_v25 }
 0xe33   :  { %v2635_v21 = vmul.f32 %v2604_v7, %v2567_v11 }
 0xe34   :  { %v2608_v3 = vmul.f32 0.5, %v2607_v46 }
 0xe35   :  { %v2583_v58 = vpop.xlane.xlu0 %2582  ;;  %v2639_v63 = vmul.f32 %v2635_v21, %v1507_v10 }
 0xe36   :  { %v2609_v54 = vsub.f32 1.5, %v2608_v3  ;;  %v2589_v38 = vmul.f32 %v2583_v58, %v4246_v8  ;;  %v1506_v3 = vld [vmem:[#allocation8 + $0x13] ss:$0 sm:$0xff] }
 0xe37   :  { %v4751_v57 = vadd.f32 %v2639_v63, %v1508_v19 }
 0xe38   :  { %v2610_v14 = vmul.f32 %v3630_v18, %v2609_v54  ;;  %v2593_v39 = vadd.f32 1e-05, %v2589_v38 }
 0xe3a   :  { %v2614_v62 = vsel %vm2613_vm7, %v3630_v18, %v2610_v14  ;;  %3631 = vrsqrt.f32 %v2593_v39  ;;  %vm2621_vm9 = vweird.f32 %v2593_v39 }
 0xe3b   :  { %v2636_v36 = vmul.f32 %v2614_v62, %v2568_v4 }
 0xe3d   :  { %v2640_v41 = vmul.f32 %v2636_v36, %v1507_v10  ;;  %v2586_v23 = vpop.xlane.xlu2 %2585 }
 0xe3e   :  { %v2590_v42 = vmul.f32 %v2586_v23, %v4246_v8 }
 0xe3f   :  { %v4753_v43 = vadd.f32 %v2640_v41, %v1508_v19 }
 0xe40   :  { %v3632_v49 = vpop.eup %3631  ;;  %v2594_v48 = vadd.f32 1e-05, %v2590_v42 }
 0xe41   :  { %v2647_v22 = vpack.c.bf16 %v4753_v43, %v4751_v57  ;;  %v2616_v15 = vmul.f32 %v3632_v49, %v2593_v39  ;;  %vm2622_vm8 = vweird.f32 %v3632_v49 }
 0xe42   :  { %3633 = vrsqrt.f32 %v2594_v48  ;;  %vm2623_vm10 = vmor %vm2621_vm9, %vm2622_vm8  ;;  %vm2631_vm12 = vweird.f32 %v2594_v48 }
 0xe43   :  { %v2617_v24 = vmul.f32 %v3632_v49, %v2616_v15  ;;  %3224 = vmatmul.msk.bf16.vlgmr.msra.gmra.mxu2 %vm164_vm0, %v2647_v22 }
 0xe45   :  { %v2618_v11 = vmul.f32 0.5, %v2617_v24 }
 0xe47   :  { %v2619_v52 = vsub.f32 1.5, %v2618_v11 }
 0xe48   :  { %v3634_v0 = vpop.eup %3633 }
 0xe49   :  { %v2620_v32 = vmul.f32 %v3632_v49, %v2619_v52  ;;  %v2626_v4 = vmul.f32 %v3634_v0, %v2594_v48  ;;  %vm2632_vm11 = vweird.f32 %v3634_v0 }
 0xe4a   :  { %vm2633_vm13 = vmor %vm2631_vm12, %vm2632_vm11  ;;  %vm2939_vm12 = vcmask 1041409  }
 0xe4b   :  { %v2627_v31 = vmul.f32 %v3634_v0, %v2626_v4  ;;  %v2624_v53 = vsel %vm2623_vm10, %v3632_v49, %v2620_v32 }
 0xe4c   :  { %v2637_v17 = vmul.f32 %v2624_v53, %v4730_v55  ;;  %v3333_v55 = vld [vmem:[%s4819_s4 + $0x50] sm:$0xff] }
 0xe4d   :  { %v2628_v37 = vmul.f32 0.5, %v2627_v31  ;;  %2783 = vmatpush.bf16.msra.mxu3 %v3333_v55 }
 0xe4e   :  { %v2641_v44 = vmul.f32 %v2637_v17, %v1507_v10 }
 0xe4f   :  { %v2629_v35 = vsub.f32 1.5, %v2628_v37 }
 0xe50   :  { %v2645_v30 = vadd.f32 %v2641_v44, %v1508_v19 }
 0xe51   :  { %v2630_v9 = vmul.f32 %v3634_v0, %v2629_v35 }
 0xe53   :  { %v2634_v45 = vsel %vm2633_vm13, %v3634_v0, %v2630_v9 }
 0xe54   :  { %v2638_v1 = vmul.f32 %v2634_v45, %v4736_v34  ;;  %v3332_v34 = vld [vmem:[%s4819_s4 + $0x48] sm:$0xff]  ;;  %s3790_s4 = smov [#allocation10]  }
 0xe55   :  { %2784 = vmatpush.bf16.msra.mxu3 %v3332_v34  ;;  %s2988_s25 = sshll.u32 %s3790_s4, 4  ;;  %s2989_s25 = int_to_ptr.vmem [resolvable:$true] %s2988_s25 }
 0xe56   :  { %v2642_v16 = vmul.f32 %v2638_v1, %v1507_v10 }
 0xe58   :  { %v2646_v50 = vadd.f32 %v2642_v16, %v1508_v19 }
 0xe59   :  { %2785 = vmatpush.bf16.msra.mxu3 %v3331_v40 }
 0xe5a   :  { %v2648_v12 = vpack.c.bf16 %v2646_v50, %v2645_v30 }
 0xe5c   :  { %3225 = vmatmul.msk.bf16.gmra.mxu2 %vm164_vm0, %v2648_v12 }
 0xec6   :  { %v2697_v59 = vpop.f32.mrf.mxu2 }
 0xec7   :  { %v2698_v26 = vadd.f32 %v2697_v59, %v1505_v6 }
 0xec9   :  { %v2707_v51 = vmax.f32 %v2698_v26, 0.0 }
 0xece   :  { %v2699_v20 = vpop.f32.mrf.mxu2 }
 0xecf   :  { %v2700_v56 = vadd.f32 %v2699_v20, %v1505_v6 }
 0xed1   :  { %v2708_v29 = vmax.f32 %v2700_v56, 0.0 }
 0xed3   :  { %v2711_v27 = vpack.c.bf16 %v2708_v29, %v2707_v51 }
 0xed5   :  { %2786 = vmatmul.bf16.vlgmr.msra.gmra.mxu3 %v2711_v27 }
 0xedf   :  { %v2702_v47 = vpop.f32.mrf.mxu2 }
 0xee0   :  { %v2703_v5 = vadd.f32 %v2702_v47, %v1505_v6 }
 0xee2   :  { %v2709_v61 = vmax.f32 %v2703_v5, 0.0 }
 0xee7   :  { %v2704_v18 = vpop.f32.mrf.mxu2 }
 0xee8   :  { %v2705_v25 = vadd.f32 %v2704_v18, %v1505_v6 }
 0xeea   :  { %v2710_v46 = vmax.f32 %v2705_v25, 0.0 }
 0xeec   :  { %v2712_v7 = vpack.c.bf16 %v2710_v46, %v2709_v61 }
 0xeee   :  { %2791 = vmatmul.bf16.gmra.mxu3 %v2712_v7  ;;  %v1509_v7 = vld [vmem:[#allocation8 + $0x16] ss:$0 sm:$0xff] }
 0xf58   :  { %v2787_v58 = vpop.f32.mrf.mxu3 }
 0xf59   :  { %v2788_v54 = vadd.f32 %v2787_v58, %v1506_v3 }
 0xf5b   :  { %v2797_v38 = vadd.f32 %v2788_v54, %v4751_v57 }
 0xf5d   :  { %v2801_v21 = vsel %vm164_vm0, %v2797_v38, 0.0 }
 0xf5e   :  { %2802 = vadd.xlane.f32.xlu0 %v2801_v21 }
 0xf60   :  { %v2789_v10 = vpop.f32.mrf.mxu3 }
 0xf61   :  { %v2790_v14 = vadd.f32 %v2789_v10, %v1506_v3 }
 0xf63   :  { %v2798_v39 = vadd.f32 %v2790_v14, %v4753_v43  ;;  %v1510_v14 = vld [vmem:[#allocation8 + $0x17] ss:$0 sm:$0xff] }
 0xf65   :  { %v2804_v62 = vsel %vm164_vm0, %v2798_v39, 0.0 }
 0xf66   :  { %2805 = vadd.xlane.f32.xlu1 %v2804_v62 }
 0xf71   :  { %v2792_v63 = vpop.f32.mrf.mxu3 }
 0xf72   :  { %v2793_v36 = vadd.f32 %v2792_v63, %v1506_v3 }
 0xf74   :  { %v2799_v19 = vadd.f32 %v2793_v36, %v2645_v30  ;;  %v3342_v36 = vld [vmem:[#allocation7 + $0x18] sm:$0xff] }
 0xf75   :  { %2973 = vmatpush.bf16.msra.mxu0 %v3342_v36 }
 0xf76   :  { %v2807_v60 = vsel %vm164_vm0, %v2799_v19, 0.0 }
 0xf77   :  { %2808 = vadd.xlane.f32.xlu2 %v2807_v60 }
 0xf79   :  { %v2794_v41 = vpop.f32.mrf.mxu3 }
 0xf7a   :  { %v2795_v23 = vadd.f32 %v2794_v41, %v1506_v3 }
 0xf7c   :  { %v2800_v42 = vadd.f32 %v2795_v23, %v2646_v50 }
 0xf7e   :  { %v2810_v33 = vsel %vm164_vm0, %v2800_v42, 0.0 }
 0xf7f   :  { %2811 = vadd.xlane.f32.xlu0 %v2810_v33 }
 0xfd1   :  { %v2803_v57 = vpop.xlane.xlu0 %2802 }
 0xfd2   :  { %v2813_v49 = vmul.f32 %v2803_v57, %v4246_v8  ;;  %v3789_v57 = vmov 16.0  }
 0xfd4   :  { %v2817_v48 = vsub.f32 %v2797_v38, %v2813_v49 }
 0xfd6   :  { %v2821_v43 = vmul.f32 %v2817_v48, %v2817_v48 }
 0xfd8   :  { %v2825_v22 = vsel %vm164_vm0, %v2821_v43, 0.0 }
 0xfd9   :  { %2826 = vadd.xlane.f32.xlu1 %v2825_v22  ;;  %v2806_v15 = vpop.xlane.xlu1 %2805  ;;  %v3340_v22 = vld [vmem:[#allocation7 + $0x8] sm:$0xff] }
 0xfda   :  { %v2814_v13 = vmul.f32 %v2806_v15, %v4246_v8 }
 0xfdc   :  { %v2818_v24 = vsub.f32 %v2798_v39, %v2814_v13 }
 0xfde   :  { %v2822_v11 = vmul.f32 %v2818_v24, %v2818_v24 }
 0xfe0   :  { %v2828_v28 = vsel %vm164_vm0, %v2822_v11, 0.0 }
 0xfe1   :  { %2829 = vadd.xlane.f32.xlu2 %v2828_v28  ;;  %v3339_v28 = vld [vmem:[#allocation7] sm:$0xff] }
 0xfea   :  { %v2809_v52 = vpop.xlane.xlu2 %2808 }
 0xfeb   :  { %v2815_v0 = vmul.f32 %v2809_v52, %v4246_v8 }
 0xfed   :  { %v4790_v32 = vsub.f32 %v2799_v19, %v2815_v0 }
 0xfef   :  { %v2823_v4 = vmul.f32 %v4790_v32, %v4790_v32 }
 0xff1   :  { %v2831_v31 = vsel %vm164_vm0, %v2823_v4, 0.0 }
 0xff2   :  { %2832 = vadd.xlane.f32.xlu0 %v2831_v31  ;;  %v2812_v53 = vpop.xlane.xlu0 %2811 }
 0xff3   :  { %v2816_v37 = vmul.f32 %v2812_v53, %v4246_v8 }
 0xff5   :  { %v4796_v35 = vsub.f32 %v2800_v42, %v2816_v37  ;;  %v3341_v42 = vld [vmem:[#allocation7 + $0x10] sm:$0xff] }
 0xff6   :  { %2974 = vmatpush.bf16.msra.mxu0 %v3341_v42 }
 0xff7   :  { %v2824_v17 = vmul.f32 %v4796_v35, %v4796_v35 }
 0xff9   :  { %v2834_v9 = vsel %vm164_vm0, %v2824_v17, 0.0 }
 0xffa   :  { %2835 = vadd.xlane.f32.xlu1 %v2834_v9  ;;  %2975 = vmatpush.bf16.msra.mxu0 %v3340_v22 }
 0xffe   :  { %2976 = vmatpush.bf16.msra.mxu0 %v3339_v28 }
0x104c   :  { %v2827_v45 = vpop.xlane.xlu1 %2826 }
0x104d   :  { %v2837_v1 = vmul.f32 %v2827_v45, %v4246_v8 }
0x104f   :  { %v2841_v44 = vadd.f32 1e-05, %v2837_v1 }
0x1051   :  { %3635 = vrsqrt.f32 %v2841_v44  ;;  %vm2851_vm4 = vweird.f32 %v2841_v44 }
0x1054   :  { %v2830_v16 = vpop.xlane.xlu2 %2829 }
0x1055   :  { %v2838_v30 = vmul.f32 %v2830_v16, %v4246_v8 }
0x1057   :  { %v3636_v50 = vpop.eup %3635  ;;  %v2842_v12 = vadd.f32 1e-05, %v2838_v30 }
0x1058   :  { %v2846_v2 = vmul.f32 %v3636_v50, %v2841_v44  ;;  %vm2852_vm14 = vweird.f32 %v3636_v50 }
0x1059   :  { %3637 = vrsqrt.f32 %v2842_v12  ;;  %vm2853_vm1 = vmor %vm2851_vm4, %vm2852_vm14  ;;  %vm2861_vm2 = vweird.f32 %v2842_v12 }
0x105a   :  { %v2847_v55 = vmul.f32 %v3636_v50, %v2846_v2 }
0x105c   :  { %v2848_v34 = vmul.f32 0.5, %v2847_v55 }
0x105e   :  { %v2849_v6 = vsub.f32 1.5, %v2848_v34 }
0x105f   :  { %v3638_v40 = vpop.eup %3637 }
0x1060   :  { %v2856_v59 = vmul.f32 %v3638_v40, %v2842_v12  ;;  %v2850_v56 = vmul.f32 %v3636_v50, %v2849_v6  ;;  %vm2862_vm15 = vweird.f32 %v3638_v40 }
0x1061   :  { %vm2863_vm3 = vmor %vm2861_vm2, %vm2862_vm15 }
0x1062   :  { %v2857_v26 = vmul.f32 %v3638_v40, %v2856_v59  ;;  %v2854_v18 = vsel %vm2853_vm1, %v3636_v50, %v2850_v56 }
0x1063   :  { %v2885_v46 = vmul.f32 %v2854_v18, %v2817_v48 }
0x1064   :  { %v2858_v20 = vmul.f32 0.5, %v2857_v26 }
0x1065   :  { %v2833_v51 = vpop.xlane.xlu0 %2832  ;;  %v2889_v21 = vmul.f32 %v2885_v46, %v1509_v7 }
0x1066   :  { %v2859_v29 = vsub.f32 1.5, %v2858_v20  ;;  %v2839_v27 = vmul.f32 %v2833_v51, %v4246_v8 }
0x1067   :  { %v2893_v19 = vadd.f32 %v2889_v21, %v1510_v14 }
0x1068   :  { %v2860_v47 = vmul.f32 %v3638_v40, %v2859_v29  ;;  %v2843_v5 = vadd.f32 1e-05, %v2839_v27 }
0x106a   :  { %v2864_v25 = vsel %vm2863_vm3, %v3638_v40, %v2860_v47  ;;  %3639 = vrsqrt.f32 %v2843_v5  ;;  %vm2871_vm6 = vweird.f32 %v2843_v5 }
0x106b   :  { %v2886_v61 = vmul.f32 %v2864_v25, %v2818_v24 }
0x106d   :  { %v2836_v3 = vpop.xlane.xlu1 %2835  ;;  %v2890_v58 = vmul.f32 %v2886_v61, %v1509_v7 }
0x106e   :  { %v2840_v54 = vmul.f32 %v2836_v3, %v4246_v8  ;;  %v2897_v8 = vsel %vm164_vm0, %v2893_v19, 0.0 }
0x106f   :  { %v2894_v62 = vadd.f32 %v2890_v58, %v1510_v14  ;;  %v2934_v58 = vld [vmem:[#allocation8 + $0x40] ss:$0 sm:$0xff] }
0x1070   :  { %v3640_v38 = vpop.eup %3639  ;;  %v2844_v10 = vadd.f32 1e-05, %v2840_v54 }
0x1071   :  { %v2866_v39 = vmul.f32 %v3640_v38, %v2843_v5  ;;  %v2898_v41 = vsel %vm164_vm0, %v2894_v62, 0.0  ;;  %vm2872_vm5 = vweird.f32 %v3640_v38 }
0x1072   :  { %3641 = vrsqrt.f32 %v2844_v10  ;;  %v2899_v49 = vadd.f32 %v2898_v41, %v2897_v8  ;;  %vm2873_vm7 = vmor %vm2871_vm6, %vm2872_vm5  ;;  %vm2881_vm9 = vweird.f32 %v2844_v10 }
0x1073   :  { %v2867_v63 = vmul.f32 %v3640_v38, %v2866_v39  ;;  %3643 = vrcp.f32 %v3789_v57 }
0x1074   :  { %v2900_v24 = vrot.slane %v2899_v49, 4 }
0x1075   :  { %v2868_v60 = vmul.f32 0.5, %v2867_v63 }
0x1076   :  { %v2901_v31 = vadd.f32 %v2900_v24, %v2899_v49 }
0x1077   :  { %v2869_v23 = vsub.f32 1.5, %v2868_v60 }
0x1078   :  { %v3642_v33 = vpop.eup %3641  ;;  %v2902_v1 = vrot.slane %v2901_v31, 2 }
0x1079   :  { %v2870_v48 = vmul.f32 %v3640_v38, %v2869_v23  ;;  %v2876_v43 = vmul.f32 %v3642_v33, %v2844_v10  ;;  %v3644_v52 = vpop.eup %3643  ;;  %vm2882_vm8 = vweird.f32 %v3642_v33 }
0x107a   :  { %vm2883_vm10 = vmor %vm2881_vm9, %vm2882_vm8  ;;  %v2916_v17 = vmul.f32 16.0, %v3644_v52  ;;  %v2903_v12 = vadd.f32 %v2902_v1, %v2901_v31  ;;  %vm2920_vm11 = vweird.f32 %v3644_v52 }
0x107b   :  { %v2874_v15 = vsel %vm2873_vm7, %v3640_v38, %v2870_v48  ;;  %v2877_v13 = vmul.f32 %v3642_v33, %v2876_v43 }
0x107c   :  { %v2887_v0 = vmul.f32 %v2874_v15, %v4790_v32  ;;  %v2917_v30 = vsub.f32 1.0, %v2916_v17  ;;  %v2904_v40 = vrot.slane %v2903_v12, 1 }
0x107d   :  { %v2878_v11 = vmul.f32 0.5, %v2877_v13 }
0x107e   :  { %v2891_v37 = vmul.f32 %v2887_v0, %v1509_v7  ;;  %v2918_v55 = vmul.f32 %v3644_v52, %v2917_v30  ;;  %v2905_v20 = vadd.f32 %v2904_v40, %v2903_v12 }
0x107f   :  { %v2879_v4 = vsub.f32 1.5, %v2878_v11 }
0x1080   :  { %v2895_v44 = vadd.f32 %v2891_v37, %v1510_v14  ;;  %v2919_v6 = vadd.f32 %v3644_v52, %v2918_v55 }
0x1081   :  { %v2880_v53 = vmul.f32 %v3642_v33, %v2879_v4 }
0x1082   :  { %v2906_v32 = vsel %vm164_vm0, %v2895_v44, 0.0 }
0x1083   :  { %v2884_v9 = vsel %vm2883_vm10, %v3642_v33, %v2880_v53 }
0x1084   :  { %v2888_v45 = vmul.f32 %v2884_v9, %v4796_v35  ;;  %v2921_v35 = vsel %vm2920_vm11, %v3644_v52, %v2919_v6 }
0x1085   :  { %v2922_v27 = vmul.f32 %v2921_v35, %v2905_v20 }
0x1086   :  { %v2892_v16 = vmul.f32 %v2888_v45, %v1509_v7 }
0x1087   :  { %v2924_v18 = vpack.c.bf16 %v2922_v27, %v2922_v27 }
0x1088   :  { %v2896_v50 = vadd.f32 %v2892_v16, %v1510_v14 }
0x1089   :  { %v2937_v61 = vunpack.c.l.b16 %v2924_v18 }
0x108a   :  { %v2907_v2 = vsel %vm164_vm0, %v2896_v50, 0.0 }
0x108b   :  { %v2908_v34 = vadd.f32 %v2907_v2, %v2906_v32 }
0x108d   :  { %v2909_v59 = vrot.slane %v2908_v34, 4 }
0x108f   :  { %v2910_v26 = vadd.f32 %v2909_v59, %v2908_v34 }
0x1091   :  { %v2911_v56 = vrot.slane %v2910_v26, 2 }
0x1093   :  { %v2912_v51 = vadd.f32 %v2911_v56, %v2910_v26 }
0x1095   :  { %v2913_v29 = vrot.slane %v2912_v51, 1 }
0x1097   :  { %v2914_v47 = vadd.f32 %v2913_v29, %v2912_v51 }
0x1099   :  { %v2923_v5 = vmul.f32 %v2921_v35, %v2914_v47 }
0x109b   :  { %v2925_v25 = vpack.c.bf16 %v2923_v5, %v2923_v5 }
0x109d   :  { %v2938_v46 = vunpack.c.l.b16 %v2925_v25 }
0x109f   :  { %v2940_v7 = vsel %vm2939_vm12, %v2938_v46, %v2937_v61 }
0x10a0   :  { %v2941_v3 = vpack.c.b16 %v2940_v7, %v2940_v7 }
0x10a2   :  { %3290 = vmatmul.msk.bf16.vlgmr.msra.gmra.mxu0 %vm164_vm0, %v2941_v3 }
0x111f   :  { %v2978_v54 = vpop.f32.mrf.mxu0 }
0x1120   :  { %v2979_v38 = vadd.f32 %v2978_v54, %v2934_v58 }
0x1122   :  { %2982 = vst [vmem:[#allocation10] sm:$0x3] %v2979_v38 }
0x1123   :  { %2993 = dma.vmem_to_hbm [thread:$0]  %s2989_s25, 32, %s2991_s27, [#allocation4]  }
0x1127   :  { %v2980_v21 = vpop.f32.mrf.mxu0 }
0x1128   :  { %3771 = dma.done.wait [#allocation4], 32  }
0x1129   :  { %3772 = vsyncadd [#allocation4], 4294967264 }
0x112a   :  { %2998 = vsyncpa [#allocation3], 1 }
0x112b   :  { %2999 = vsyncpa [#allocation6], 1 }
0x112c   :  { %3000 = vsyncpa [#allocation9], 1 }
0x112d   :  { %3001 = vsyncpa [#allocation4], 1 }

</bundles_post_ra>
